<compile_context>
chip_gen: v5e
topology: v5e:2x2
jax: 0.10.0
libtpu: 0.0.40
codegen_flags: <defaults>
</compile_context>

<pallas_src>
import functools

import numpy as np
import jax
import jax.numpy as jnp
from jax.experimental import pallas as pl
from jax.experimental.pallas import tpu as pltpu


# ----------------------------------------------------------------------------
# DEEP_TRANSFER default configuration
# ----------------------------------------------------------------------------
BASE_FILTERS = [32, 32, 64, 64, 128, 128]
KERNEL_SIZE = [3, 3, 3, 3, 3, 3]
STRIDE = [2, 1, 2, 1, 2, 1]
DENSE_DIMS = [128]
N_FC_LAYERS = 2
FC_DIMS = 128
OUTPUT_CLASSES = 10

_VMEM_LIMIT = 48 * 1024 * 1024       # explicit scoped-VMEM cap (safe on v5e/v6e/v7x)


def _round_up(x, m):
    return (x + m - 1) // m * m


# ----------------------------------------------------------------------------
# Pallas kernel 1: fused 3x3 "same" conv + bias + ReLU (one image per grid step)
# ----------------------------------------------------------------------------
def _conv_taps_kernel(x_ref, w_ref, b_ref, o_ref, *, taps, stride, wp, m):
    """x_ref: (1, s, L, C) bf16  row-phase-split, row-flattened, zero-padded image
       w_ref: (k*k, C, O) bf16   tap-major weights (resident across the grid)
       b_ref: (1, O) f32
       o_ref: (1, m, O) bf16     m = Ho * Wp; row r = ho*Wp + w~ is the conv result
                                 at output row ho, pre-subsample column w~.
    For tap (ki, kj) the pixels needed by all m output positions form ONE contiguous
    slice of phase (ki % s) starting at (ki // s) * Wp + kj  -> clean 2-D matmuls,
    no strided loads and no in-kernel reshapes."""
    acc = None
    for t, (ki, kj) in enumerate(taps):
        start = (ki // stride) * wp + kj                          # static per tap
        xs = x_ref[0, ki % stride, pl.ds(start, m), :]            # (m, C) contiguous
        part = jnp.dot(xs, w_ref[t], preferred_element_type=jnp.float32)
        acc = part if acc is None else acc + part
    acc = jnp.maximum(acc + b_ref[...], 0.0)                      # f32 epilogue
    o_ref[0, :, :] = acc.astype(o_ref.dtype)


def conv3x3_relu(x, w_taps, b, stride):
    """NHWC 'same' conv (k=3, pad=1, PyTorch alignment) + bias + ReLU.
    x: (N, H, W, C) bf16; w_taps: (9, C, O) bf16; b: (1, O) f32 -> (N, Ho, Wo, O) bf16."""
    n, h, w, c = x.shape
    kk, _, o = w_taps.shape
    k = KERNEL_SIZE[0]
    assert kk == k * k
    s = stride
    p = k // 2
    ho = (h + 2 * p - k) // s + 1
    wo = (w + 2 * p - k) // s + 1
    wp = w + 2 * p

    # Single fused zero-pad: conv rows/cols + phase alignment + ONE guard row per
    # phase (covers the <=2 wrap-around elements the flattened tap slices can read).
    extra = (-(h + 2 * p)) % s
    xp = jnp.pad(x, ((0, 0), (p, p + extra + s), (p, p), (0, 0)))
    hq = (h + 2 * p + extra) // s + 1            # rows per phase, incl. guard row
    length = hq * wp
    m = ho * wp                                  # matmul M per image (garbage cols cropped below)

    # row-phase split (phase = padded_row % s), flatten (row, col).
    if s == 1:                                   # phase split is a pure reshape
        xph = xp.reshape(n, 1, length, c)
    else:
        xph = jnp.transpose(xp.reshape(n, hq, s, wp, c), (0, 2, 1, 3, 4))
        xph = xph.reshape(n, s, length, c)

    taps = [(ki, kj) for ki in range(k) for kj in range(k)]
    kernel = functools.partial(_conv_taps_kernel, taps=taps, stride=s, wp=wp, m=m)
    flops = 2 * n * m * c * o * len(taps)
    bytes_accessed = (xph.size * xph.dtype.itemsize + w_taps.size * 2
                      + b.size * 4 + n * m * o * 2)

    out_flat = pl.pallas_call(
        kernel,
        out_shape=jax.ShapeDtypeStruct((n, m, o), jnp.bfloat16),
        grid=(n,),
        in_specs=[
            pl.BlockSpec((1, s, length, c), lambda i: (i, 0, 0, 0)),
            pl.BlockSpec((k * k, c, o), lambda i: (0, 0, 0)),     # resident weights
            pl.BlockSpec((1, o), lambda i: (0, 0)),
        ],
        out_specs=pl.BlockSpec((1, m, o), lambda i: (i, 0, 0)),
        compiler_params=pltpu.CompilerParams(
            dimension_semantics=("parallel",),
            vmem_limit_bytes=_VMEM_LIMIT),
        cost_estimate=pl.CostEstimate(flops=flops, transcendentals=0,
                                      bytes_accessed=bytes_accessed),
    )(xph, w_taps, b)

    # restore (Ho, Wp), drop the k-1 wrap-around columns, apply the column stride
    out = out_flat.reshape(n, ho, wp, o)[:, :, 0:s * (wo - 1) + 1:s, :]
    return out                        # (N, Ho, Wo, O) NHWC bf16


# ----------------------------------------------------------------------------
# Pallas kernel 2: fused DENSE_BLOCK + CLASSIFIER (all weights resident in VMEM)
# ----------------------------------------------------------------------------
def _dense_stack_kernel(x_ref, w0_ref, b0_ref, w1_ref, b1_ref, w2_ref, b2_ref,
                        wo_ref, bo_ref, hd_ref, y_ref):
    # DENSE_BLOCK layer (flatten -> 128, ReLU); its activation is a module output
    h = jnp.dot(x_ref[...], w0_ref[...], preferred_element_type=jnp.float32)
    h = jnp.maximum(h + b0_ref[...], 0.0)
    hd_ref[...] = h.astype(hd_ref.dtype)
    # CLASSIFIER: 2 hidden FC layers (ReLU) + linear output layer
    # TODO(synk): dropout(p=0.5) after each hidden FC omitted (inference identity).
    t = h.astype(jnp.bfloat16)
    t = jnp.dot(t, w1_ref[...], preferred_element_type=jnp.float32)
    t = jnp.maximum(t + b1_ref[...], 0.0).astype(jnp.bfloat16)
    t = jnp.dot(t, w2_ref[...], preferred_element_type=jnp.float32)
    t = jnp.maximum(t + b2_ref[...], 0.0).astype(jnp.bfloat16)
    y_ref[...] = jnp.dot(t, wo_ref[...], preferred_element_type=jnp.float32) + bo_ref[...]


def dense_classifier_stack(hf, prep):
    """One pallas_call for DENSE_BLOCK (1 layer) + CLASSIFIER (2 FC + out), tiled over batch."""
    assert len(prep["dense"]) == 1 and len(prep["clf_fc"]) == 2
    (w0, b0), = prep["dense"]
    (w1, b1), (w2, b2) = prep["clf_fc"]
    wo, bo = prep["clf_out"]
    m, kdim = hf.shape
    d = w0.shape[1]
    n_out = wo.shape[1]

    tm = 256 if m > 256 else _round_up(m, 8)
    mp = _round_up(m, tm)
    xb = hf.astype(jnp.bfloat16)
    if mp != m:
        xb = jnp.pad(xb, ((0, mp - m), (0, 0)))

    flops = 2 * mp * (kdim * d + d * d * 2 + d * n_out)
    bytes_accessed = (xb.size * 2 + (w0.size + w1.size + w2.size + wo.size) * 2
                      + (b0.size + b1.size + b2.size + bo.size) * 4
                      + mp * d * 2 + mp * n_out * 4)

    hd, y = pl.pallas_call(
        _dense_stack_kernel,
        out_shape=(jax.ShapeDtypeStruct((mp, d), jnp.bfloat16),
                   jax.ShapeDtypeStruct((mp, n_out), jnp.float32)),
        grid=(mp // tm,),
        in_specs=[
            pl.BlockSpec((tm, kdim), lambda i: (i, 0)),
            pl.BlockSpec((kdim, d), lambda i: (0, 0)),
            pl.BlockSpec((1, d), lambda i: (0, 0)),
            pl.BlockSpec((d, d), lambda i: (0, 0)),
            pl.BlockSpec((1, d), lambda i: (0, 0)),
            pl.BlockSpec((d, d), lambda i: (0, 0)),
            pl.BlockSpec((1, d), lambda i: (0, 0)),
            pl.BlockSpec((d, n_out), lambda i: (0, 0)),
            pl.BlockSpec((1, n_out), lambda i: (0, 0)),
        ],
        out_specs=(pl.BlockSpec((tm, d), lambda i: (i, 0)),
                   pl.BlockSpec((tm, n_out), lambda i: (i, 0))),
        compiler_params=pltpu.CompilerParams(
            dimension_semantics=("parallel",),
            vmem_limit_bytes=_VMEM_LIMIT),
        cost_estimate=pl.CostEstimate(flops=flops, transcendentals=0,
                                      bytes_accessed=bytes_accessed),
    )(xb, w0, b0, w1, b1, w2, b2, wo, bo)
    return hd[:m], y[:m]


# ----------------------------------------------------------------------------
# parameters: PyTorch-layout init + one-time kernel-layout preparation
# ----------------------------------------------------------------------------
def _conv_out_dim(d, k, s):
    return (d + 2 * (k // 2) - k) // s + 1


def init_params(key, input_shape):
    """PyTorch-layout parameters (conv weight (O, C, kh, kw), dense (in, out))."""
    c_in, h, w = input_shape
    params = {"conv": [], "dense_block": [], "clf_fc": []}
    keys = jax.random.split(key, 16)
    ki = 0
    ch = c_in
    for f, k, s in zip(BASE_FILTERS, KERNEL_SIZE, STRIDE):
        fan_in = ch * k * k
        wgt = jax.random.normal(keys[ki], (f, ch, k, k), jnp.float32) / jnp.sqrt(fan_in)
        params["conv"].append((wgt, jnp.zeros((f,), jnp.float32)))
        ki += 1
        ch = f
        h, w = _conv_out_dim(h, k, s), _conv_out_dim(w, k, s)
    flatten_dims = ch * h * w

    d_in = flatten_dims
    for d_out in DENSE_DIMS:
        wgt = jax.random.normal(keys[ki], (d_in, d_out), jnp.float32) / jnp.sqrt(d_in)
        params["dense_block"].append((wgt, jnp.zeros((d_out,), jnp.float32)))
        ki += 1
        d_in = d_out

    d_in = DENSE_DIMS[-1]
    for _ in range(N_FC_LAYERS):
        wgt = jax.random.normal(keys[ki], (d_in, FC_DIMS), jnp.float32) / jnp.sqrt(d_in)
        params["clf_fc"].append((wgt, jnp.zeros((FC_DIMS,), jnp.float32)))
        ki += 1
        d_in = FC_DIMS
    wgt = jax.random.normal(keys[ki], (d_in, OUTPUT_CLASSES), jnp.float32) / jnp.sqrt(d_in)
    params["clf_out"] = (wgt, jnp.zeros((OUTPUT_CLASSES,), jnp.float32))
    return params


def prepare_params(params):
    """One-time dtype/layout prep (outside jit): conv weights tap-major (k*k, C, O) bf16,
    dense weights bf16, biases f32 (1, O). Nothing is rebuilt per forward call."""
    prep = {"conv": [], "dense": [], "clf_fc": []}
    for wgt, bia in params["conv"]:
        o, c, kh, kw = wgt.shape
        w_taps = jnp.transpose(wgt, (2, 3, 1, 0)).reshape(kh * kw, c, o)
        prep["conv"].append((w_taps.astype(jnp.bfloat16),
                             bia.reshape(1, o).astype(jnp.float32)))
    for wgt, bia in params["dense_block"]:
        prep["dense"].append((wgt.astype(jnp.bfloat16),
                              bia.reshape(1, -1).astype(jnp.float32)))
    for wgt, bia in params["clf_fc"]:
        prep["clf_fc"].append((wgt.astype(jnp.bfloat16),
                               bia.reshape(1, -1).astype(jnp.float32)))
    wgt, bia = params["clf_out"]
    prep["clf_out"] = (wgt.astype(jnp.bfloat16), bia.reshape(1, -1).astype(jnp.float32))
    return prep


# ----------------------------------------------------------------------------
# DEEP_TRANSFER forward (hasDecoder=False, hasAdversial=False)
# ----------------------------------------------------------------------------
@jax.jit
def deep_transfer_forward(prep, x):
    """x: (N, C, H, W) f32 NCHW (PyTorch boundary layout).
    Returns (h_conv tuple [NCHW, bf16], h_dense tuple [bf16], y_task [f32])."""
    h = jnp.transpose(x, (0, 2, 3, 1)).astype(jnp.bfloat16)      # NHWC, bf16 internally
    h_conv_nhwc = []
    for (w_taps, b), s in zip(prep["conv"], STRIDE):
        h = conv3x3_relu(h, w_taps, b, stride=s)
        h_conv_nhwc.append(h)
    # NCHW only for the returned activations / the PyTorch-order flatten
    h_conv = tuple(jnp.transpose(a, (0, 3, 1, 2)) for a in h_conv_nhwc)
    hf = h_conv[-1].reshape(h_conv[-1].shape[0], -1)             # (N, C*H*W), torch order
    h_dense_last, y_task = dense_classifier_stack(hf, prep)
    return h_conv, (h_dense_last,), y_task


# ----------------------------------------------------------------------------
# pure-JAX reference (validation only; mirrors the same bf16 weights/casts)
# ----------------------------------------------------------------------------
def reference_forward(prep, x):
    k, p = KERNEL_SIZE[0], KERNEL_SIZE[0] // 2
    h = jnp.transpose(x, (0, 2, 3, 1)).astype(jnp.bfloat16)
    h_conv_nhwc = []
    for (w_taps, b), s in zip(prep["conv"], STRIDE):
        c, o = w_taps.shape[1], w_taps.shape[2]
        w4 = w_taps.reshape(k, k, c, o).astype(jnp.float32)      # HWIO
        y = jax.lax.conv_general_dilated(
            h.astype(jnp.float32), w4, window_strides=(s, s),
            padding=((p, p), (p, p)),
            dimension_numbers=("NHWC", "HWIO", "NHWC"))
        y = jnp.maximum(y + b.reshape(1, 1, 1, o), 0.0)
        h = y.astype(jnp.bfloat16)
        h_conv_nhwc.append(h)
    h_conv = tuple(jnp.transpose(a, (0, 3, 1, 2)) for a in h_conv_nhwc)
    hf = h_conv[-1].reshape(h_conv[-1].shape[0], -1).astype(jnp.bfloat16)

    (w0, b0), = prep["dense"]
    hd = jnp.maximum(jnp.dot(hf, w0, preferred_element_type=jnp.float32) + b0, 0.0)
    hd_bf16 = hd.astype(jnp.bfloat16)
    t = hd_bf16
    for w, b in prep["clf_fc"]:
        t = jnp.maximum(jnp.dot(t, w, preferred_element_type=jnp.float32) + b, 0.0)
        t = t.astype(jnp.bfloat16)
    wo, bo = prep["clf_out"]
    y_task = jnp.dot(t, wo, preferred_element_type=jnp.float32) + bo
    return h_conv, (hd_bf16,), y_task


if __name__ == "__main__":
    key = jax.random.PRNGKey(0)
    kp, kx = jax.random.split(key)

    input_shape = (3, 16, 16)        # small variant of the default (3, 64, 64)
    batch = 2
    params = init_params(kp, input_shape)
    prep = prepare_params(params)    # one-time layout/dtype prep (outside jit)
    x = jax.random.normal(kx, (batch,) + input_shape, jnp.float32)

    h_conv, h_dense, y_task = deep_transfer_forward(prep, x)
    jax.block_until_ready((h_conv, h_dense, y_task))

    assert len(h_conv) == 6
    assert h_conv[-1].shape == (batch, 128, 2, 2)
    assert h_dense[-1].shape == (batch, 128)
    assert y_task.shape == (batch, OUTPUT_CLASSES)

    # numerical check against a pure-JAX mirror using identical bf16 weights/casts
    r_conv, r_dense, r_y = reference_forward(prep, x)
    np.testing.assert_allclose(np.asarray(h_conv[0].astype(jnp.float32)),
                               np.asarray(r_conv[0].astype(jnp.float32)),
                               rtol=1e-2, atol=1e-2)
    np.testing.assert_allclose(np.asarray(h_conv[-1].astype(jnp.float32)),
                               np.asarray(r_conv[-1].astype(jnp.float32)),
                               rtol=1e-2, atol=1e-2)
    np.testing.assert_allclose(np.asarray(h_dense[-1].astype(jnp.float32)),
                               np.asarray(r_dense[-1].astype(jnp.float32)),
                               rtol=1e-2, atol=1e-2)
    np.testing.assert_allclose(np.asarray(y_task), np.asarray(r_y),
                               rtol=1e-2, atol=1e-2)

    print("KERNEL_OK")
</pallas_src>

<mosaic_0001>
module attributes {stable_mosaic.version = 11 : i64} {
  func.func @_conv_taps_kernel(%arg0: i32, %arg1: memref<1x2x180x3xbf16, #tpu.memory_space<vmem>>, %arg2: memref<9x3x32xbf16, #tpu.memory_space<vmem>>, %arg3: memref<1x32xf32, #tpu.memory_space<vmem>>, %arg4: memref<1x144x32xbf16, #tpu.memory_space<vmem>>) attributes {dimension_semantics = [#tpu.dimension_semantics<parallel>], iteration_bounds = array<i64: 2>, scalar_prefetch = 0 : i64, scratch_operands = 0 : i64, tpu.core_type = #tpu.core_type<tc>, window_params = [{transform_indices = @transform_0, window_bounds = array<i64: 1, 2, 180, 3>}, {pipeline_mode = #tpu.pipeline_mode<synchronous>, transform_indices = @transform_1, window_bounds = array<i64: 9, 3, 32>}, {pipeline_mode = #tpu.pipeline_mode<synchronous>, transform_indices = @transform_2, window_bounds = array<i64: 1, 32>}, {transform_indices = @transform_3, window_bounds = array<i64: 1, 144, 32>}]} {
    %c0 = arith.constant 0 : index
    %c0_0 = arith.constant 0 : index
    %c0_1 = arith.constant 0 : index
    %c0_2 = arith.constant 0 : index
    %0 = vector.load %arg1[%c0, %c0_0, %c0_1, %c0_2] : memref<1x2x180x3xbf16, #tpu.memory_space<vmem>>, vector<1x1x144x3xbf16>
    %1 = vector.shape_cast %0 : vector<1x1x144x3xbf16> to vector<144x3xbf16>
    %c0_3 = arith.constant 0 : index
    %c0_4 = arith.constant 0 : index
    %c0_5 = arith.constant 0 : index
    %2 = vector.load %arg2[%c0_3, %c0_4, %c0_5] : memref<9x3x32xbf16, #tpu.memory_space<vmem>>, vector<1x3x32xbf16>
    %3 = vector.shape_cast %2 : vector<1x3x32xbf16> to vector<3x32xbf16>
    %cst = arith.constant dense<0.000000e+00> : vector<144x32xf32>
    %4 = tpu.matmul %1, %3, %cst {dimension_numbers = #tpu.dot_dimension_numbers<[1], [0], [0], [1], [0, 0, 1, 1], [], []>} : vector<144x3xbf16>, vector<3x32xbf16>, vector<144x32xf32> -> vector<144x32xf32>
    %c0_6 = arith.constant 0 : index
    %c0_7 = arith.constant 0 : index
    %c1 = arith.constant 1 : index
    %c0_8 = arith.constant 0 : index
    %5 = vector.load %arg1[%c0_6, %c0_7, %c1, %c0_8] : memref<1x2x180x3xbf16, #tpu.memory_space<vmem>>, vector<1x1x144x3xbf16>
    %6 = vector.shape_cast %5 : vector<1x1x144x3xbf16> to vector<144x3xbf16>
    %c1_9 = arith.constant 1 : index
    %c0_10 = arith.constant 0 : index
    %c0_11 = arith.constant 0 : index
    %7 = vector.load %arg2[%c1_9, %c0_10, %c0_11] : memref<9x3x32xbf16, #tpu.memory_space<vmem>>, vector<1x3x32xbf16>
    %8 = vector.shape_cast %7 : vector<1x3x32xbf16> to vector<3x32xbf16>
    %cst_12 = arith.constant dense<0.000000e+00> : vector<144x32xf32>
    %9 = tpu.matmul %6, %8, %cst_12 {dimension_numbers = #tpu.dot_dimension_numbers<[1], [0], [0], [1], [0, 0, 1, 1], [], []>} : vector<144x3xbf16>, vector<3x32xbf16>, vector<144x32xf32> -> vector<144x32xf32>
    %10 = arith.addf %4, %9 : vector<144x32xf32>
    %c0_13 = arith.constant 0 : index
    %c0_14 = arith.constant 0 : index
    %c2 = arith.constant 2 : index
    %c0_15 = arith.constant 0 : index
    %11 = vector.load %arg1[%c0_13, %c0_14, %c2, %c0_15] : memref<1x2x180x3xbf16, #tpu.memory_space<vmem>>, vector<1x1x144x3xbf16>
    %12 = vector.shape_cast %11 : vector<1x1x144x3xbf16> to vector<144x3xbf16>
    %c2_16 = arith.constant 2 : index
    %c0_17 = arith.constant 0 : index
    %c0_18 = arith.constant 0 : index
    %13 = vector.load %arg2[%c2_16, %c0_17, %c0_18] : memref<9x3x32xbf16, #tpu.memory_space<vmem>>, vector<1x3x32xbf16>
    %14 = vector.shape_cast %13 : vector<1x3x32xbf16> to vector<3x32xbf16>
    %cst_19 = arith.constant dense<0.000000e+00> : vector<144x32xf32>
    %15 = tpu.matmul %12, %14, %cst_19 {dimension_numbers = #tpu.dot_dimension_numbers<[1], [0], [0], [1], [0, 0, 1, 1], [], []>} : vector<144x3xbf16>, vector<3x32xbf16>, vector<144x32xf32> -> vector<144x32xf32>
    %16 = arith.addf %10, %15 : vector<144x32xf32>
    %c0_20 = arith.constant 0 : index
    %c1_21 = arith.constant 1 : index
    %c0_22 = arith.constant 0 : index
    %c0_23 = arith.constant 0 : index
    %17 = vector.load %arg1[%c0_20, %c1_21, %c0_22, %c0_23] : memref<1x2x180x3xbf16, #tpu.memory_space<vmem>>, vector<1x1x144x3xbf16>
    %18 = vector.shape_cast %17 : vector<1x1x144x3xbf16> to vector<144x3xbf16>
    %c3 = arith.constant 3 : index
    %c0_24 = arith.constant 0 : index
    %c0_25 = arith.constant 0 : index
    %19 = vector.load %arg2[%c3, %c0_24, %c0_25] : memref<9x3x32xbf16, #tpu.memory_space<vmem>>, vector<1x3x32xbf16>
    %20 = vector.shape_cast %19 : vector<1x3x32xbf16> to vector<3x32xbf16>
    %cst_26 = arith.constant dense<0.000000e+00> : vector<144x32xf32>
    %21 = tpu.matmul %18, %20, %cst_26 {dimension_numbers = #tpu.dot_dimension_numbers<[1], [0], [0], [1], [0, 0, 1, 1], [], []>} : vector<144x3xbf16>, vector<3x32xbf16>, vector<144x32xf32> -> vector<144x32xf32>
    %22 = arith.addf %16, %21 : vector<144x32xf32>
    %c0_27 = arith.constant 0 : index
    %c1_28 = arith.constant 1 : index
    %c1_29 = arith.constant 1 : index
    %c0_30 = arith.constant 0 : index
    %23 = vector.load %arg1[%c0_27, %c1_28, %c1_29, %c0_30] : memref<1x2x180x3xbf16, #tpu.memory_space<vmem>>, vector<1x1x144x3xbf16>
    %24 = vector.shape_cast %23 : vector<1x1x144x3xbf16> to vector<144x3xbf16>
    %c4 = arith.constant 4 : index
    %c0_31 = arith.constant 0 : index
    %c0_32 = arith.constant 0 : index
    %25 = vector.load %arg2[%c4, %c0_31, %c0_32] : memref<9x3x32xbf16, #tpu.memory_space<vmem>>, vector<1x3x32xbf16>
    %26 = vector.shape_cast %25 : vector<1x3x32xbf16> to vector<3x32xbf16>
    %cst_33 = arith.constant dense<0.000000e+00> : vector<144x32xf32>
    %27 = tpu.matmul %24, %26, %cst_33 {dimension_numbers = #tpu.dot_dimension_numbers<[1], [0], [0], [1], [0, 0, 1, 1], [], []>} : vector<144x3xbf16>, vector<3x32xbf16>, vector<144x32xf32> -> vector<144x32xf32>
    %28 = arith.addf %22, %27 : vector<144x32xf32>
    %c0_34 = arith.constant 0 : index
    %c1_35 = arith.constant 1 : index
    %c2_36 = arith.constant 2 : index
    %c0_37 = arith.constant 0 : index
    %29 = vector.load %arg1[%c0_34, %c1_35, %c2_36, %c0_37] : memref<1x2x180x3xbf16, #tpu.memory_space<vmem>>, vector<1x1x144x3xbf16>
    %30 = vector.shape_cast %29 : vector<1x1x144x3xbf16> to vector<144x3xbf16>
    %c5 = arith.constant 5 : index
    %c0_38 = arith.constant 0 : index
    %c0_39 = arith.constant 0 : index
    %31 = vector.load %arg2[%c5, %c0_38, %c0_39] : memref<9x3x32xbf16, #tpu.memory_space<vmem>>, vector<1x3x32xbf16>
    %32 = vector.shape_cast %31 : vector<1x3x32xbf16> to vector<3x32xbf16>
    %cst_40 = arith.constant dense<0.000000e+00> : vector<144x32xf32>
    %33 = tpu.matmul %30, %32, %cst_40 {dimension_numbers = #tpu.dot_dimension_numbers<[1], [0], [0], [1], [0, 0, 1, 1], [], []>} : vector<144x3xbf16>, vector<3x32xbf16>, vector<144x32xf32> -> vector<144x32xf32>
    %34 = arith.addf %28, %33 : vector<144x32xf32>
    %c0_41 = arith.constant 0 : index
    %c0_42 = arith.constant 0 : index
    %c18 = arith.constant 18 : index
    %c0_43 = arith.constant 0 : index
    %35 = vector.load %arg1[%c0_41, %c0_42, %c18, %c0_43] : memref<1x2x180x3xbf16, #tpu.memory_space<vmem>>, vector<1x1x144x3xbf16>
    %36 = vector.shape_cast %35 : vector<1x1x144x3xbf16> to vector<144x3xbf16>
    %c6 = arith.constant 6 : index
    %c0_44 = arith.constant 0 : index
    %c0_45 = arith.constant 0 : index
    %37 = vector.load %arg2[%c6, %c0_44, %c0_45] : memref<9x3x32xbf16, #tpu.memory_space<vmem>>, vector<1x3x32xbf16>
    %38 = vector.shape_cast %37 : vector<1x3x32xbf16> to vector<3x32xbf16>
    %cst_46 = arith.constant dense<0.000000e+00> : vector<144x32xf32>
    %39 = tpu.matmul %36, %38, %cst_46 {dimension_numbers = #tpu.dot_dimension_numbers<[1], [0], [0], [1], [0, 0, 1, 1], [], []>} : vector<144x3xbf16>, vector<3x32xbf16>, vector<144x32xf32> -> vector<144x32xf32>
    %40 = arith.addf %34, %39 : vector<144x32xf32>
    %c0_47 = arith.constant 0 : index
    %c0_48 = arith.constant 0 : index
    %c19 = arith.constant 19 : index
    %c0_49 = arith.constant 0 : index
    %41 = vector.load %arg1[%c0_47, %c0_48, %c19, %c0_49] : memref<1x2x180x3xbf16, #tpu.memory_space<vmem>>, vector<1x1x144x3xbf16>
    %42 = vector.shape_cast %41 : vector<1x1x144x3xbf16> to vector<144x3xbf16>
    %c7 = arith.constant 7 : index
    %c0_50 = arith.constant 0 : index
    %c0_51 = arith.constant 0 : index
    %43 = vector.load %arg2[%c7, %c0_50, %c0_51] : memref<9x3x32xbf16, #tpu.memory_space<vmem>>, vector<1x3x32xbf16>
    %44 = vector.shape_cast %43 : vector<1x3x32xbf16> to vector<3x32xbf16>
    %cst_52 = arith.constant dense<0.000000e+00> : vector<144x32xf32>
    %45 = tpu.matmul %42, %44, %cst_52 {dimension_numbers = #tpu.dot_dimension_numbers<[1], [0], [0], [1], [0, 0, 1, 1], [], []>} : vector<144x3xbf16>, vector<3x32xbf16>, vector<144x32xf32> -> vector<144x32xf32>
    %46 = arith.addf %40, %45 : vector<144x32xf32>
    %c0_53 = arith.constant 0 : index
    %c0_54 = arith.constant 0 : index
    %c20 = arith.constant 20 : index
    %c0_55 = arith.constant 0 : index
    %47 = vector.load %arg1[%c0_53, %c0_54, %c20, %c0_55] : memref<1x2x180x3xbf16, #tpu.memory_space<vmem>>, vector<1x1x144x3xbf16>
    %48 = vector.shape_cast %47 : vector<1x1x144x3xbf16> to vector<144x3xbf16>
    %c8 = arith.constant 8 : index
    %c0_56 = arith.constant 0 : index
    %c0_57 = arith.constant 0 : index
    %49 = vector.load %arg2[%c8, %c0_56, %c0_57] : memref<9x3x32xbf16, #tpu.memory_space<vmem>>, vector<1x3x32xbf16>
    %50 = vector.shape_cast %49 : vector<1x3x32xbf16> to vector<3x32xbf16>
    %cst_58 = arith.constant dense<0.000000e+00> : vector<144x32xf32>
    %51 = tpu.matmul %48, %50, %cst_58 {dimension_numbers = #tpu.dot_dimension_numbers<[1], [0], [0], [1], [0, 0, 1, 1], [], []>} : vector<144x3xbf16>, vector<3x32xbf16>, vector<144x32xf32> -> vector<144x32xf32>
    %52 = arith.addf %46, %51 : vector<144x32xf32>
    %c0_59 = arith.constant 0 : index
    %c0_60 = arith.constant 0 : index
    %53 = vector.load %arg3[%c0_59, %c0_60] : memref<1x32xf32, #tpu.memory_space<vmem>>, vector<1x32xf32>
    %54 = vector.broadcast %53 : vector<1x32xf32> to vector<144x32xf32>
    %55 = arith.addf %52, %54 : vector<144x32xf32>
    %cst_61 = arith.constant 0.000000e+00 : f32
    %56 = vector.broadcast %cst_61 : f32 to vector<144x32xf32>
    %57 = arith.maximumf %55, %56 : vector<144x32xf32>
    %58 = arith.truncf %57 : vector<144x32xf32> to vector<144x32xbf16>
    %c0_62 = arith.constant 0 : index
    %c0_63 = arith.constant 0 : index
    %c0_64 = arith.constant 0 : index
    %59 = vector.load %arg4[%c0_62, %c0_63, %c0_64] : memref<1x144x32xbf16, #tpu.memory_space<vmem>>, vector<1x144x32xbf16>
    %60 = vector.shape_cast %59 : vector<1x144x32xbf16> to vector<144x32xbf16>
    %61 = vector.shape_cast %58 : vector<144x32xbf16> to vector<1x144x32xbf16>
    tpu.vector_store %arg4[%c0_62, %c0_63, %c0_64], %61 {strides = array<i32>} : memref<1x144x32xbf16, #tpu.memory_space<vmem>>, vector<1x144x32xbf16>,
    return
  }
  func.func @transform_0(%arg0: i32) -> (i32, i32, i32, i32) {
    %c0_i32 = arith.constant 0 : i32
    %c0_i32_0 = arith.constant 0 : i32
    %c0_i32_1 = arith.constant 0 : i32
    %c0_i32_2 = arith.constant 0 : i32
    return %arg0, %c0_i32, %c0_i32_0, %c0_i32_1 : i32, i32, i32, i32
  }
  func.func @transform_1(%arg0: i32) -> (i32, i32, i32) {
    %c0_i32 = arith.constant 0 : i32
    %c0_i32_0 = arith.constant 0 : i32
    %c0_i32_1 = arith.constant 0 : i32
    %c0_i32_2 = arith.constant 0 : i32
    return %c0_i32, %c0_i32_0, %c0_i32_1 : i32, i32, i32
  }
  func.func @transform_2(%arg0: i32) -> (i32, i32) {
    %c0_i32 = arith.constant 0 : i32
    %c0_i32_0 = arith.constant 0 : i32
    %c0_i32_1 = arith.constant 0 : i32
    return %c0_i32, %c0_i32_0 : i32, i32
  }
  func.func @transform_3(%arg0: i32) -> (i32, i32, i32) {
    %c0_i32 = arith.constant 0 : i32
    %c0_i32_0 = arith.constant 0 : i32
    %c0_i32_1 = arith.constant 0 : i32
    return %arg0, %c0_i32, %c0_i32_0 : i32, i32, i32
  }
}

module attributes {stable_mosaic.version = 11 : i64} {
  func.func @_conv_taps_kernel(%arg0: i32, %arg1: memref<1x1x110x32xbf16, #tpu.memory_space<vmem>>, %arg2: memref<9x32x32xbf16, #tpu.memory_space<vmem>>, %arg3: memref<1x32xf32, #tpu.memory_space<vmem>>, %arg4: memref<1x80x32xbf16, #tpu.memory_space<vmem>>) attributes {dimension_semantics = [#tpu.dimension_semantics<parallel>], iteration_bounds = array<i64: 2>, scalar_prefetch = 0 : i64, scratch_operands = 0 : i64, tpu.core_type = #tpu.core_type<tc>, window_params = [{transform_indices = @transform_0, window_bounds = array<i64: 1, 1, 110, 32>}, {pipeline_mode = #tpu.pipeline_mode<synchronous>, transform_indices = @transform_1, window_bounds = array<i64: 9, 32, 32>}, {pipeline_mode = #tpu.pipeline_mode<synchronous>, transform_indices = @transform_2, window_bounds = array<i64: 1, 32>}, {transform_indices = @transform_3, window_bounds = array<i64: 1, 80, 32>}]} {
    %c0 = arith.constant 0 : index
    %c0_0 = arith.constant 0 : index
    %c0_1 = arith.constant 0 : index
    %c0_2 = arith.constant 0 : index
    %0 = vector.load %arg1[%c0, %c0_0, %c0_1, %c0_2] : memref<1x1x110x32xbf16, #tpu.memory_space<vmem>>, vector<1x1x80x32xbf16>
    %1 = vector.shape_cast %0 : vector<1x1x80x32xbf16> to vector<80x32xbf16>
    %c0_3 = arith.constant 0 : index
    %c0_4 = arith.constant 0 : index
    %c0_5 = arith.constant 0 : index
    %2 = vector.load %arg2[%c0_3, %c0_4, %c0_5] : memref<9x32x32xbf16, #tpu.memory_space<vmem>>, vector<1x32x32xbf16>
    %3 = vector.shape_cast %2 : vector<1x32x32xbf16> to vector<32x32xbf16>
    %cst = arith.constant dense<0.000000e+00> : vector<80x32xf32>
    %4 = tpu.matmul %1, %3, %cst {dimension_numbers = #tpu.dot_dimension_numbers<[1], [0], [0], [1], [0, 0, 1, 1], [], []>} : vector<80x32xbf16>, vector<32x32xbf16>, vector<80x32xf32> -> vector<80x32xf32>
    %c0_6 = arith.constant 0 : index
    %c0_7 = arith.constant 0 : index
    %c1 = arith.constant 1 : index
    %c0_8 = arith.constant 0 : index
    %5 = vector.load %arg1[%c0_6, %c0_7, %c1, %c0_8] : memref<1x1x110x32xbf16, #tpu.memory_space<vmem>>, vector<1x1x80x32xbf16>
    %6 = vector.shape_cast %5 : vector<1x1x80x32xbf16> to vector<80x32xbf16>
    %c1_9 = arith.constant 1 : index
    %c0_10 = arith.constant 0 : index
    %c0_11 = arith.constant 0 : index
    %7 = vector.load %arg2[%c1_9, %c0_10, %c0_11] : memref<9x32x32xbf16, #tpu.memory_space<vmem>>, vector<1x32x32xbf16>
    %8 = vector.shape_cast %7 : vector<1x32x32xbf16> to vector<32x32xbf16>
    %cst_12 = arith.constant dense<0.000000e+00> : vector<80x32xf32>
    %9 = tpu.matmul %6, %8, %cst_12 {dimension_numbers = #tpu.dot_dimension_numbers<[1], [0], [0], [1], [0, 0, 1, 1], [], []>} : vector<80x32xbf16>, vector<32x32xbf16>, vector<80x32xf32> -> vector<80x32xf32>
    %10 = arith.addf %4, %9 : vector<80x32xf32>
    %c0_13 = arith.constant 0 : index
    %c0_14 = arith.constant 0 : index
    %c2 = arith.constant 2 : index
    %c0_15 = arith.constant 0 : index
    %11 = vector.load %arg1[%c0_13, %c0_14, %c2, %c0_15] : memref<1x1x110x32xbf16, #tpu.memory_space<vmem>>, vector<1x1x80x32xbf16>
    %12 = vector.shape_cast %11 : vector<1x1x80x32xbf16> to vector<80x32xbf16>
    %c2_16 = arith.constant 2 : index
    %c0_17 = arith.constant 0 : index
    %c0_18 = arith.constant 0 : index
    %13 = vector.load %arg2[%c2_16, %c0_17, %c0_18] : memref<9x32x32xbf16, #tpu.memory_space<vmem>>, vector<1x32x32xbf16>
    %14 = vector.shape_cast %13 : vector<1x32x32xbf16> to vector<32x32xbf16>
    %cst_19 = arith.constant dense<0.000000e+00> : vector<80x32xf32>
    %15 = tpu.matmul %12, %14, %cst_19 {dimension_numbers = #tpu.dot_dimension_numbers<[1], [0], [0], [1], [0, 0, 1, 1], [], []>} : vector<80x32xbf16>, vector<32x32xbf16>, vector<80x32xf32> -> vector<80x32xf32>
    %16 = arith.addf %10, %15 : vector<80x32xf32>
    %c0_20 = arith.constant 0 : index
    %c0_21 = arith.constant 0 : index
    %c10 = arith.constant 10 : index
    %c0_22 = arith.constant 0 : index
    %17 = vector.load %arg1[%c0_20, %c0_21, %c10, %c0_22] : memref<1x1x110x32xbf16, #tpu.memory_space<vmem>>, vector<1x1x80x32xbf16>
    %18 = vector.shape_cast %17 : vector<1x1x80x32xbf16> to vector<80x32xbf16>
    %c3 = arith.constant 3 : index
    %c0_23 = arith.constant 0 : index
    %c0_24 = arith.constant 0 : index
    %19 = vector.load %arg2[%c3, %c0_23, %c0_24] : memref<9x32x32xbf16, #tpu.memory_space<vmem>>, vector<1x32x32xbf16>
    %20 = vector.shape_cast %19 : vector<1x32x32xbf16> to vector<32x32xbf16>
    %cst_25 = arith.constant dense<0.000000e+00> : vector<80x32xf32>
    %21 = tpu.matmul %18, %20, %cst_25 {dimension_numbers = #tpu.dot_dimension_numbers<[1], [0], [0], [1], [0, 0, 1, 1], [], []>} : vector<80x32xbf16>, vector<32x32xbf16>, vector<80x32xf32> -> vector<80x32xf32>
    %22 = arith.addf %16, %21 : vector<80x32xf32>
    %c0_26 = arith.constant 0 : index
    %c0_27 = arith.constant 0 : index
    %c11 = arith.constant 11 : index
    %c0_28 = arith.constant 0 : index
    %23 = vector.load %arg1[%c0_26, %c0_27, %c11, %c0_28] : memref<1x1x110x32xbf16, #tpu.memory_space<vmem>>, vector<1x1x80x32xbf16>
    %24 = vector.shape_cast %23 : vector<1x1x80x32xbf16> to vector<80x32xbf16>
    %c4 = arith.constant 4 : index
    %c0_29 = arith.constant 0 : index
    %c0_30 = arith.constant 0 : index
    %25 = vector.load %arg2[%c4, %c0_29, %c0_30] : memref<9x32x32xbf16, #tpu.memory_space<vmem>>, vector<1x32x32xbf16>
    %26 = vector.shape_cast %25 : vector<1x32x32xbf16> to vector<32x32xbf16>
    %cst_31 = arith.constant dense<0.000000e+00> : vector<80x32xf32>
    %27 = tpu.matmul %24, %26, %cst_31 {dimension_numbers = #tpu.dot_dimension_numbers<[1], [0], [0], [1], [0, 0, 1, 1], [], []>} : vector<80x32xbf16>, vector<32x32xbf16>, vector<80x32xf32> -> vector<80x32xf32>
    %28 = arith.addf %22, %27 : vector<80x32xf32>
    %c0_32 = arith.constant 0 : index
    %c0_33 = arith.constant 0 : index
    %c12 = arith.constant 12 : index
    %c0_34 = arith.constant 0 : index
    %29 = vector.load %arg1[%c0_32, %c0_33, %c12, %c0_34] : memref<1x1x110x32xbf16, #tpu.memory_space<vmem>>, vector<1x1x80x32xbf16>
    %30 = vector.shape_cast %29 : vector<1x1x80x32xbf16> to vector<80x32xbf16>
    %c5 = arith.constant 5 : index
    %c0_35 = arith.constant 0 : index
    %c0_36 = arith.constant 0 : index
    %31 = vector.load %arg2[%c5, %c0_35, %c0_36] : memref<9x32x32xbf16, #tpu.memory_space<vmem>>, vector<1x32x32xbf16>
    %32 = vector.shape_cast %31 : vector<1x32x32xbf16> to vector<32x32xbf16>
    %cst_37 = arith.constant dense<0.000000e+00> : vector<80x32xf32>
    %33 = tpu.matmul %30, %32, %cst_37 {dimension_numbers = #tpu.dot_dimension_numbers<[1], [0], [0], [1], [0, 0, 1, 1], [], []>} : vector<80x32xbf16>, vector<32x32xbf16>, vector<80x32xf32> -> vector<80x32xf32>
    %34 = arith.addf %28, %33 : vector<80x32xf32>
    %c0_38 = arith.constant 0 : index
    %c0_39 = arith.constant 0 : index
    %c20 = arith.constant 20 : index
    %c0_40 = arith.constant 0 : index
    %35 = vector.load %arg1[%c0_38, %c0_39, %c20, %c0_40] : memref<1x1x110x32xbf16, #tpu.memory_space<vmem>>, vector<1x1x80x32xbf16>
    %36 = vector.shape_cast %35 : vector<1x1x80x32xbf16> to vector<80x32xbf16>
    %c6 = arith.constant 6 : index
    %c0_41 = arith.constant 0 : index
    %c0_42 = arith.constant 0 : index
    %37 = vector.load %arg2[%c6, %c0_41, %c0_42] : memref<9x32x32xbf16, #tpu.memory_space<vmem>>, vector<1x32x32xbf16>
    %38 = vector.shape_cast %37 : vector<1x32x32xbf16> to vector<32x32xbf16>
    %cst_43 = arith.constant dense<0.000000e+00> : vector<80x32xf32>
    %39 = tpu.matmul %36, %38, %cst_43 {dimension_numbers = #tpu.dot_dimension_numbers<[1], [0], [0], [1], [0, 0, 1, 1], [], []>} : vector<80x32xbf16>, vector<32x32xbf16>, vector<80x32xf32> -> vector<80x32xf32>
    %40 = arith.addf %34, %39 : vector<80x32xf32>
    %c0_44 = arith.constant 0 : index
    %c0_45 = arith.constant 0 : index
    %c21 = arith.constant 21 : index
    %c0_46 = arith.constant 0 : index
    %41 = vector.load %arg1[%c0_44, %c0_45, %c21, %c0_46] : memref<1x1x110x32xbf16, #tpu.memory_space<vmem>>, vector<1x1x80x32xbf16>
    %42 = vector.shape_cast %41 : vector<1x1x80x32xbf16> to vector<80x32xbf16>
    %c7 = arith.constant 7 : index
    %c0_47 = arith.constant 0 : index
    %c0_48 = arith.constant 0 : index
    %43 = vector.load %arg2[%c7, %c0_47, %c0_48] : memref<9x32x32xbf16, #tpu.memory_space<vmem>>, vector<1x32x32xbf16>
    %44 = vector.shape_cast %43 : vector<1x32x32xbf16> to vector<32x32xbf16>
    %cst_49 = arith.constant dense<0.000000e+00> : vector<80x32xf32>
    %45 = tpu.matmul %42, %44, %cst_49 {dimension_numbers = #tpu.dot_dimension_numbers<[1], [0], [0], [1], [0, 0, 1, 1], [], []>} : vector<80x32xbf16>, vector<32x32xbf16>, vector<80x32xf32> -> vector<80x32xf32>
    %46 = arith.addf %40, %45 : vector<80x32xf32>
    %c0_50 = arith.constant 0 : index
    %c0_51 = arith.constant 0 : index
    %c22 = arith.constant 22 : index
    %c0_52 = arith.constant 0 : index
    %47 = vector.load %arg1[%c0_50, %c0_51, %c22, %c0_52] : memref<1x1x110x32xbf16, #tpu.memory_space<vmem>>, vector<1x1x80x32xbf16>
    %48 = vector.shape_cast %47 : vector<1x1x80x32xbf16> to vector<80x32xbf16>
    %c8 = arith.constant 8 : index
    %c0_53 = arith.constant 0 : index
    %c0_54 = arith.constant 0 : index
    %49 = vector.load %arg2[%c8, %c0_53, %c0_54] : memref<9x32x32xbf16, #tpu.memory_space<vmem>>, vector<1x32x32xbf16>
    %50 = vector.shape_cast %49 : vector<1x32x32xbf16> to vector<32x32xbf16>
    %cst_55 = arith.constant dense<0.000000e+00> : vector<80x32xf32>
    %51 = tpu.matmul %48, %50, %cst_55 {dimension_numbers = #tpu.dot_dimension_numbers<[1], [0], [0], [1], [0, 0, 1, 1], [], []>} : vector<80x32xbf16>, vector<32x32xbf16>, vector<80x32xf32> -> vector<80x32xf32>
    %52 = arith.addf %46, %51 : vector<80x32xf32>
    %c0_56 = arith.constant 0 : index
    %c0_57 = arith.constant 0 : index
    %53 = vector.load %arg3[%c0_56, %c0_57] : memref<1x32xf32, #tpu.memory_space<vmem>>, vector<1x32xf32>
    %54 = vector.broadcast %53 : vector<1x32xf32> to vector<80x32xf32>
    %55 = arith.addf %52, %54 : vector<80x32xf32>
    %cst_58 = arith.constant 0.000000e+00 : f32
    %56 = vector.broadcast %cst_58 : f32 to vector<80x32xf32>
    %57 = arith.maximumf %55, %56 : vector<80x32xf32>
    %58 = arith.truncf %57 : vector<80x32xf32> to vector<80x32xbf16>
    %c0_59 = arith.constant 0 : index
    %c0_60 = arith.constant 0 : index
    %c0_61 = arith.constant 0 : index
    %59 = vector.load %arg4[%c0_59, %c0_60, %c0_61] : memref<1x80x32xbf16, #tpu.memory_space<vmem>>, vector<1x80x32xbf16>
    %60 = vector.shape_cast %59 : vector<1x80x32xbf16> to vector<80x32xbf16>
    %61 = vector.shape_cast %58 : vector<80x32xbf16> to vector<1x80x32xbf16>
    tpu.vector_store %arg4[%c0_59, %c0_60, %c0_61], %61 {strides = array<i32>} : memref<1x80x32xbf16, #tpu.memory_space<vmem>>, vector<1x80x32xbf16>,
    return
  }
  func.func @transform_0(%arg0: i32) -> (i32, i32, i32, i32) {
    %c0_i32 = arith.constant 0 : i32
    %c0_i32_0 = arith.constant 0 : i32
    %c0_i32_1 = arith.constant 0 : i32
    %c0_i32_2 = arith.constant 0 : i32
    return %arg0, %c0_i32, %c0_i32_0, %c0_i32_1 : i32, i32, i32, i32
  }
  func.func @transform_1(%arg0: i32) -> (i32, i32, i32) {
    %c0_i32 = arith.constant 0 : i32
    %c0_i32_0 = arith.constant 0 : i32
    %c0_i32_1 = arith.constant 0 : i32
    %c0_i32_2 = arith.constant 0 : i32
    return %c0_i32, %c0_i32_0, %c0_i32_1 : i32, i32, i32
  }
  func.func @transform_2(%arg0: i32) -> (i32, i32) {
    %c0_i32 = arith.constant 0 : i32
    %c0_i32_0 = arith.constant 0 : i32
    %c0_i32_1 = arith.constant 0 : i32
    return %c0_i32, %c0_i32_0 : i32, i32
  }
  func.func @transform_3(%arg0: i32) -> (i32, i32, i32) {
    %c0_i32 = arith.constant 0 : i32
    %c0_i32_0 = arith.constant 0 : i32
    %c0_i32_1 = arith.constant 0 : i32
    return %arg0, %c0_i32, %c0_i32_0 : i32, i32, i32
  }
}

module attributes {stable_mosaic.version = 11 : i64} {
  func.func @_conv_taps_kernel(%arg0: i32, %arg1: memref<1x2x60x32xbf16, #tpu.memory_space<vmem>>, %arg2: memref<9x32x64xbf16, #tpu.memory_space<vmem>>, %arg3: memref<1x64xf32, #tpu.memory_space<vmem>>, %arg4: memref<1x40x64xbf16, #tpu.memory_space<vmem>>) attributes {dimension_semantics = [#tpu.dimension_semantics<parallel>], iteration_bounds = array<i64: 2>, scalar_prefetch = 0 : i64, scratch_operands = 0 : i64, tpu.core_type = #tpu.core_type<tc>, window_params = [{transform_indices = @transform_0, window_bounds = array<i64: 1, 2, 60, 32>}, {pipeline_mode = #tpu.pipeline_mode<synchronous>, transform_indices = @transform_1, window_bounds = array<i64: 9, 32, 64>}, {pipeline_mode = #tpu.pipeline_mode<synchronous>, transform_indices = @transform_2, window_bounds = array<i64: 1, 64>}, {transform_indices = @transform_3, window_bounds = array<i64: 1, 40, 64>}]} {
    %c0 = arith.constant 0 : index
    %c0_0 = arith.constant 0 : index
    %c0_1 = arith.constant 0 : index
    %c0_2 = arith.constant 0 : index
    %0 = vector.load %arg1[%c0, %c0_0, %c0_1, %c0_2] : memref<1x2x60x32xbf16, #tpu.memory_space<vmem>>, vector<1x1x40x32xbf16>
    %1 = vector.shape_cast %0 : vector<1x1x40x32xbf16> to vector<40x32xbf16>
    %c0_3 = arith.constant 0 : index
    %c0_4 = arith.constant 0 : index
    %c0_5 = arith.constant 0 : index
    %2 = vector.load %arg2[%c0_3, %c0_4, %c0_5] : memref<9x32x64xbf16, #tpu.memory_space<vmem>>, vector<1x32x64xbf16>
    %3 = vector.shape_cast %2 : vector<1x32x64xbf16> to vector<32x64xbf16>
    %cst = arith.constant dense<0.000000e+00> : vector<40x64xf32>
    %4 = tpu.matmul %1, %3, %cst {dimension_numbers = #tpu.dot_dimension_numbers<[1], [0], [0], [1], [0, 0, 1, 1], [], []>} : vector<40x32xbf16>, vector<32x64xbf16>, vector<40x64xf32> -> vector<40x64xf32>
    %c0_6 = arith.constant 0 : index
    %c0_7 = arith.constant 0 : index
    %c1 = arith.constant 1 : index
    %c0_8 = arith.constant 0 : index
    %5 = vector.load %arg1[%c0_6, %c0_7, %c1, %c0_8] : memref<1x2x60x32xbf16, #tpu.memory_space<vmem>>, vector<1x1x40x32xbf16>
    %6 = vector.shape_cast %5 : vector<1x1x40x32xbf16> to vector<40x32xbf16>
    %c1_9 = arith.constant 1 : index
    %c0_10 = arith.constant 0 : index
    %c0_11 = arith.constant 0 : index
    %7 = vector.load %arg2[%c1_9, %c0_10, %c0_11] : memref<9x32x64xbf16, #tpu.memory_space<vmem>>, vector<1x32x64xbf16>
    %8 = vector.shape_cast %7 : vector<1x32x64xbf16> to vector<32x64xbf16>
    %cst_12 = arith.constant dense<0.000000e+00> : vector<40x64xf32>
    %9 = tpu.matmul %6, %8, %cst_12 {dimension_numbers = #tpu.dot_dimension_numbers<[1], [0], [0], [1], [0, 0, 1, 1], [], []>} : vector<40x32xbf16>, vector<32x64xbf16>, vector<40x64xf32> -> vector<40x64xf32>
    %10 = arith.addf %4, %9 : vector<40x64xf32>
    %c0_13 = arith.constant 0 : index
    %c0_14 = arith.constant 0 : index
    %c2 = arith.constant 2 : index
    %c0_15 = arith.constant 0 : index
    %11 = vector.load %arg1[%c0_13, %c0_14, %c2, %c0_15] : memref<1x2x60x32xbf16, #tpu.memory_space<vmem>>, vector<1x1x40x32xbf16>
    %12 = vector.shape_cast %11 : vector<1x1x40x32xbf16> to vector<40x32xbf16>
    %c2_16 = arith.constant 2 : index
    %c0_17 = arith.constant 0 : index
    %c0_18 = arith.constant 0 : index
    %13 = vector.load %arg2[%c2_16, %c0_17, %c0_18] : memref<9x32x64xbf16, #tpu.memory_space<vmem>>, vector<1x32x64xbf16>
    %14 = vector.shape_cast %13 : vector<1x32x64xbf16> to vector<32x64xbf16>
    %cst_19 = arith.constant dense<0.000000e+00> : vector<40x64xf32>
    %15 = tpu.matmul %12, %14, %cst_19 {dimension_numbers = #tpu.dot_dimension_numbers<[1], [0], [0], [1], [0, 0, 1, 1], [], []>} : vector<40x32xbf16>, vector<32x64xbf16>, vector<40x64xf32> -> vector<40x64xf32>
    %16 = arith.addf %10, %15 : vector<40x64xf32>
    %c0_20 = arith.constant 0 : index
    %c1_21 = arith.constant 1 : index
    %c0_22 = arith.constant 0 : index
    %c0_23 = arith.constant 0 : index
    %17 = vector.load %arg1[%c0_20, %c1_21, %c0_22, %c0_23] : memref<1x2x60x32xbf16, #tpu.memory_space<vmem>>, vector<1x1x40x32xbf16>
    %18 = vector.shape_cast %17 : vector<1x1x40x32xbf16> to vector<40x32xbf16>
    %c3 = arith.constant 3 : index
    %c0_24 = arith.constant 0 : index
    %c0_25 = arith.constant 0 : index
    %19 = vector.load %arg2[%c3, %c0_24, %c0_25] : memref<9x32x64xbf16, #tpu.memory_space<vmem>>, vector<1x32x64xbf16>
    %20 = vector.shape_cast %19 : vector<1x32x64xbf16> to vector<32x64xbf16>
    %cst_26 = arith.constant dense<0.000000e+00> : vector<40x64xf32>
    %21 = tpu.matmul %18, %20, %cst_26 {dimension_numbers = #tpu.dot_dimension_numbers<[1], [0], [0], [1], [0, 0, 1, 1], [], []>} : vector<40x32xbf16>, vector<32x64xbf16>, vector<40x64xf32> -> vector<40x64xf32>
    %22 = arith.addf %16, %21 : vector<40x64xf32>
    %c0_27 = arith.constant 0 : index
    %c1_28 = arith.constant 1 : index
    %c1_29 = arith.constant 1 : index
    %c0_30 = arith.constant 0 : index
    %23 = vector.load %arg1[%c0_27, %c1_28, %c1_29, %c0_30] : memref<1x2x60x32xbf16, #tpu.memory_space<vmem>>, vector<1x1x40x32xbf16>
    %24 = vector.shape_cast %23 : vector<1x1x40x32xbf16> to vector<40x32xbf16>
    %c4 = arith.constant 4 : index
    %c0_31 = arith.constant 0 : index
    %c0_32 = arith.constant 0 : index
    %25 = vector.load %arg2[%c4, %c0_31, %c0_32] : memref<9x32x64xbf16, #tpu.memory_space<vmem>>, vector<1x32x64xbf16>
    %26 = vector.shape_cast %25 : vector<1x32x64xbf16> to vector<32x64xbf16>
    %cst_33 = arith.constant dense<0.000000e+00> : vector<40x64xf32>
    %27 = tpu.matmul %24, %26, %cst_33 {dimension_numbers = #tpu.dot_dimension_numbers<[1], [0], [0], [1], [0, 0, 1, 1], [], []>} : vector<40x32xbf16>, vector<32x64xbf16>, vector<40x64xf32> -> vector<40x64xf32>
    %28 = arith.addf %22, %27 : vector<40x64xf32>
    %c0_34 = arith.constant 0 : index
    %c1_35 = arith.constant 1 : index
    %c2_36 = arith.constant 2 : index
    %c0_37 = arith.constant 0 : index
    %29 = vector.load %arg1[%c0_34, %c1_35, %c2_36, %c0_37] : memref<1x2x60x32xbf16, #tpu.memory_space<vmem>>, vector<1x1x40x32xbf16>
    %30 = vector.shape_cast %29 : vector<1x1x40x32xbf16> to vector<40x32xbf16>
    %c5 = arith.constant 5 : index
    %c0_38 = arith.constant 0 : index
    %c0_39 = arith.constant 0 : index
    %31 = vector.load %arg2[%c5, %c0_38, %c0_39] : memref<9x32x64xbf16, #tpu.memory_space<vmem>>, vector<1x32x64xbf16>
    %32 = vector.shape_cast %31 : vector<1x32x64xbf16> to vector<32x64xbf16>
    %cst_40 = arith.constant dense<0.000000e+00> : vector<40x64xf32>
    %33 = tpu.matmul %30, %32, %cst_40 {dimension_numbers = #tpu.dot_dimension_numbers<[1], [0], [0], [1], [0, 0, 1, 1], [], []>} : vector<40x32xbf16>, vector<32x64xbf16>, vector<40x64xf32> -> vector<40x64xf32>
    %34 = arith.addf %28, %33 : vector<40x64xf32>
    %c0_41 = arith.constant 0 : index
    %c0_42 = arith.constant 0 : index
    %c10 = arith.constant 10 : index
    %c0_43 = arith.constant 0 : index
    %35 = vector.load %arg1[%c0_41, %c0_42, %c10, %c0_43] : memref<1x2x60x32xbf16, #tpu.memory_space<vmem>>, vector<1x1x40x32xbf16>
    %36 = vector.shape_cast %35 : vector<1x1x40x32xbf16> to vector<40x32xbf16>
    %c6 = arith.constant 6 : index
    %c0_44 = arith.constant 0 : index
    %c0_45 = arith.constant 0 : index
    %37 = vector.load %arg2[%c6, %c0_44, %c0_45] : memref<9x32x64xbf16, #tpu.memory_space<vmem>>, vector<1x32x64xbf16>
    %38 = vector.shape_cast %37 : vector<1x32x64xbf16> to vector<32x64xbf16>
    %cst_46 = arith.constant dense<0.000000e+00> : vector<40x64xf32>
    %39 = tpu.matmul %36, %38, %cst_46 {dimension_numbers = #tpu.dot_dimension_numbers<[1], [0], [0], [1], [0, 0, 1, 1], [], []>} : vector<40x32xbf16>, vector<32x64xbf16>, vector<40x64xf32> -> vector<40x64xf32>
    %40 = arith.addf %34, %39 : vector<40x64xf32>
    %c0_47 = arith.constant 0 : index
    %c0_48 = arith.constant 0 : index
    %c11 = arith.constant 11 : index
    %c0_49 = arith.constant 0 : index
    %41 = vector.load %arg1[%c0_47, %c0_48, %c11, %c0_49] : memref<1x2x60x32xbf16, #tpu.memory_space<vmem>>, vector<1x1x40x32xbf16>
    %42 = vector.shape_cast %41 : vector<1x1x40x32xbf16> to vector<40x32xbf16>
    %c7 = arith.constant 7 : index
    %c0_50 = arith.constant 0 : index
    %c0_51 = arith.constant 0 : index
    %43 = vector.load %arg2[%c7, %c0_50, %c0_51] : memref<9x32x64xbf16, #tpu.memory_space<vmem>>, vector<1x32x64xbf16>
    %44 = vector.shape_cast %43 : vector<1x32x64xbf16> to vector<32x64xbf16>
    %cst_52 = arith.constant dense<0.000000e+00> : vector<40x64xf32>
    %45 = tpu.matmul %42, %44, %cst_52 {dimension_numbers = #tpu.dot_dimension_numbers<[1], [0], [0], [1], [0, 0, 1, 1], [], []>} : vector<40x32xbf16>, vector<32x64xbf16>, vector<40x64xf32> -> vector<40x64xf32>
    %46 = arith.addf %40, %45 : vector<40x64xf32>
    %c0_53 = arith.constant 0 : index
    %c0_54 = arith.constant 0 : index
    %c12 = arith.constant 12 : index
    %c0_55 = arith.constant 0 : index
    %47 = vector.load %arg1[%c0_53, %c0_54, %c12, %c0_55] : memref<1x2x60x32xbf16, #tpu.memory_space<vmem>>, vector<1x1x40x32xbf16>
    %48 = vector.shape_cast %47 : vector<1x1x40x32xbf16> to vector<40x32xbf16>
    %c8 = arith.constant 8 : index
    %c0_56 = arith.constant 0 : index
    %c0_57 = arith.constant 0 : index
    %49 = vector.load %arg2[%c8, %c0_56, %c0_57] : memref<9x32x64xbf16, #tpu.memory_space<vmem>>, vector<1x32x64xbf16>
    %50 = vector.shape_cast %49 : vector<1x32x64xbf16> to vector<32x64xbf16>
    %cst_58 = arith.constant dense<0.000000e+00> : vector<40x64xf32>
    %51 = tpu.matmul %48, %50, %cst_58 {dimension_numbers = #tpu.dot_dimension_numbers<[1], [0], [0], [1], [0, 0, 1, 1], [], []>} : vector<40x32xbf16>, vector<32x64xbf16>, vector<40x64xf32> -> vector<40x64xf32>
    %52 = arith.addf %46, %51 : vector<40x64xf32>
    %c0_59 = arith.constant 0 : index
    %c0_60 = arith.constant 0 : index
    %53 = vector.load %arg3[%c0_59, %c0_60] : memref<1x64xf32, #tpu.memory_space<vmem>>, vector<1x64xf32>
    %54 = vector.broadcast %53 : vector<1x64xf32> to vector<40x64xf32>
    %55 = arith.addf %52, %54 : vector<40x64xf32>
    %cst_61 = arith.constant 0.000000e+00 : f32
    %56 = vector.broadcast %cst_61 : f32 to vector<40x64xf32>
    %57 = arith.maximumf %55, %56 : vector<40x64xf32>
    %58 = arith.truncf %57 : vector<40x64xf32> to vector<40x64xbf16>
    %c0_62 = arith.constant 0 : index
    %c0_63 = arith.constant 0 : index
    %c0_64 = arith.constant 0 : index
    %59 = vector.load %arg4[%c0_62, %c0_63, %c0_64] : memref<1x40x64xbf16, #tpu.memory_space<vmem>>, vector<1x40x64xbf16>
    %60 = vector.shape_cast %59 : vector<1x40x64xbf16> to vector<40x64xbf16>
    %61 = vector.shape_cast %58 : vector<40x64xbf16> to vector<1x40x64xbf16>
    tpu.vector_store %arg4[%c0_62, %c0_63, %c0_64], %61 {strides = array<i32>} : memref<1x40x64xbf16, #tpu.memory_space<vmem>>, vector<1x40x64xbf16>,
    return
  }
  func.func @transform_0(%arg0: i32) -> (i32, i32, i32, i32) {
    %c0_i32 = arith.constant 0 : i32
    %c0_i32_0 = arith.constant 0 : i32
    %c0_i32_1 = arith.constant 0 : i32
    %c0_i32_2 = arith.constant 0 : i32
    return %arg0, %c0_i32, %c0_i32_0, %c0_i32_1 : i32, i32, i32, i32
  }
  func.func @transform_1(%arg0: i32) -> (i32, i32, i32) {
    %c0_i32 = arith.constant 0 : i32
    %c0_i32_0 = arith.constant 0 : i32
    %c0_i32_1 = arith.constant 0 : i32
    %c0_i32_2 = arith.constant 0 : i32
    return %c0_i32, %c0_i32_0, %c0_i32_1 : i32, i32, i32
  }
  func.func @transform_2(%arg0: i32) -> (i32, i32) {
    %c0_i32 = arith.constant 0 : i32
    %c0_i32_0 = arith.constant 0 : i32
    %c0_i32_1 = arith.constant 0 : i32
    return %c0_i32, %c0_i32_0 : i32, i32
  }
  func.func @transform_3(%arg0: i32) -> (i32, i32, i32) {
    %c0_i32 = arith.constant 0 : i32
    %c0_i32_0 = arith.constant 0 : i32
    %c0_i32_1 = arith.constant 0 : i32
    return %arg0, %c0_i32, %c0_i32_0 : i32, i32, i32
  }
}

module attributes {stable_mosaic.version = 11 : i64} {
  func.func @_conv_taps_kernel(%arg0: i32, %arg1: memref<1x1x42x64xbf16, #tpu.memory_space<vmem>>, %arg2: memref<9x64x64xbf16, #tpu.memory_space<vmem>>, %arg3: memref<1x64xf32, #tpu.memory_space<vmem>>, %arg4: memref<1x24x64xbf16, #tpu.memory_space<vmem>>) attributes {dimension_semantics = [#tpu.dimension_semantics<parallel>], iteration_bounds = array<i64: 2>, scalar_prefetch = 0 : i64, scratch_operands = 0 : i64, tpu.core_type = #tpu.core_type<tc>, window_params = [{transform_indices = @transform_0, window_bounds = array<i64: 1, 1, 42, 64>}, {pipeline_mode = #tpu.pipeline_mode<synchronous>, transform_indices = @transform_1, window_bounds = array<i64: 9, 64, 64>}, {pipeline_mode = #tpu.pipeline_mode<synchronous>, transform_indices = @transform_2, window_bounds = array<i64: 1, 64>}, {transform_indices = @transform_3, window_bounds = array<i64: 1, 24, 64>}]} {
    %c0 = arith.constant 0 : index
    %c0_0 = arith.constant 0 : index
    %c0_1 = arith.constant 0 : index
    %c0_2 = arith.constant 0 : index
    %0 = vector.load %arg1[%c0, %c0_0, %c0_1, %c0_2] : memref<1x1x42x64xbf16, #tpu.memory_space<vmem>>, vector<1x1x24x64xbf16>
    %1 = vector.shape_cast %0 : vector<1x1x24x64xbf16> to vector<24x64xbf16>
    %c0_3 = arith.constant 0 : index
    %c0_4 = arith.constant 0 : index
    %c0_5 = arith.constant 0 : index
    %2 = vector.load %arg2[%c0_3, %c0_4, %c0_5] : memref<9x64x64xbf16, #tpu.memory_space<vmem>>, vector<1x64x64xbf16>
    %3 = vector.shape_cast %2 : vector<1x64x64xbf16> to vector<64x64xbf16>
    %cst = arith.constant dense<0.000000e+00> : vector<24x64xf32>
    %4 = tpu.matmul %1, %3, %cst {dimension_numbers = #tpu.dot_dimension_numbers<[1], [0], [0], [1], [0, 0, 1, 1], [], []>} : vector<24x64xbf16>, vector<64x64xbf16>, vector<24x64xf32> -> vector<24x64xf32>
    %c0_6 = arith.constant 0 : index
    %c0_7 = arith.constant 0 : index
    %c1 = arith.constant 1 : index
    %c0_8 = arith.constant 0 : index
    %5 = vector.load %arg1[%c0_6, %c0_7, %c1, %c0_8] : memref<1x1x42x64xbf16, #tpu.memory_space<vmem>>, vector<1x1x24x64xbf16>
    %6 = vector.shape_cast %5 : vector<1x1x24x64xbf16> to vector<24x64xbf16>
    %c1_9 = arith.constant 1 : index
    %c0_10 = arith.constant 0 : index
    %c0_11 = arith.constant 0 : index
    %7 = vector.load %arg2[%c1_9, %c0_10, %c0_11] : memref<9x64x64xbf16, #tpu.memory_space<vmem>>, vector<1x64x64xbf16>
    %8 = vector.shape_cast %7 : vector<1x64x64xbf16> to vector<64x64xbf16>
    %cst_12 = arith.constant dense<0.000000e+00> : vector<24x64xf32>
    %9 = tpu.matmul %6, %8, %cst_12 {dimension_numbers = #tpu.dot_dimension_numbers<[1], [0], [0], [1], [0, 0, 1, 1], [], []>} : vector<24x64xbf16>, vector<64x64xbf16>, vector<24x64xf32> -> vector<24x64xf32>
    %10 = arith.addf %4, %9 : vector<24x64xf32>
    %c0_13 = arith.constant 0 : index
    %c0_14 = arith.constant 0 : index
    %c2 = arith.constant 2 : index
    %c0_15 = arith.constant 0 : index
    %11 = vector.load %arg1[%c0_13, %c0_14, %c2, %c0_15] : memref<1x1x42x64xbf16, #tpu.memory_space<vmem>>, vector<1x1x24x64xbf16>
    %12 = vector.shape_cast %11 : vector<1x1x24x64xbf16> to vector<24x64xbf16>
    %c2_16 = arith.constant 2 : index
    %c0_17 = arith.constant 0 : index
    %c0_18 = arith.constant 0 : index
    %13 = vector.load %arg2[%c2_16, %c0_17, %c0_18] : memref<9x64x64xbf16, #tpu.memory_space<vmem>>, vector<1x64x64xbf16>
    %14 = vector.shape_cast %13 : vector<1x64x64xbf16> to vector<64x64xbf16>
    %cst_19 = arith.constant dense<0.000000e+00> : vector<24x64xf32>
    %15 = tpu.matmul %12, %14, %cst_19 {dimension_numbers = #tpu.dot_dimension_numbers<[1], [0], [0], [1], [0, 0, 1, 1], [], []>} : vector<24x64xbf16>, vector<64x64xbf16>, vector<24x64xf32> -> vector<24x64xf32>
    %16 = arith.addf %10, %15 : vector<24x64xf32>
    %c0_20 = arith.constant 0 : index
    %c0_21 = arith.constant 0 : index
    %c6 = arith.constant 6 : index
    %c0_22 = arith.constant 0 : index
    %17 = vector.load %arg1[%c0_20, %c0_21, %c6, %c0_22] : memref<1x1x42x64xbf16, #tpu.memory_space<vmem>>, vector<1x1x24x64xbf16>
    %18 = vector.shape_cast %17 : vector<1x1x24x64xbf16> to vector<24x64xbf16>
    %c3 = arith.constant 3 : index
    %c0_23 = arith.constant 0 : index
    %c0_24 = arith.constant 0 : index
    %19 = vector.load %arg2[%c3, %c0_23, %c0_24] : memref<9x64x64xbf16, #tpu.memory_space<vmem>>, vector<1x64x64xbf16>
    %20 = vector.shape_cast %19 : vector<1x64x64xbf16> to vector<64x64xbf16>
    %cst_25 = arith.constant dense<0.000000e+00> : vector<24x64xf32>
    %21 = tpu.matmul %18, %20, %cst_25 {dimension_numbers = #tpu.dot_dimension_numbers<[1], [0], [0], [1], [0, 0, 1, 1], [], []>} : vector<24x64xbf16>, vector<64x64xbf16>, vector<24x64xf32> -> vector<24x64xf32>
    %22 = arith.addf %16, %21 : vector<24x64xf32>
    %c0_26 = arith.constant 0 : index
    %c0_27 = arith.constant 0 : index
    %c7 = arith.constant 7 : index
    %c0_28 = arith.constant 0 : index
    %23 = vector.load %arg1[%c0_26, %c0_27, %c7, %c0_28] : memref<1x1x42x64xbf16, #tpu.memory_space<vmem>>, vector<1x1x24x64xbf16>
    %24 = vector.shape_cast %23 : vector<1x1x24x64xbf16> to vector<24x64xbf16>
    %c4 = arith.constant 4 : index
    %c0_29 = arith.constant 0 : index
    %c0_30 = arith.constant 0 : index
    %25 = vector.load %arg2[%c4, %c0_29, %c0_30] : memref<9x64x64xbf16, #tpu.memory_space<vmem>>, vector<1x64x64xbf16>
    %26 = vector.shape_cast %25 : vector<1x64x64xbf16> to vector<64x64xbf16>
    %cst_31 = arith.constant dense<0.000000e+00> : vector<24x64xf32>
    %27 = tpu.matmul %24, %26, %cst_31 {dimension_numbers = #tpu.dot_dimension_numbers<[1], [0], [0], [1], [0, 0, 1, 1], [], []>} : vector<24x64xbf16>, vector<64x64xbf16>, vector<24x64xf32> -> vector<24x64xf32>
    %28 = arith.addf %22, %27 : vector<24x64xf32>
    %c0_32 = arith.constant 0 : index
    %c0_33 = arith.constant 0 : index
    %c8 = arith.constant 8 : index
    %c0_34 = arith.constant 0 : index
    %29 = vector.load %arg1[%c0_32, %c0_33, %c8, %c0_34] : memref<1x1x42x64xbf16, #tpu.memory_space<vmem>>, vector<1x1x24x64xbf16>
    %30 = vector.shape_cast %29 : vector<1x1x24x64xbf16> to vector<24x64xbf16>
    %c5 = arith.constant 5 : index
    %c0_35 = arith.constant 0 : index
    %c0_36 = arith.constant 0 : index
    %31 = vector.load %arg2[%c5, %c0_35, %c0_36] : memref<9x64x64xbf16, #tpu.memory_space<vmem>>, vector<1x64x64xbf16>
    %32 = vector.shape_cast %31 : vector<1x64x64xbf16> to vector<64x64xbf16>
    %cst_37 = arith.constant dense<0.000000e+00> : vector<24x64xf32>
    %33 = tpu.matmul %30, %32, %cst_37 {dimension_numbers = #tpu.dot_dimension_numbers<[1], [0], [0], [1], [0, 0, 1, 1], [], []>} : vector<24x64xbf16>, vector<64x64xbf16>, vector<24x64xf32> -> vector<24x64xf32>
    %34 = arith.addf %28, %33 : vector<24x64xf32>
    %c0_38 = arith.constant 0 : index
    %c0_39 = arith.constant 0 : index
    %c12 = arith.constant 12 : index
    %c0_40 = arith.constant 0 : index
    %35 = vector.load %arg1[%c0_38, %c0_39, %c12, %c0_40] : memref<1x1x42x64xbf16, #tpu.memory_space<vmem>>, vector<1x1x24x64xbf16>
    %36 = vector.shape_cast %35 : vector<1x1x24x64xbf16> to vector<24x64xbf16>
    %c6_41 = arith.constant 6 : index
    %c0_42 = arith.constant 0 : index
    %c0_43 = arith.constant 0 : index
    %37 = vector.load %arg2[%c6_41, %c0_42, %c0_43] : memref<9x64x64xbf16, #tpu.memory_space<vmem>>, vector<1x64x64xbf16>
    %38 = vector.shape_cast %37 : vector<1x64x64xbf16> to vector<64x64xbf16>
    %cst_44 = arith.constant dense<0.000000e+00> : vector<24x64xf32>
    %39 = tpu.matmul %36, %38, %cst_44 {dimension_numbers = #tpu.dot_dimension_numbers<[1], [0], [0], [1], [0, 0, 1, 1], [], []>} : vector<24x64xbf16>, vector<64x64xbf16>, vector<24x64xf32> -> vector<24x64xf32>
    %40 = arith.addf %34, %39 : vector<24x64xf32>
    %c0_45 = arith.constant 0 : index
    %c0_46 = arith.constant 0 : index
    %c13 = arith.constant 13 : index
    %c0_47 = arith.constant 0 : index
    %41 = vector.load %arg1[%c0_45, %c0_46, %c13, %c0_47] : memref<1x1x42x64xbf16, #tpu.memory_space<vmem>>, vector<1x1x24x64xbf16>
    %42 = vector.shape_cast %41 : vector<1x1x24x64xbf16> to vector<24x64xbf16>
    %c7_48 = arith.constant 7 : index
    %c0_49 = arith.constant 0 : index
    %c0_50 = arith.constant 0 : index
    %43 = vector.load %arg2[%c7_48, %c0_49, %c0_50] : memref<9x64x64xbf16, #tpu.memory_space<vmem>>, vector<1x64x64xbf16>
    %44 = vector.shape_cast %43 : vector<1x64x64xbf16> to vector<64x64xbf16>
    %cst_51 = arith.constant dense<0.000000e+00> : vector<24x64xf32>
    %45 = tpu.matmul %42, %44, %cst_51 {dimension_numbers = #tpu.dot_dimension_numbers<[1], [0], [0], [1], [0, 0, 1, 1], [], []>} : vector<24x64xbf16>, vector<64x64xbf16>, vector<24x64xf32> -> vector<24x64xf32>
    %46 = arith.addf %40, %45 : vector<24x64xf32>
    %c0_52 = arith.constant 0 : index
    %c0_53 = arith.constant 0 : index
    %c14 = arith.constant 14 : index
    %c0_54 = arith.constant 0 : index
    %47 = vector.load %arg1[%c0_52, %c0_53, %c14, %c0_54] : memref<1x1x42x64xbf16, #tpu.memory_space<vmem>>, vector<1x1x24x64xbf16>
    %48 = vector.shape_cast %47 : vector<1x1x24x64xbf16> to vector<24x64xbf16>
    %c8_55 = arith.constant 8 : index
    %c0_56 = arith.constant 0 : index
    %c0_57 = arith.constant 0 : index
    %49 = vector.load %arg2[%c8_55, %c0_56, %c0_57] : memref<9x64x64xbf16, #tpu.memory_space<vmem>>, vector<1x64x64xbf16>
    %50 = vector.shape_cast %49 : vector<1x64x64xbf16> to vector<64x64xbf16>
    %cst_58 = arith.constant dense<0.000000e+00> : vector<24x64xf32>
    %51 = tpu.matmul %48, %50, %cst_58 {dimension_numbers = #tpu.dot_dimension_numbers<[1], [0], [0], [1], [0, 0, 1, 1], [], []>} : vector<24x64xbf16>, vector<64x64xbf16>, vector<24x64xf32> -> vector<24x64xf32>
    %52 = arith.addf %46, %51 : vector<24x64xf32>
    %c0_59 = arith.constant 0 : index
    %c0_60 = arith.constant 0 : index
    %53 = vector.load %arg3[%c0_59, %c0_60] : memref<1x64xf32, #tpu.memory_space<vmem>>, vector<1x64xf32>
    %54 = vector.broadcast %53 : vector<1x64xf32> to vector<24x64xf32>
    %55 = arith.addf %52, %54 : vector<24x64xf32>
    %cst_61 = arith.constant 0.000000e+00 : f32
    %56 = vector.broadcast %cst_61 : f32 to vector<24x64xf32>
    %57 = arith.maximumf %55, %56 : vector<24x64xf32>
    %58 = arith.truncf %57 : vector<24x64xf32> to vector<24x64xbf16>
    %c0_62 = arith.constant 0 : index
    %c0_63 = arith.constant 0 : index
    %c0_64 = arith.constant 0 : index
    %59 = vector.load %arg4[%c0_62, %c0_63, %c0_64] : memref<1x24x64xbf16, #tpu.memory_space<vmem>>, vector<1x24x64xbf16>
    %60 = vector.shape_cast %59 : vector<1x24x64xbf16> to vector<24x64xbf16>
    %61 = vector.shape_cast %58 : vector<24x64xbf16> to vector<1x24x64xbf16>
    tpu.vector_store %arg4[%c0_62, %c0_63, %c0_64], %61 {strides = array<i32>} : memref<1x24x64xbf16, #tpu.memory_space<vmem>>, vector<1x24x64xbf16>,
    return
  }
  func.func @transform_0(%arg0: i32) -> (i32, i32, i32, i32) {
    %c0_i32 = arith.constant 0 : i32
    %c0_i32_0 = arith.constant 0 : i32
    %c0_i32_1 = arith.constant 0 : i32
    %c0_i32_2 = arith.constant 0 : i32
    return %arg0, %c0_i32, %c0_i32_0, %c0_i32_1 : i32, i32, i32, i32
  }
  func.func @transform_1(%arg0: i32) -> (i32, i32, i32) {
    %c0_i32 = arith.constant 0 : i32
    %c0_i32_0 = arith.constant 0 : i32
    %c0_i32_1 = arith.constant 0 : i32
    %c0_i32_2 = arith.constant 0 : i32
    return %c0_i32, %c0_i32_0, %c0_i32_1 : i32, i32, i32
  }
  func.func @transform_2(%arg0: i32) -> (i32, i32) {
    %c0_i32 = arith.constant 0 : i32
    %c0_i32_0 = arith.constant 0 : i32
    %c0_i32_1 = arith.constant 0 : i32
    return %c0_i32, %c0_i32_0 : i32, i32
  }
  func.func @transform_3(%arg0: i32) -> (i32, i32, i32) {
    %c0_i32 = arith.constant 0 : i32
    %c0_i32_0 = arith.constant 0 : i32
    %c0_i32_1 = arith.constant 0 : i32
    return %arg0, %c0_i32, %c0_i32_0 : i32, i32, i32
  }
}

module attributes {stable_mosaic.version = 11 : i64} {
  func.func @_conv_taps_kernel(%arg0: i32, %arg1: memref<1x2x24x64xbf16, #tpu.memory_space<vmem>>, %arg2: memref<9x64x128xbf16, #tpu.memory_space<vmem>>, %arg3: memref<1x128xf32, #tpu.memory_space<vmem>>, %arg4: memref<1x12x128xbf16, #tpu.memory_space<vmem>>) attributes {dimension_semantics = [#tpu.dimension_semantics<parallel>], iteration_bounds = array<i64: 2>, scalar_prefetch = 0 : i64, scratch_operands = 0 : i64, tpu.core_type = #tpu.core_type<tc>, window_params = [{transform_indices = @transform_0, window_bounds = array<i64: 1, 2, 24, 64>}, {pipeline_mode = #tpu.pipeline_mode<synchronous>, transform_indices = @transform_1, window_bounds = array<i64: 9, 64, 128>}, {pipeline_mode = #tpu.pipeline_mode<synchronous>, transform_indices = @transform_2, window_bounds = array<i64: 1, 128>}, {transform_indices = @transform_3, window_bounds = array<i64: 1, 12, 128>}]} {
    %c0 = arith.constant 0 : index
    %c0_0 = arith.constant 0 : index
    %c0_1 = arith.constant 0 : index
    %c0_2 = arith.constant 0 : index
    %0 = vector.load %arg1[%c0, %c0_0, %c0_1, %c0_2] : memref<1x2x24x64xbf16, #tpu.memory_space<vmem>>, vector<1x1x12x64xbf16>
    %1 = vector.shape_cast %0 : vector<1x1x12x64xbf16> to vector<12x64xbf16>
    %c0_3 = arith.constant 0 : index
    %c0_4 = arith.constant 0 : index
    %c0_5 = arith.constant 0 : index
    %2 = vector.load %arg2[%c0_3, %c0_4, %c0_5] : memref<9x64x128xbf16, #tpu.memory_space<vmem>>, vector<1x64x128xbf16>
    %3 = vector.shape_cast %2 : vector<1x64x128xbf16> to vector<64x128xbf16>
    %cst = arith.constant dense<0.000000e+00> : vector<12x128xf32>
    %4 = tpu.matmul %1, %3, %cst {dimension_numbers = #tpu.dot_dimension_numbers<[1], [0], [0], [1], [0, 0, 1, 1], [], []>} : vector<12x64xbf16>, vector<64x128xbf16>, vector<12x128xf32> -> vector<12x128xf32>
    %c0_6 = arith.constant 0 : index
    %c0_7 = arith.constant 0 : index
    %c1 = arith.constant 1 : index
    %c0_8 = arith.constant 0 : index
    %5 = vector.load %arg1[%c0_6, %c0_7, %c1, %c0_8] : memref<1x2x24x64xbf16, #tpu.memory_space<vmem>>, vector<1x1x12x64xbf16>
    %6 = vector.shape_cast %5 : vector<1x1x12x64xbf16> to vector<12x64xbf16>
    %c1_9 = arith.constant 1 : index
    %c0_10 = arith.constant 0 : index
    %c0_11 = arith.constant 0 : index
    %7 = vector.load %arg2[%c1_9, %c0_10, %c0_11] : memref<9x64x128xbf16, #tpu.memory_space<vmem>>, vector<1x64x128xbf16>
    %8 = vector.shape_cast %7 : vector<1x64x128xbf16> to vector<64x128xbf16>
    %cst_12 = arith.constant dense<0.000000e+00> : vector<12x128xf32>
    %9 = tpu.matmul %6, %8, %cst_12 {dimension_numbers = #tpu.dot_dimension_numbers<[1], [0], [0], [1], [0, 0, 1, 1], [], []>} : vector<12x64xbf16>, vector<64x128xbf16>, vector<12x128xf32> -> vector<12x128xf32>
    %10 = arith.addf %4, %9 : vector<12x128xf32>
    %c0_13 = arith.constant 0 : index
    %c0_14 = arith.constant 0 : index
    %c2 = arith.constant 2 : index
    %c0_15 = arith.constant 0 : index
    %11 = vector.load %arg1[%c0_13, %c0_14, %c2, %c0_15] : memref<1x2x24x64xbf16, #tpu.memory_space<vmem>>, vector<1x1x12x64xbf16>
    %12 = vector.shape_cast %11 : vector<1x1x12x64xbf16> to vector<12x64xbf16>
    %c2_16 = arith.constant 2 : index
    %c0_17 = arith.constant 0 : index
    %c0_18 = arith.constant 0 : index
    %13 = vector.load %arg2[%c2_16, %c0_17, %c0_18] : memref<9x64x128xbf16, #tpu.memory_space<vmem>>, vector<1x64x128xbf16>
    %14 = vector.shape_cast %13 : vector<1x64x128xbf16> to vector<64x128xbf16>
    %cst_19 = arith.constant dense<0.000000e+00> : vector<12x128xf32>
    %15 = tpu.matmul %12, %14, %cst_19 {dimension_numbers = #tpu.dot_dimension_numbers<[1], [0], [0], [1], [0, 0, 1, 1], [], []>} : vector<12x64xbf16>, vector<64x128xbf16>, vector<12x128xf32> -> vector<12x128xf32>
    %16 = arith.addf %10, %15 : vector<12x128xf32>
    %c0_20 = arith.constant 0 : index
    %c1_21 = arith.constant 1 : index
    %c0_22 = arith.constant 0 : index
    %c0_23 = arith.constant 0 : index
    %17 = vector.load %arg1[%c0_20, %c1_21, %c0_22, %c0_23] : memref<1x2x24x64xbf16, #tpu.memory_space<vmem>>, vector<1x1x12x64xbf16>
    %18 = vector.shape_cast %17 : vector<1x1x12x64xbf16> to vector<12x64xbf16>
    %c3 = arith.constant 3 : index
    %c0_24 = arith.constant 0 : index
    %c0_25 = arith.constant 0 : index
    %19 = vector.load %arg2[%c3, %c0_24, %c0_25] : memref<9x64x128xbf16, #tpu.memory_space<vmem>>, vector<1x64x128xbf16>
    %20 = vector.shape_cast %19 : vector<1x64x128xbf16> to vector<64x128xbf16>
    %cst_26 = arith.constant dense<0.000000e+00> : vector<12x128xf32>
    %21 = tpu.matmul %18, %20, %cst_26 {dimension_numbers = #tpu.dot_dimension_numbers<[1], [0], [0], [1], [0, 0, 1, 1], [], []>} : vector<12x64xbf16>, vector<64x128xbf16>, vector<12x128xf32> -> vector<12x128xf32>
    %22 = arith.addf %16, %21 : vector<12x128xf32>
    %c0_27 = arith.constant 0 : index
    %c1_28 = arith.constant 1 : index
    %c1_29 = arith.constant 1 : index
    %c0_30 = arith.constant 0 : index
    %23 = vector.load %arg1[%c0_27, %c1_28, %c1_29, %c0_30] : memref<1x2x24x64xbf16, #tpu.memory_space<vmem>>, vector<1x1x12x64xbf16>
    %24 = vector.shape_cast %23 : vector<1x1x12x64xbf16> to vector<12x64xbf16>
    %c4 = arith.constant 4 : index
    %c0_31 = arith.constant 0 : index
    %c0_32 = arith.constant 0 : index
    %25 = vector.load %arg2[%c4, %c0_31, %c0_32] : memref<9x64x128xbf16, #tpu.memory_space<vmem>>, vector<1x64x128xbf16>
    %26 = vector.shape_cast %25 : vector<1x64x128xbf16> to vector<64x128xbf16>
    %cst_33 = arith.constant dense<0.000000e+00> : vector<12x128xf32>
    %27 = tpu.matmul %24, %26, %cst_33 {dimension_numbers = #tpu.dot_dimension_numbers<[1], [0], [0], [1], [0, 0, 1, 1], [], []>} : vector<12x64xbf16>, vector<64x128xbf16>, vector<12x128xf32> -> vector<12x128xf32>
    %28 = arith.addf %22, %27 : vector<12x128xf32>
    %c0_34 = arith.constant 0 : index
    %c1_35 = arith.constant 1 : index
    %c2_36 = arith.constant 2 : index
    %c0_37 = arith.constant 0 : index
    %29 = vector.load %arg1[%c0_34, %c1_35, %c2_36, %c0_37] : memref<1x2x24x64xbf16, #tpu.memory_space<vmem>>, vector<1x1x12x64xbf16>
    %30 = vector.shape_cast %29 : vector<1x1x12x64xbf16> to vector<12x64xbf16>
    %c5 = arith.constant 5 : index
    %c0_38 = arith.constant 0 : index
    %c0_39 = arith.constant 0 : index
    %31 = vector.load %arg2[%c5, %c0_38, %c0_39] : memref<9x64x128xbf16, #tpu.memory_space<vmem>>, vector<1x64x128xbf16>
    %32 = vector.shape_cast %31 : vector<1x64x128xbf16> to vector<64x128xbf16>
    %cst_40 = arith.constant dense<0.000000e+00> : vector<12x128xf32>
    %33 = tpu.matmul %30, %32, %cst_40 {dimension_numbers = #tpu.dot_dimension_numbers<[1], [0], [0], [1], [0, 0, 1, 1], [], []>} : vector<12x64xbf16>, vector<64x128xbf16>, vector<12x128xf32> -> vector<12x128xf32>
    %34 = arith.addf %28, %33 : vector<12x128xf32>
    %c0_41 = arith.constant 0 : index
    %c0_42 = arith.constant 0 : index
    %c6 = arith.constant 6 : index
    %c0_43 = arith.constant 0 : index
    %35 = vector.load %arg1[%c0_41, %c0_42, %c6, %c0_43] : memref<1x2x24x64xbf16, #tpu.memory_space<vmem>>, vector<1x1x12x64xbf16>
    %36 = vector.shape_cast %35 : vector<1x1x12x64xbf16> to vector<12x64xbf16>
    %c6_44 = arith.constant 6 : index
    %c0_45 = arith.constant 0 : index
    %c0_46 = arith.constant 0 : index
    %37 = vector.load %arg2[%c6_44, %c0_45, %c0_46] : memref<9x64x128xbf16, #tpu.memory_space<vmem>>, vector<1x64x128xbf16>
    %38 = vector.shape_cast %37 : vector<1x64x128xbf16> to vector<64x128xbf16>
    %cst_47 = arith.constant dense<0.000000e+00> : vector<12x128xf32>
    %39 = tpu.matmul %36, %38, %cst_47 {dimension_numbers = #tpu.dot_dimension_numbers<[1], [0], [0], [1], [0, 0, 1, 1], [], []>} : vector<12x64xbf16>, vector<64x128xbf16>, vector<12x128xf32> -> vector<12x128xf32>
    %40 = arith.addf %34, %39 : vector<12x128xf32>
    %c0_48 = arith.constant 0 : index
    %c0_49 = arith.constant 0 : index
    %c7 = arith.constant 7 : index
    %c0_50 = arith.constant 0 : index
    %41 = vector.load %arg1[%c0_48, %c0_49, %c7, %c0_50] : memref<1x2x24x64xbf16, #tpu.memory_space<vmem>>, vector<1x1x12x64xbf16>
    %42 = vector.shape_cast %41 : vector<1x1x12x64xbf16> to vector<12x64xbf16>
    %c7_51 = arith.constant 7 : index
    %c0_52 = arith.constant 0 : index
    %c0_53 = arith.constant 0 : index
    %43 = vector.load %arg2[%c7_51, %c0_52, %c0_53] : memref<9x64x128xbf16, #tpu.memory_space<vmem>>, vector<1x64x128xbf16>
    %44 = vector.shape_cast %43 : vector<1x64x128xbf16> to vector<64x128xbf16>
    %cst_54 = arith.constant dense<0.000000e+00> : vector<12x128xf32>
    %45 = tpu.matmul %42, %44, %cst_54 {dimension_numbers = #tpu.dot_dimension_numbers<[1], [0], [0], [1], [0, 0, 1, 1], [], []>} : vector<12x64xbf16>, vector<64x128xbf16>, vector<12x128xf32> -> vector<12x128xf32>
    %46 = arith.addf %40, %45 : vector<12x128xf32>
    %c0_55 = arith.constant 0 : index
    %c0_56 = arith.constant 0 : index
    %c8 = arith.constant 8 : index
    %c0_57 = arith.constant 0 : index
    %47 = vector.load %arg1[%c0_55, %c0_56, %c8, %c0_57] : memref<1x2x24x64xbf16, #tpu.memory_space<vmem>>, vector<1x1x12x64xbf16>
    %48 = vector.shape_cast %47 : vector<1x1x12x64xbf16> to vector<12x64xbf16>
    %c8_58 = arith.constant 8 : index
    %c0_59 = arith.constant 0 : index
    %c0_60 = arith.constant 0 : index
    %49 = vector.load %arg2[%c8_58, %c0_59, %c0_60] : memref<9x64x128xbf16, #tpu.memory_space<vmem>>, vector<1x64x128xbf16>
    %50 = vector.shape_cast %49 : vector<1x64x128xbf16> to vector<64x128xbf16>
    %cst_61 = arith.constant dense<0.000000e+00> : vector<12x128xf32>
    %51 = tpu.matmul %48, %50, %cst_61 {dimension_numbers = #tpu.dot_dimension_numbers<[1], [0], [0], [1], [0, 0, 1, 1], [], []>} : vector<12x64xbf16>, vector<64x128xbf16>, vector<12x128xf32> -> vector<12x128xf32>
    %52 = arith.addf %46, %51 : vector<12x128xf32>
    %c0_62 = arith.constant 0 : index
    %c0_63 = arith.constant 0 : index
    %53 = vector.load %arg3[%c0_62, %c0_63] : memref<1x128xf32, #tpu.memory_space<vmem>>, vector<1x128xf32>
    %54 = vector.broadcast %53 : vector<1x128xf32> to vector<12x128xf32>
    %55 = arith.addf %52, %54 : vector<12x128xf32>
    %cst_64 = arith.constant 0.000000e+00 : f32
    %56 = vector.broadcast %cst_64 : f32 to vector<12x128xf32>
    %57 = arith.maximumf %55, %56 : vector<12x128xf32>
    %58 = arith.truncf %57 : vector<12x128xf32> to vector<12x128xbf16>
    %c0_65 = arith.constant 0 : index
    %c0_66 = arith.constant 0 : index
    %c0_67 = arith.constant 0 : index
    %59 = vector.load %arg4[%c0_65, %c0_66, %c0_67] : memref<1x12x128xbf16, #tpu.memory_space<vmem>>, vector<1x12x128xbf16>
    %60 = vector.shape_cast %59 : vector<1x12x128xbf16> to vector<12x128xbf16>
    %61 = vector.shape_cast %58 : vector<12x128xbf16> to vector<1x12x128xbf16>
    tpu.vector_store %arg4[%c0_65, %c0_66, %c0_67], %61 {strides = array<i32>} : memref<1x12x128xbf16, #tpu.memory_space<vmem>>, vector<1x12x128xbf16>,
    return
  }
  func.func @transform_0(%arg0: i32) -> (i32, i32, i32, i32) {
    %c0_i32 = arith.constant 0 : i32
    %c0_i32_0 = arith.constant 0 : i32
    %c0_i32_1 = arith.constant 0 : i32
    %c0_i32_2 = arith.constant 0 : i32
    return %arg0, %c0_i32, %c0_i32_0, %c0_i32_1 : i32, i32, i32, i32
  }
  func.func @transform_1(%arg0: i32) -> (i32, i32, i32) {
    %c0_i32 = arith.constant 0 : i32
    %c0_i32_0 = arith.constant 0 : i32
    %c0_i32_1 = arith.constant 0 : i32
    %c0_i32_2 = arith.constant 0 : i32
    return %c0_i32, %c0_i32_0, %c0_i32_1 : i32, i32, i32
  }
  func.func @transform_2(%arg0: i32) -> (i32, i32) {
    %c0_i32 = arith.constant 0 : i32
    %c0_i32_0 = arith.constant 0 : i32
    %c0_i32_1 = arith.constant 0 : i32
    return %c0_i32, %c0_i32_0 : i32, i32
  }
  func.func @transform_3(%arg0: i32) -> (i32, i32, i32) {
    %c0_i32 = arith.constant 0 : i32
    %c0_i32_0 = arith.constant 0 : i32
    %c0_i32_1 = arith.constant 0 : i32
    return %arg0, %c0_i32, %c0_i32_0 : i32, i32, i32
  }
}

module attributes {stable_mosaic.version = 11 : i64} {
  func.func @_conv_taps_kernel(%arg0: i32, %arg1: memref<1x1x20x128xbf16, #tpu.memory_space<vmem>>, %arg2: memref<9x128x128xbf16, #tpu.memory_space<vmem>>, %arg3: memref<1x128xf32, #tpu.memory_space<vmem>>, %arg4: memref<1x8x128xbf16, #tpu.memory_space<vmem>>) attributes {dimension_semantics = [#tpu.dimension_semantics<parallel>], iteration_bounds = array<i64: 2>, scalar_prefetch = 0 : i64, scratch_operands = 0 : i64, tpu.core_type = #tpu.core_type<tc>, window_params = [{transform_indices = @transform_0, window_bounds = array<i64: 1, 1, 20, 128>}, {pipeline_mode = #tpu.pipeline_mode<synchronous>, transform_indices = @transform_1, window_bounds = array<i64: 9, 128, 128>}, {pipeline_mode = #tpu.pipeline_mode<synchronous>, transform_indices = @transform_2, window_bounds = array<i64: 1, 128>}, {transform_indices = @transform_3, window_bounds = array<i64: 1, 8, 128>}]} {
    %c0 = arith.constant 0 : index
    %c0_0 = arith.constant 0 : index
    %c0_1 = arith.constant 0 : index
    %c0_2 = arith.constant 0 : index
    %0 = vector.load %arg1[%c0, %c0_0, %c0_1, %c0_2] : memref<1x1x20x128xbf16, #tpu.memory_space<vmem>>, vector<1x1x8x128xbf16>
    %1 = vector.shape_cast %0 : vector<1x1x8x128xbf16> to vector<8x128xbf16>
    %c0_3 = arith.constant 0 : index
    %c0_4 = arith.constant 0 : index
    %c0_5 = arith.constant 0 : index
    %2 = vector.load %arg2[%c0_3, %c0_4, %c0_5] : memref<9x128x128xbf16, #tpu.memory_space<vmem>>, vector<1x128x128xbf16>
    %3 = vector.shape_cast %2 : vector<1x128x128xbf16> to vector<128x128xbf16>
    %cst = arith.constant dense<0.000000e+00> : vector<8x128xf32>
    %4 = tpu.matmul %1, %3, %cst {dimension_numbers = #tpu.dot_dimension_numbers<[1], [0], [0], [1], [0, 0, 1, 1], [], []>} : vector<8x128xbf16>, vector<128x128xbf16>, vector<8x128xf32> -> vector<8x128xf32>
    %c0_6 = arith.constant 0 : index
    %c0_7 = arith.constant 0 : index
    %c1 = arith.constant 1 : index
    %c0_8 = arith.constant 0 : index
    %5 = vector.load %arg1[%c0_6, %c0_7, %c1, %c0_8] : memref<1x1x20x128xbf16, #tpu.memory_space<vmem>>, vector<1x1x8x128xbf16>
    %6 = vector.shape_cast %5 : vector<1x1x8x128xbf16> to vector<8x128xbf16>
    %c1_9 = arith.constant 1 : index
    %c0_10 = arith.constant 0 : index
    %c0_11 = arith.constant 0 : index
    %7 = vector.load %arg2[%c1_9, %c0_10, %c0_11] : memref<9x128x128xbf16, #tpu.memory_space<vmem>>, vector<1x128x128xbf16>
    %8 = vector.shape_cast %7 : vector<1x128x128xbf16> to vector<128x128xbf16>
    %cst_12 = arith.constant dense<0.000000e+00> : vector<8x128xf32>
    %9 = tpu.matmul %6, %8, %cst_12 {dimension_numbers = #tpu.dot_dimension_numbers<[1], [0], [0], [1], [0, 0, 1, 1], [], []>} : vector<8x128xbf16>, vector<128x128xbf16>, vector<8x128xf32> -> vector<8x128xf32>
    %10 = arith.addf %4, %9 : vector<8x128xf32>
    %c0_13 = arith.constant 0 : index
    %c0_14 = arith.constant 0 : index
    %c2 = arith.constant 2 : index
    %c0_15 = arith.constant 0 : index
    %11 = vector.load %arg1[%c0_13, %c0_14, %c2, %c0_15] : memref<1x1x20x128xbf16, #tpu.memory_space<vmem>>, vector<1x1x8x128xbf16>
    %12 = vector.shape_cast %11 : vector<1x1x8x128xbf16> to vector<8x128xbf16>
    %c2_16 = arith.constant 2 : index
    %c0_17 = arith.constant 0 : index
    %c0_18 = arith.constant 0 : index
    %13 = vector.load %arg2[%c2_16, %c0_17, %c0_18] : memref<9x128x128xbf16, #tpu.memory_space<vmem>>, vector<1x128x128xbf16>
    %14 = vector.shape_cast %13 : vector<1x128x128xbf16> to vector<128x128xbf16>
    %cst_19 = arith.constant dense<0.000000e+00> : vector<8x128xf32>
    %15 = tpu.matmul %12, %14, %cst_19 {dimension_numbers = #tpu.dot_dimension_numbers<[1], [0], [0], [1], [0, 0, 1, 1], [], []>} : vector<8x128xbf16>, vector<128x128xbf16>, vector<8x128xf32> -> vector<8x128xf32>
    %16 = arith.addf %10, %15 : vector<8x128xf32>
    %c0_20 = arith.constant 0 : index
    %c0_21 = arith.constant 0 : index
    %c4 = arith.constant 4 : index
    %c0_22 = arith.constant 0 : index
    %17 = vector.load %arg1[%c0_20, %c0_21, %c4, %c0_22] : memref<1x1x20x128xbf16, #tpu.memory_space<vmem>>, vector<1x1x8x128xbf16>
    %18 = vector.shape_cast %17 : vector<1x1x8x128xbf16> to vector<8x128xbf16>
    %c3 = arith.constant 3 : index
    %c0_23 = arith.constant 0 : index
    %c0_24 = arith.constant 0 : index
    %19 = vector.load %arg2[%c3, %c0_23, %c0_24] : memref<9x128x128xbf16, #tpu.memory_space<vmem>>, vector<1x128x128xbf16>
    %20 = vector.shape_cast %19 : vector<1x128x128xbf16> to vector<128x128xbf16>
    %cst_25 = arith.constant dense<0.000000e+00> : vector<8x128xf32>
    %21 = tpu.matmul %18, %20, %cst_25 {dimension_numbers = #tpu.dot_dimension_numbers<[1], [0], [0], [1], [0, 0, 1, 1], [], []>} : vector<8x128xbf16>, vector<128x128xbf16>, vector<8x128xf32> -> vector<8x128xf32>
    %22 = arith.addf %16, %21 : vector<8x128xf32>
    %c0_26 = arith.constant 0 : index
    %c0_27 = arith.constant 0 : index
    %c5 = arith.constant 5 : index
    %c0_28 = arith.constant 0 : index
    %23 = vector.load %arg1[%c0_26, %c0_27, %c5, %c0_28] : memref<1x1x20x128xbf16, #tpu.memory_space<vmem>>, vector<1x1x8x128xbf16>
    %24 = vector.shape_cast %23 : vector<1x1x8x128xbf16> to vector<8x128xbf16>
    %c4_29 = arith.constant 4 : index
    %c0_30 = arith.constant 0 : index
    %c0_31 = arith.constant 0 : index
    %25 = vector.load %arg2[%c4_29, %c0_30, %c0_31] : memref<9x128x128xbf16, #tpu.memory_space<vmem>>, vector<1x128x128xbf16>
    %26 = vector.shape_cast %25 : vector<1x128x128xbf16> to vector<128x128xbf16>
    %cst_32 = arith.constant dense<0.000000e+00> : vector<8x128xf32>
    %27 = tpu.matmul %24, %26, %cst_32 {dimension_numbers = #tpu.dot_dimension_numbers<[1], [0], [0], [1], [0, 0, 1, 1], [], []>} : vector<8x128xbf16>, vector<128x128xbf16>, vector<8x128xf32> -> vector<8x128xf32>
    %28 = arith.addf %22, %27 : vector<8x128xf32>
    %c0_33 = arith.constant 0 : index
    %c0_34 = arith.constant 0 : index
    %c6 = arith.constant 6 : index
    %c0_35 = arith.constant 0 : index
    %29 = vector.load %arg1[%c0_33, %c0_34, %c6, %c0_35] : memref<1x1x20x128xbf16, #tpu.memory_space<vmem>>, vector<1x1x8x128xbf16>
    %30 = vector.shape_cast %29 : vector<1x1x8x128xbf16> to vector<8x128xbf16>
    %c5_36 = arith.constant 5 : index
    %c0_37 = arith.constant 0 : index
    %c0_38 = arith.constant 0 : index
    %31 = vector.load %arg2[%c5_36, %c0_37, %c0_38] : memref<9x128x128xbf16, #tpu.memory_space<vmem>>, vector<1x128x128xbf16>
    %32 = vector.shape_cast %31 : vector<1x128x128xbf16> to vector<128x128xbf16>
    %cst_39 = arith.constant dense<0.000000e+00> : vector<8x128xf32>
    %33 = tpu.matmul %30, %32, %cst_39 {dimension_numbers = #tpu.dot_dimension_numbers<[1], [0], [0], [1], [0, 0, 1, 1], [], []>} : vector<8x128xbf16>, vector<128x128xbf16>, vector<8x128xf32> -> vector<8x128xf32>
    %34 = arith.addf %28, %33 : vector<8x128xf32>
    %c0_40 = arith.constant 0 : index
    %c0_41 = arith.constant 0 : index
    %c8 = arith.constant 8 : index
    %c0_42 = arith.constant 0 : index
    %35 = vector.load %arg1[%c0_40, %c0_41, %c8, %c0_42] : memref<1x1x20x128xbf16, #tpu.memory_space<vmem>>, vector<1x1x8x128xbf16>
    %36 = vector.shape_cast %35 : vector<1x1x8x128xbf16> to vector<8x128xbf16>
    %c6_43 = arith.constant 6 : index
    %c0_44 = arith.constant 0 : index
    %c0_45 = arith.constant 0 : index
    %37 = vector.load %arg2[%c6_43, %c0_44, %c0_45] : memref<9x128x128xbf16, #tpu.memory_space<vmem>>, vector<1x128x128xbf16>
    %38 = vector.shape_cast %37 : vector<1x128x128xbf16> to vector<128x128xbf16>
    %cst_46 = arith.constant dense<0.000000e+00> : vector<8x128xf32>
    %39 = tpu.matmul %36, %38, %cst_46 {dimension_numbers = #tpu.dot_dimension_numbers<[1], [0], [0], [1], [0, 0, 1, 1], [], []>} : vector<8x128xbf16>, vector<128x128xbf16>, vector<8x128xf32> -> vector<8x128xf32>
    %40 = arith.addf %34, %39 : vector<8x128xf32>
    %c0_47 = arith.constant 0 : index
    %c0_48 = arith.constant 0 : index
    %c9 = arith.constant 9 : index
    %c0_49 = arith.constant 0 : index
    %41 = vector.load %arg1[%c0_47, %c0_48, %c9, %c0_49] : memref<1x1x20x128xbf16, #tpu.memory_space<vmem>>, vector<1x1x8x128xbf16>
    %42 = vector.shape_cast %41 : vector<1x1x8x128xbf16> to vector<8x128xbf16>
    %c7 = arith.constant 7 : index
    %c0_50 = arith.constant 0 : index
    %c0_51 = arith.constant 0 : index
    %43 = vector.load %arg2[%c7, %c0_50, %c0_51] : memref<9x128x128xbf16, #tpu.memory_space<vmem>>, vector<1x128x128xbf16>
    %44 = vector.shape_cast %43 : vector<1x128x128xbf16> to vector<128x128xbf16>
    %cst_52 = arith.constant dense<0.000000e+00> : vector<8x128xf32>
    %45 = tpu.matmul %42, %44, %cst_52 {dimension_numbers = #tpu.dot_dimension_numbers<[1], [0], [0], [1], [0, 0, 1, 1], [], []>} : vector<8x128xbf16>, vector<128x128xbf16>, vector<8x128xf32> -> vector<8x128xf32>
    %46 = arith.addf %40, %45 : vector<8x128xf32>
    %c0_53 = arith.constant 0 : index
    %c0_54 = arith.constant 0 : index
    %c10 = arith.constant 10 : index
    %c0_55 = arith.constant 0 : index
    %47 = vector.load %arg1[%c0_53, %c0_54, %c10, %c0_55] : memref<1x1x20x128xbf16, #tpu.memory_space<vmem>>, vector<1x1x8x128xbf16>
    %48 = vector.shape_cast %47 : vector<1x1x8x128xbf16> to vector<8x128xbf16>
    %c8_56 = arith.constant 8 : index
    %c0_57 = arith.constant 0 : index
    %c0_58 = arith.constant 0 : index
    %49 = vector.load %arg2[%c8_56, %c0_57, %c0_58] : memref<9x128x128xbf16, #tpu.memory_space<vmem>>, vector<1x128x128xbf16>
    %50 = vector.shape_cast %49 : vector<1x128x128xbf16> to vector<128x128xbf16>
    %cst_59 = arith.constant dense<0.000000e+00> : vector<8x128xf32>
    %51 = tpu.matmul %48, %50, %cst_59 {dimension_numbers = #tpu.dot_dimension_numbers<[1], [0], [0], [1], [0, 0, 1, 1], [], []>} : vector<8x128xbf16>, vector<128x128xbf16>, vector<8x128xf32> -> vector<8x128xf32>
    %52 = arith.addf %46, %51 : vector<8x128xf32>
    %c0_60 = arith.constant 0 : index
    %c0_61 = arith.constant 0 : index
    %53 = vector.load %arg3[%c0_60, %c0_61] : memref<1x128xf32, #tpu.memory_space<vmem>>, vector<1x128xf32>
    %54 = vector.broadcast %53 : vector<1x128xf32> to vector<8x128xf32>
    %55 = arith.addf %52, %54 : vector<8x128xf32>
    %cst_62 = arith.constant 0.000000e+00 : f32
    %56 = vector.broadcast %cst_62 : f32 to vector<8x128xf32>
    %57 = arith.maximumf %55, %56 : vector<8x128xf32>
    %58 = arith.truncf %57 : vector<8x128xf32> to vector<8x128xbf16>
    %c0_63 = arith.constant 0 : index
    %c0_64 = arith.constant 0 : index
    %c0_65 = arith.constant 0 : index
    %59 = vector.load %arg4[%c0_63, %c0_64, %c0_65] : memref<1x8x128xbf16, #tpu.memory_space<vmem>>, vector<1x8x128xbf16>
    %60 = vector.shape_cast %59 : vector<1x8x128xbf16> to vector<8x128xbf16>
    %61 = vector.shape_cast %58 : vector<8x128xbf16> to vector<1x8x128xbf16>
    tpu.vector_store %arg4[%c0_63, %c0_64, %c0_65], %61 {strides = array<i32>} : memref<1x8x128xbf16, #tpu.memory_space<vmem>>, vector<1x8x128xbf16>,
    return
  }
  func.func @transform_0(%arg0: i32) -> (i32, i32, i32, i32) {
    %c0_i32 = arith.constant 0 : i32
    %c0_i32_0 = arith.constant 0 : i32
    %c0_i32_1 = arith.constant 0 : i32
    %c0_i32_2 = arith.constant 0 : i32
    return %arg0, %c0_i32, %c0_i32_0, %c0_i32_1 : i32, i32, i32, i32
  }
  func.func @transform_1(%arg0: i32) -> (i32, i32, i32) {
    %c0_i32 = arith.constant 0 : i32
    %c0_i32_0 = arith.constant 0 : i32
    %c0_i32_1 = arith.constant 0 : i32
    %c0_i32_2 = arith.constant 0 : i32
    return %c0_i32, %c0_i32_0, %c0_i32_1 : i32, i32, i32
  }
  func.func @transform_2(%arg0: i32) -> (i32, i32) {
    %c0_i32 = arith.constant 0 : i32
    %c0_i32_0 = arith.constant 0 : i32
    %c0_i32_1 = arith.constant 0 : i32
    return %c0_i32, %c0_i32_0 : i32, i32
  }
  func.func @transform_3(%arg0: i32) -> (i32, i32, i32) {
    %c0_i32 = arith.constant 0 : i32
    %c0_i32_0 = arith.constant 0 : i32
    %c0_i32_1 = arith.constant 0 : i32
    return %arg0, %c0_i32, %c0_i32_0 : i32, i32, i32
  }
}

module attributes {stable_mosaic.version = 11 : i64} {
  func.func @_dense_stack_kernel(%arg0: i32, %arg1: memref<8x512xbf16, #tpu.memory_space<vmem>>, %arg2: memref<512x128xbf16, #tpu.memory_space<vmem>>, %arg3: memref<1x128xf32, #tpu.memory_space<vmem>>, %arg4: memref<128x128xbf16, #tpu.memory_space<vmem>>, %arg5: memref<1x128xf32, #tpu.memory_space<vmem>>, %arg6: memref<128x128xbf16, #tpu.memory_space<vmem>>, %arg7: memref<1x128xf32, #tpu.memory_space<vmem>>, %arg8: memref<128x10xbf16, #tpu.memory_space<vmem>>, %arg9: memref<1x10xf32, #tpu.memory_space<vmem>>, %arg10: memref<8x128xbf16, #tpu.memory_space<vmem>>, %arg11: memref<8x10xf32, #tpu.memory_space<vmem>>) attributes {dimension_semantics = [#tpu.dimension_semantics<parallel>], iteration_bounds = array<i64: 1>, scalar_prefetch = 0 : i64, scratch_operands = 0 : i64, tpu.core_type = #tpu.core_type<tc>, window_params = [{transform_indices = @transform_0, window_bounds = array<i64: 8, 512>}, {pipeline_mode = #tpu.pipeline_mode<synchronous>, transform_indices = @transform_1, window_bounds = array<i64: 512, 128>}, {pipeline_mode = #tpu.pipeline_mode<synchronous>, transform_indices = @transform_2, window_bounds = array<i64: 1, 128>}, {pipeline_mode = #tpu.pipeline_mode<synchronous>, transform_indices = @transform_3, window_bounds = array<i64: 128, 128>}, {pipeline_mode = #tpu.pipeline_mode<synchronous>, transform_indices = @transform_4, window_bounds = array<i64: 1, 128>}, {pipeline_mode = #tpu.pipeline_mode<synchronous>, transform_indices = @transform_5, window_bounds = array<i64: 128, 128>}, {pipeline_mode = #tpu.pipeline_mode<synchronous>, transform_indices = @transform_6, window_bounds = array<i64: 1, 128>}, {pipeline_mode = #tpu.pipeline_mode<synchronous>, transform_indices = @transform_7, window_bounds = array<i64: 128, 10>}, {pipeline_mode = #tpu.pipeline_mode<synchronous>, transform_indices = @transform_8, window_bounds = array<i64: 1, 10>}, {transform_indices = @transform_9, window_bounds = array<i64: 8, 128>}, {transform_indices = @transform_10, window_bounds = array<i64: 8, 10>}]} {
    %c0 = arith.constant 0 : index
    %c0_0 = arith.constant 0 : index
    %0 = vector.load %arg1[%c0, %c0_0] : memref<8x512xbf16, #tpu.memory_space<vmem>>, vector<8x512xbf16>
    %c0_1 = arith.constant 0 : index
    %c0_2 = arith.constant 0 : index
    %1 = vector.load %arg2[%c0_1, %c0_2] : memref<512x128xbf16, #tpu.memory_space<vmem>>, vector<512x128xbf16>
    %cst = arith.constant dense<0.000000e+00> : vector<8x128xf32>
    %2 = tpu.matmul %0, %1, %cst {dimension_numbers = #tpu.dot_dimension_numbers<[1], [0], [0], [1], [0, 0, 1, 1], [], []>} : vector<8x512xbf16>, vector<512x128xbf16>, vector<8x128xf32> -> vector<8x128xf32>
    %c0_3 = arith.constant 0 : index
    %c0_4 = arith.constant 0 : index
    %3 = vector.load %arg3[%c0_3, %c0_4] : memref<1x128xf32, #tpu.memory_space<vmem>>, vector<1x128xf32>
    %4 = vector.broadcast %3 : vector<1x128xf32> to vector<8x128xf32>
    %5 = arith.addf %2, %4 : vector<8x128xf32>
    %cst_5 = arith.constant 0.000000e+00 : f32
    %6 = vector.broadcast %cst_5 : f32 to vector<8x128xf32>
    %7 = arith.maximumf %5, %6 : vector<8x128xf32>
    %8 = arith.truncf %7 : vector<8x128xf32> to vector<8x128xbf16>
    %c0_6 = arith.constant 0 : index
    %c0_7 = arith.constant 0 : index
    %9 = vector.load %arg10[%c0_6, %c0_7] : memref<8x128xbf16, #tpu.memory_space<vmem>>, vector<8x128xbf16>
    tpu.vector_store %arg10[%c0_6, %c0_7], %8 {strides = array<i32>} : memref<8x128xbf16, #tpu.memory_space<vmem>>, vector<8x128xbf16>,
    %10 = arith.truncf %7 : vector<8x128xf32> to vector<8x128xbf16>
    %c0_8 = arith.constant 0 : index
    %c0_9 = arith.constant 0 : index
    %11 = vector.load %arg4[%c0_8, %c0_9] : memref<128x128xbf16, #tpu.memory_space<vmem>>, vector<128x128xbf16>
    %cst_10 = arith.constant dense<0.000000e+00> : vector<8x128xf32>
    %12 = tpu.matmul %10, %11, %cst_10 {dimension_numbers = #tpu.dot_dimension_numbers<[1], [0], [0], [1], [0, 0, 1, 1], [], []>} : vector<8x128xbf16>, vector<128x128xbf16>, vector<8x128xf32> -> vector<8x128xf32>
    %c0_11 = arith.constant 0 : index
    %c0_12 = arith.constant 0 : index
    %13 = vector.load %arg5[%c0_11, %c0_12] : memref<1x128xf32, #tpu.memory_space<vmem>>, vector<1x128xf32>
    %14 = vector.broadcast %13 : vector<1x128xf32> to vector<8x128xf32>
    %15 = arith.addf %12, %14 : vector<8x128xf32>
    %cst_13 = arith.constant 0.000000e+00 : f32
    %16 = vector.broadcast %cst_13 : f32 to vector<8x128xf32>
    %17 = arith.maximumf %15, %16 : vector<8x128xf32>
    %18 = arith.truncf %17 : vector<8x128xf32> to vector<8x128xbf16>
    %c0_14 = arith.constant 0 : index
    %c0_15 = arith.constant 0 : index
    %19 = vector.load %arg6[%c0_14, %c0_15] : memref<128x128xbf16, #tpu.memory_space<vmem>>, vector<128x128xbf16>
    %cst_16 = arith.constant dense<0.000000e+00> : vector<8x128xf32>
    %20 = tpu.matmul %18, %19, %cst_16 {dimension_numbers = #tpu.dot_dimension_numbers<[1], [0], [0], [1], [0, 0, 1, 1], [], []>} : vector<8x128xbf16>, vector<128x128xbf16>, vector<8x128xf32> -> vector<8x128xf32>
    %c0_17 = arith.constant 0 : index
    %c0_18 = arith.constant 0 : index
    %21 = vector.load %arg7[%c0_17, %c0_18] : memref<1x128xf32, #tpu.memory_space<vmem>>, vector<1x128xf32>
    %22 = vector.broadcast %21 : vector<1x128xf32> to vector<8x128xf32>
    %23 = arith.addf %20, %22 : vector<8x128xf32>
    %cst_19 = arith.constant 0.000000e+00 : f32
    %24 = vector.broadcast %cst_19 : f32 to vector<8x128xf32>
    %25 = arith.maximumf %23, %24 : vector<8x128xf32>
    %26 = arith.truncf %25 : vector<8x128xf32> to vector<8x128xbf16>
    %c0_20 = arith.constant 0 : index
    %c0_21 = arith.constant 0 : index
    %27 = vector.load %arg8[%c0_20, %c0_21] : memref<128x10xbf16, #tpu.memory_space<vmem>>, vector<128x10xbf16>
    %cst_22 = arith.constant dense<0.000000e+00> : vector<8x10xf32>
    %28 = tpu.matmul %26, %27, %cst_22 {dimension_numbers = #tpu.dot_dimension_numbers<[1], [0], [0], [1], [0, 0, 1, 1], [], []>} : vector<8x128xbf16>, vector<128x10xbf16>, vector<8x10xf32> -> vector<8x10xf32>
    %c0_23 = arith.constant 0 : index
    %c0_24 = arith.constant 0 : index
    %29 = vector.load %arg9[%c0_23, %c0_24] : memref<1x10xf32, #tpu.memory_space<vmem>>, vector<1x10xf32>
    %30 = vector.broadcast %29 : vector<1x10xf32> to vector<8x10xf32>
    %31 = arith.addf %28, %30 : vector<8x10xf32>
    %c0_25 = arith.constant 0 : index
    %c0_26 = arith.constant 0 : index
    %32 = vector.load %arg11[%c0_25, %c0_26] : memref<8x10xf32, #tpu.memory_space<vmem>>, vector<8x10xf32>
    tpu.vector_store %arg11[%c0_25, %c0_26], %31 {strides = array<i32>} : memref<8x10xf32, #tpu.memory_space<vmem>>, vector<8x10xf32>,
    return
  }
  func.func @transform_0(%arg0: i32) -> (i32, i32) {
    %c0_i32 = arith.constant 0 : i32
    %c0_i32_0 = arith.constant 0 : i32
    return %arg0, %c0_i32 : i32, i32
  }
  func.func @transform_1(%arg0: i32) -> (i32, i32) {
    %c0_i32 = arith.constant 0 : i32
    %c0_i32_0 = arith.constant 0 : i32
    %c0_i32_1 = arith.constant 0 : i32
    return %c0_i32, %c0_i32_0 : i32, i32
  }
  func.func @transform_2(%arg0: i32) -> (i32, i32) {
    %c0_i32 = arith.constant 0 : i32
    %c0_i32_0 = arith.constant 0 : i32
    %c0_i32_1 = arith.constant 0 : i32
    return %c0_i32, %c0_i32_0 : i32, i32
  }
  func.func @transform_3(%arg0: i32) -> (i32, i32) {
    %c0_i32 = arith.constant 0 : i32
    %c0_i32_0 = arith.constant 0 : i32
    %c0_i32_1 = arith.constant 0 : i32
    return %c0_i32, %c0_i32_0 : i32, i32
  }
  func.func @transform_4(%arg0: i32) -> (i32, i32) {
    %c0_i32 = arith.constant 0 : i32
    %c0_i32_0 = arith.constant 0 : i32
    %c0_i32_1 = arith.constant 0 : i32
    return %c0_i32, %c0_i32_0 : i32, i32
  }
  func.func @transform_5(%arg0: i32) -> (i32, i32) {
    %c0_i32 = arith.constant 0 : i32
    %c0_i32_0 = arith.constant 0 : i32
    %c0_i32_1 = arith.constant 0 : i32
    return %c0_i32, %c0_i32_0 : i32, i32
  }
  func.func @transform_6(%arg0: i32) -> (i32, i32) {
    %c0_i32 = arith.constant 0 : i32
    %c0_i32_0 = arith.constant 0 : i32
    %c0_i32_1 = arith.constant 0 : i32
    return %c0_i32, %c0_i32_0 : i32, i32
  }
  func.func @transform_7(%arg0: i32) -> (i32, i32) {
    %c0_i32 = arith.constant 0 : i32
    %c0_i32_0 = arith.constant 0 : i32
    %c0_i32_1 = arith.constant 0 : i32
    return %c0_i32, %c0_i32_0 : i32, i32
  }
  func.func @transform_8(%arg0: i32) -> (i32, i32) {
    %c0_i32 = arith.constant 0 : i32
    %c0_i32_0 = arith.constant 0 : i32
    %c0_i32_1 = arith.constant 0 : i32
    return %c0_i32, %c0_i32_0 : i32, i32
  }
  func.func @transform_9(%arg0: i32) -> (i32, i32) {
    %c0_i32 = arith.constant 0 : i32
    %c0_i32_0 = arith.constant 0 : i32
    return %arg0, %c0_i32 : i32, i32
  }
  func.func @transform_10(%arg0: i32) -> (i32, i32) {
    %c0_i32 = arith.constant 0 : i32
    %c0_i32_0 = arith.constant 0 : i32
    return %arg0, %c0_i32 : i32, i32
  }
}

</mosaic_0001>

<bundles_post_ra>
// kernel: deep_transfer_forward.7
= control target key start
LH: loop header
LB: loop body
LE: loop exit
PB: predicated region body
PF: predicated region fallthrough
CT: control target
= control target key end

     0   :  { %s2156_s12 = smov 0   ;;  %s2792_s0 = inlined_call_operand.vmem [shape: bf16[2,2,180,3], index: 0, kind: input, shape index: {}]   ;;  %s2793_s1 = inlined_call_operand.vmem [shape: bf16[9,3,32], index: 1, kind: input, shape index: {}]   ;;  %s2794_s2 = inlined_call_operand.vmem [shape: f32[1,32], index: 2, kind: input, shape index: {}]   ;;  %s2795_s3 = inlined_call_operand.vmem [shape: bf16[2,144,32], index: 3, kind: output, shape index: {}]  }
   0x1 LB: > { %s1801_s13 = sadd.s32 4294967295, %s2133_s12   ;;  %p1805_p0 = scmp.ge.s32.totalorder %s2133_s12, 1  ;;  %s2133_s12 = sphi %s2156_s12, %s13_s12  }
   0x2   : > { %p137_p1 = scmp.lt.s32.totalorder %s2133_s12, 3 }
   0x4   : > { %p138_p2 = pnand %p1805_p0, %p137_p1 }
   0x5   : > { %p161_p3 = scmp.lt.s32.totalorder (!%p138_p2), %s1801_s13, 1 }
   0x6   : > { %141 = sbr.rel (%p138_p2) target bundleno = 497 (0x1f1), region = 32 }
   0xb   : > { %v1808_v0 = vld [vmem:[%s2793_s1 + $0x2] sm:$0x3]  ;;  %vm347_vm0 = vcmask 1040384   ;;  %vm348_vm1 = vcmask 1041408   ;;  %v2135_v1 = vmov 65535   ;;  %s2797_s13 = smov (!%p161_p3, %s1801_s13), 1 }
   0xc   : > { %v349_v2 = vsel %vm347_vm0, 4294967295, %v2135_v1  ;;  %v1859_v3 = vld [vmem:[%s2793_s1 + $0x4] sm:$0x3]  ;;  %v190_v5 = vld [vmem:[%s2793_s1] sm:$0x3]  ;;  %s2112_s22 = smul.u32 184, %s2797_s13 }
   0xd   : > { %v2170_v4 = vsel %vm348_vm1, %v349_v2, 0  ;;  %v1887_v6 = vld [vmem:[%s2793_s1 + $0x6] sm:$0x3]  ;;  %vm242_vm2 = vsmask.f32 7424  ;;  %vm319_vm3 = vcmask 23552  }
   0xe   : > { %v352_v7 = vand.u32 %v1808_v0, %v2170_v4  ;;  %v537_v8 = vand.u32 %v1859_v3, %v2170_v4  ;;  %v427_v9 = vand.u32 %v2170_v4, %v190_v5  ;;  %v705_v10 = vand.u32 %v1887_v6, %v2170_v4  ;;  %s2188_s25 = scalar_lea.vmem %s2792_s0, %s2112_s22  ;;  %v1952_v43 = vld [vmem:[%s2793_s1 + $0x8] sm:$0x3]  ;;  %s2113_s11 = smul.u32 72, %s2797_s13 }
   0xf   : > { %v2191_v11 = vld [vmem:[%s2188_s25 + $0x8] sm:$0xff]  ;;  %v2194_v12 = vld [vmem:[%s2188_s25 + $0x10] sm:$0xff]  ;;  %v2197_v13 = vld [vmem:[%s2188_s25 + $0x20] sm:$0xff]  ;;  %v952_v47 = vand.u32 %v1952_v43, %v2170_v4  ;;  %vm489_vm4 = vcmask 1046528   ;;  %vm1547_vm5 = vcmask 1045504   ;;  %vm1727_vm7 = vcmask 257024  }
  0x10   : > { %2109 = vmatpush.bf16.msra.mxu1 %v352_v7  ;;  %2110 = vmatpush.bf16.msra.mxu2 %v352_v7  ;;  %v2200_v14 = vld [vmem:[%s2188_s25 + $0x28] sm:$0xff]  ;;  %v2203_v15 = vld [vmem:[%s2188_s25 + $0x38] sm:$0xff]  ;;  %v2206_v16 = vld [vmem:[%s2188_s25 + $0x40] sm:$0xff]  ;;  %v251_v17 = vshll.u32 %v2191_v11, 16  ;;  %v255_v18 = vshrl.u32 %v2191_v11, 16  ;;  %v259_v19 = vshll.u32 %v2194_v12, 16  ;;  %s2718_s16 = scalar_lea.vmem %s2795_s3, %s2113_s11 }
  0x11   : > { %2111 = vmatpush.bf16.msra.mxu3 %v352_v7  ;;  %361 = vmatpush.bf16.msra.mxu0 %v352_v7  ;;  %v275_v20 = vshll.u32 %v2197_v13, 16  ;;  %v279_v21 = vshrl.u32 %v2197_v13, 16  ;;  %v283_v22 = vshll.u32 %v2200_v14, 16  ;;  %v299_v23 = vshll.u32 %v2203_v15, 16  ;;  %v191_v31 = vld [vmem:[%s2188_s25 + $0x48] sm:$0x1] }
  0x12   : > { %v303_v24 = vshrl.u32 %v2203_v15, 16  ;;  %v253_v25 = vrot.slane %v251_v17, 1  ;;  %v261_v26 = vrot.slane %v259_v19, 1  ;;  %v307_v28 = vshll.u32 %v2206_v16, 16  ;;  %v2227_v39 = vld [vmem:[%s2188_s25] sm:$0xff]   ;;  %v2234_v41 = vld [vmem:[%s2188_s25 + $0x18] sm:$0xff] }
  0x13   : > { %v2216_v27 = vrot.slane %v275_v20, 1  ;;  %v285_v29 = vrot.slane %v283_v22, 1  ;;  %v2219_v30 = vrot.slane %v299_v23, 1  ;;  %v231_v38 = vunpack.c.l.b16 %v191_v31  ;;  %v2237_v42 = vld [vmem:[%s2188_s25 + $0x30] sm:$0xff]  ;;  %v1933_v56 = vld [vmem:[%s2188_s25 + $0x5c] sm:$0xff]   ;;  %v2260_v1 = vld [vmem:[%s2188_s25 + $0x64] sm:$0xff] }
  0x14   : > { %546 = vmatpush.bf16.msrb.mxu2 %v537_v8  ;;  %436 = vmatpush.bf16.msrb.mxu1 %v427_v9  ;;  %v257_v32 = vor.u32 %v255_v18, %v253_v25  ;;  %v309_v34 = vrot.slane %v307_v28, 1  ;;  %v244_v45 = vshrl.u32 %v2227_v39, 16  ;;  %v246_v46 = vshll.u32 %v2227_v39, 16  ;;  %v2255_v57 = vld [vmem:[%s2188_s25 + $0x5c] sm:$0xf0] }
  0x15   : > { %714 = vmatpush.bf16.msrb.mxu3 %v705_v10  ;;  %v281_v33 = vor.u32 %v279_v21, %v2216_v27  ;;  %v305_v35 = vor.u32 %v303_v24, %v2219_v30  ;;  %v2242_v44 = vpack.c.b16 %v231_v38, %v231_v38  ;;  %v263_v48 = vshrl.u32 %v2194_v12, 16  ;;  %961 = vmatpush.bf16.msrb.mxu0 %v952_v47  ;;  %v2005_v10 = vld [vmem:[%s2793_s1 + $0xc] sm:$0x3]  ;;  %v2047_v17 = vld [vmem:[%s2793_s1 + $0xe] sm:$0x3] }
  0x16   : > { %v262_v36 = vsel %vm242_vm2, %v257_v32, %v261_v26  ;;  %v248_v49 = vrot.slane %v246_v46, 1  ;;  %v267_v50 = vshll.u32 %v2234_v41, 16  ;;  %v287_v51 = vshrl.u32 %v2200_v14, 16  ;;  %v1995_v20 = vld [vmem:[%s2793_s1 + $0xa] sm:$0x3] }
  0x17   : > { %v286_v37 = vsel %vm242_vm2, %v281_v33, %v285_v29  ;;  %1842 = vmatmul.msk.bf16.vlgmr.msra.gmra.mxu1 %vm319_vm3, %v262_v36  ;;  %v310_v40 = vsel %vm242_vm2, %v305_v35, %v309_v34  ;;  %v291_v52 = vshll.u32 %v2237_v42, 16  ;;  %v311_v53 = vshrl.u32 %v2206_v16, 16  ;;  %v2057_v21 = vld [vmem:[%s2793_s1 + $0x10] sm:$0x3]  ;;  %v2077_v35 = vld [vmem:[%s2188_s25 + $0x5c] sm:$0xff] }
  0x18   : > { %1845 = vmatmul.msk.bf16.vlgmr.msra.gmra.mxu2 %vm319_vm3, %v286_v37  ;;  %1848 = vmatmul.msk.bf16.vlgmr.msra.gmra.mxu3 %vm319_vm3, %v310_v40  ;;  %v315_v54 = vshll.u32 %v2242_v44, 16  ;;  %v249_v55 = vor.u32 %v248_v49, %v244_v45  ;;  %v265_v58 = vor.u32 %v263_v48, %v261_v26  ;;  %v269_v60 = vrot.slane %v267_v50, 1  ;;  %v2290_v33 = vld [vmem:[%s2188_s25 + $0x6c] sm:$0xff]  ;;  %v2106_v38 = vld [vmem:[%s2188_s25] sm:$0xf0]  ;;  %v2308_v48 = vld [vmem:[%s2188_s25 + $0x74] sm:$0xff] }
  0x19   : > { %v289_v61 = vor.u32 %v287_v51, %v285_v29  ;;  %v293_v62 = vrot.slane %v291_v52, 1  ;;  %v313_v63 = vor.u32 %v311_v53, %v309_v34  ;;  %v851_v2 = vshll.u32 %v1933_v56, 16  ;;  %v2107_v40 = vld [vmem:[%s2188_s25] sm:$0xe]  ;;  %v2078_v50 = vld [vmem:[%s2188_s25 + $0x64] sm:$0xff] }
  0x1a   : > { %v254_v59 = vsel %vm242_vm2, %v249_v55, %v253_v25  ;;  %v317_v0 = vrot.slane %v315_v54, 1  ;;  %v270_v3 = vsel %vm242_vm2, %v265_v58, %v269_v60  ;;  %v849_v7 = vshrl.u32 %v1933_v56, 16  ;;  %v2322_v58 = vld [vmem:[%s2188_s25 + $0x7c] sm:$0xff] }
  0x1b   : > { %1841 = vmatmul.msk.bf16.vlgmr.msra.gmra.mxu0 %vm319_vm3, %v254_v59  ;;  %v294_v5 = vsel %vm242_vm2, %v289_v61, %v293_v62  ;;  %v853_v8 = vrot.slane %v851_v2, 1  ;;  %v856_v9 = vshll.u32 %v2260_v1, 16  ;;  %v1269_v18 = vand.u32 %v2005_v10, %v2170_v4 }
  0x1c   : > { %v318_v6 = vsel %vm242_vm2, %v313_v63, %v317_v0  ;;  %v1467_v19 = vand.u32 %v2047_v17, %v2170_v4  ;;  %v1079_v24 = vand.u32 %v1995_v20, %v2170_v4  ;;  %v1595_v25 = vand.u32 %v2057_v21, %v2170_v4  ;;  %v2081_v20 = vld [vmem:[%s2188_s25 + $0x7c] sm:$0xff] }
  0x1d   : > { %v854_v22 = vor.u32 %v853_v8, %v849_v7  ;;  %v858_v23 = vrot.slane %v856_v9, 1  ;;  %1278 = vmatpush.bf16.msra.mxu2 %v1269_v18  ;;  %v271_v26 = vshrl.u32 %v2234_v41, 16  ;;  %v295_v28 = vshrl.u32 %v2237_v42, 16  ;;  %v2350_v18 = vld [vmem:[%s2188_s25 + $0x8c] sm:$0xff] }
  0x1e   : > { %1476 = vmatpush.bf16.msra.mxu3 %v1467_v19  ;;  %1088 = vmatpush.bf16.msra.mxu1 %v1079_v24  ;;  %v860_v36 = vshrl.u32 %v2260_v1, 16  ;;  %v864_v37 = vshll.u32 %v2290_v33, 16  ;;  %v2108_v45 = vor.u32 %v2107_v40, %v2106_v38  ;;  %v491_v47 = vrot.slane %v2191_v11, 1 }
  0x1f   : > { %1604 = vmatpush.bf16.msra.mxu0 %v1595_v25  ;;  %v859_v29 = vsel %vm242_vm2, %v854_v22, %v858_v23  ;;  %v273_v31 = vor.u32 %v271_v26, %v269_v60  ;;  %v297_v32 = vor.u32 %v295_v28, %v293_v62  ;;  %v868_v51 = vshrl.u32 %v2290_v33, 16  ;;  %v2079_v60 = vld [vmem:[%s2188_s25 + $0x6c] sm:$0xff]  ;;  %v2364_v26 = vld [vmem:[%s2188_s25 + $0x94] sm:$0xff] }
  0x20   : > { %v862_v43 = vor.u32 %v860_v36, %v858_v23  ;;  %v490_v46 = vrot.slane %v2108_v45, 1  ;;  %v872_v52 = vshll.u32 %v2308_v48, 16  ;;  %v493_v56 = vrot.slane %v2194_v12, 1  ;;  %v2378_v36 = vld [vmem:[%s2188_s25 + $0x9c] sm:$0xff] }
  0x21   : > { %v278_v4 = vsel %vm242_vm2, %v273_v31, %v2216_v27  ;;  %v302_v34 = vsel %vm242_vm2, %v297_v32, %v2219_v30  ;;  %v866_v27 = vrot.slane %v864_v37, 1  ;;  %v880_v61 = vshll.u32 %v2322_v58, 16 }
  0x22   : > { %v492_v49 = vsel %vm489_vm4, %v490_v46, %v491_v47  ;;  %v874_v54 = vrot.slane %v872_v52, 1  ;;  %v494_v59 = vsel %vm489_vm4, %v491_v47, %v493_v56  ;;  %v495_v2 = vrot.slane %v2234_v41, 1 }
  0x23   : > { %v867_v30 = vsel %vm242_vm2, %v862_v43, %v866_v27  ;;  %v870_v53 = vor.u32 %v868_v51, %v866_v27  ;;  %v882_v63 = vrot.slane %v880_v61, 1  ;;  %v497_v17 = vrot.slane %v2197_v13, 1  ;;  %v1951_v51 = vld [vmem:[%s2188_s25 + $0xa4] sm:$0x1] }
  0x24   : > { %v896_v21 = vshll.u32 %v2350_v18, 16  ;;  %v499_v25 = vrot.slane %v2200_v14, 1  ;;  %v904_v31 = vshll.u32 %v2364_v26, 16  ;;  %v908_v40 = vshrl.u32 %v2364_v26, 16 }
  0x25   : > { %v875_v55 = vsel %vm242_vm2, %v870_v53, %v874_v54  ;;  %v498_v19 = vsel %vm489_vm4, %v495_v2, %v497_v17  ;;  %v912_v43 = vshll.u32 %v2378_v36, 16  ;;  %v837_v52 = vunpack.c.l.b16 %v1951_v51 }
  0x26   : > { %v898_v23 = vrot.slane %v896_v21, 1  ;;  %v500_v28 = vsel %vm489_vm4, %v497_v17, %v499_v25  ;;  %v916_v61 = vshrl.u32 %v2378_v36, 16  ;;  %vm1349_vm6 = vsmask.f32 6400 }
  0x27   : > { %1843 = vmatmul.msk.bf16.gmra.mxu1 %vm319_vm3, %v270_v3  ;;  %v2336_v3 = vld [vmem:[%s2188_s25 + $0x84] sm:$0xff]  ;;  %v914_v45 = vrot.slane %v912_v43, 1 }
  0x28   : > { %1846 = vmatmul.msk.bf16.gmra.mxu2 %vm319_vm3, %v294_v5  ;;  %1849 = vmatmul.msk.bf16.gmra.mxu3 %vm319_vm3, %v318_v6  ;;  %v496_v5 = vsel %vm489_vm4, %v493_v56, %v495_v2  ;;  %v2080_v6 = vld [vmem:[%s2188_s25 + $0x74] sm:$0xff]  ;;  %v888_v7 = vshll.u32 %v2336_v3, 16 }
  0x2a   : > { %v890_v9 = vrot.slane %v888_v7, 1 }
  0x2b   : > { %1985 = vmatmul.msk.bf16.vlgmr.msrb.gmra.mxu0 %vm319_vm3, %v859_v29  ;;  %v2082_v29 = vld [vmem:[%s2188_s25 + $0x84] sm:$0xff] }
  0x37   : > { %1844 = vmatmul.msk.bf16.gmra.mxu1 %vm319_vm3, %v278_v4  ;;  %v906_v4 = vrot.slane %v904_v31, 1 }
  0x38   : > { %1847 = vmatmul.msk.bf16.gmra.mxu2 %vm319_vm3, %v302_v34  ;;  %1924 = vmatmul.msk.bf16.vlgmr.msrb.gmra.mxu3 %vm319_vm3, %v2077_v35  ;;  %v501_v35 = vrot.slane %v2237_v42, 1 }
  0x39   : > { %v910_v27 = vor.u32 %v908_v40, %v906_v4 }
  0x3a   : > { %v502_v38 = vsel %vm489_vm4, %v499_v25, %v501_v35  ;;  %v2443_v25 = vld [vmem:[%s2188_s25 + $0x10] sm:$0xff] }
  0x3b   : > { %1986 = vmatmul.msk.bf16.gmra.mxu0 %vm319_vm3, %v867_v30  ;;  %v1359_v31 = vshrl.u32 %v2443_v25, 16 }
  0x3d   : > { %v1361_v43 = vrot.slane %v1359_v31, 1 }
  0x47   : > { %1850 = vmatmul.msk.bf16.vlgmr.msrb.gmra.mxu1 %vm319_vm3, %v2227_v39  ;;  %v876_v39 = vshrl.u32 %v2308_v48, 16 }
  0x48   : > { %1860 = vmatmul.msk.bf16.vlgmr.msrb.gmra.mxu2 %vm319_vm3, %v492_v49  ;;  %1925 = vmatmul.msk.bf16.gmra.mxu3 %vm319_vm3, %v2078_v50  ;;  %v915_v50 = vsel %vm242_vm2, %v910_v27, %v914_v45 }
  0x49   : > { %v878_v62 = vor.u32 %v876_v39, %v874_v54  ;;  %v2404_v54 = vpack.c.b16 %v837_v52, %v837_v52  ;;  %v507_v52 = vrot.slane %v2242_v44, 1 }
  0x4b   : > { %1987 = vmatmul.msk.bf16.gmra.mxu0 %vm319_vm3, %v875_v55  ;;  %v883_v0 = vsel %vm242_vm2, %v878_v62, %v882_v63  ;;  %v920_v62 = vshll.u32 %v2404_v54, 16 }
  0x57   : > { %1851 = vmatmul.msk.bf16.gmra.mxu1 %vm319_vm3, %v2191_v11  ;;  %v884_v11 = vshrl.u32 %v2322_v58, 16 }
  0x58   : > { %1861 = vmatmul.msk.bf16.gmra.mxu2 %vm319_vm3, %v494_v59  ;;  %1926 = vmatmul.msk.bf16.gmra.mxu3 %vm319_vm3, %v2079_v60  ;;  %v2084_v60 = vld [vmem:[%s2188_s25 + $0x94] sm:$0xff] }
  0x59   : > { %v886_v8 = vor.u32 %v884_v11, %v882_v63  ;;  %v918_v63 = vor.u32 %v916_v61, %v914_v45 }
  0x5b   : > { %1988 = vmatmul.msk.bf16.gmra.mxu0 %vm319_vm3, %v883_v0  ;;  %v891_v10 = vsel %vm242_vm2, %v886_v8, %v890_v9  ;;  %v922_v0 = vrot.slane %v920_v62, 1  ;;  %v1154_v8 = vld [vmem:[%s2188_s25 + $0xc] sm:$0xf] }
  0x5c   : > { %v1194_v17 = vunpack.c.l.b16 %v1154_v8 }
  0x5d   : > { %v923_v7 = vsel %vm242_vm2, %v918_v63, %v922_v0 }
  0x67   : > { %1852 = vmatmul.msk.bf16.gmra.mxu1 %vm319_vm3, %v2194_v12  ;;  %v892_v12 = vshrl.u32 %v2336_v3, 16 }
  0x68   : > { %1862 = vmatmul.msk.bf16.gmra.mxu2 %vm319_vm3, %v496_v5  ;;  %1927 = vmatmul.msk.bf16.gmra.mxu3 %vm319_vm3, %v2080_v6 }
  0x69   : > { %v894_v22 = vor.u32 %v892_v12, %v890_v9  ;;  %v505_v9 = vrot.slane %v2206_v16, 1 }
  0x6b   : > { %1989 = vmatmul.msk.bf16.gmra.mxu0 %vm319_vm3, %v891_v10  ;;  %v899_v24 = vsel %vm242_vm2, %v894_v22, %v898_v23  ;;  %v508_v0 = vsel %vm489_vm4, %v505_v9, %v507_v52 }
  0x77   : > { %1853 = vmatmul.msk.bf16.gmra.mxu1 %vm319_vm3, %v2234_v41  ;;  %v900_v41 = vshrl.u32 %v2350_v18, 16 }
  0x78   : > { %1863 = vmatmul.msk.bf16.gmra.mxu2 %vm319_vm3, %v498_v19  ;;  %1928 = vmatmul.msk.bf16.gmra.mxu3 %vm319_vm3, %v2081_v20  ;;  %v1541_v19 = vld [vmem:[%s2188_s25 + $0x8] sm:$0xc] }
  0x79   : > { %v902_v32 = vor.u32 %v900_v41, %v898_v23  ;;  %v1545_v12 = vunpack.c.l.b16 %v1541_v19 }
  0x7b   : > { %1990 = vmatmul.msk.bf16.gmra.mxu0 %vm319_vm3, %v899_v24  ;;  %v907_v34 = vsel %vm242_vm2, %v902_v32, %v906_v4  ;;  %v2085_v24 = vld [vmem:[%s2188_s25 + $0x9c] sm:$0xff]  ;;  %v1546_v41 = vpack.c.b16 %v1194_v17, %v1545_v12  ;;  %v1362_v32 = vshll.u32 %v2443_v25, 16 }
  0x87   : > { %1854 = vmatmul.msk.bf16.gmra.mxu1 %vm319_vm3, %v2197_v13  ;;  %v2083_v13 = vld [vmem:[%s2188_s25 + $0x8c] sm:$0xff] }
  0x88   : > { %1864 = vmatmul.msk.bf16.gmra.mxu2 %vm319_vm3, %v500_v28  ;;  %1929 = vmatmul.msk.bf16.gmra.mxu3 %vm319_vm3, %v2082_v29 }
  0x8b   : > { %1991 = vmatmul.msk.bf16.gmra.mxu0 %vm319_vm3, %v907_v34 }
  0x94   : > { %v2380_v37 = vpop.f32.mrf.mxu1 }
  0x97   : > { %1855 = vmatmul.msk.bf16.gmra.mxu1 %vm319_vm3, %v2200_v14  ;;  %v503_v14 = vrot.slane %v2203_v15, 1 }
  0x98   : > { %1865 = vmatmul.msk.bf16.gmra.mxu2 %vm319_vm3, %v502_v38  ;;  %1930 = vmatmul.msk.bf16.gmra.mxu3 %vm319_vm3, %v2083_v13  ;;  %v2396_v49 = vpop.f32.mrf.mxu0  ;;  %v1549_v38 = vrot.slane %v2443_v25, 2 }
  0x99   : > { %v504_v59 = vsel %vm489_vm4, %v501_v35, %v503_v14  ;;  %v506_v23 = vsel %vm489_vm4, %v503_v14, %v505_v9  ;;  %v1548_v35 = vrot.slane %v1546_v41, 2 }
  0x9b   : > { %v2390_v30 = vpop.f32.mrf.mxu2  ;;  %v2392_v46 = vpop.f32.mrf.mxu3  ;;  %1992 = vmatmul.msk.bf16.gmra.mxu0 %vm319_vm3, %v915_v50  ;;  %v1364_v50 = vrot.slane %v1362_v32, 2  ;;  %v1550_v14 = vsel %vm1547_vm5, %v1548_v35, %v1549_v38 }
  0x9c   : > { %v2394_v47 = vpop.f32.mrf.mxu1 }
  0xa0   : > { %v2412_v39 = vpop.f32.mrf.mxu0 }
  0xa3   : > { %v2402_v53 = vpop.f32.mrf.mxu2  ;;  %v2406_v55 = vpop.f32.mrf.mxu3 }
  0xa4   : > { %v2408_v56 = vpop.f32.mrf.mxu1 }
  0xa7   : > { %1856 = vmatmul.msk.bf16.gmra.mxu1 %vm319_vm3, %v2237_v42  ;;  %v1153_v42 = vld [vmem:[%s2188_s25 + $0x8] sm:$0xe] }
  0xa8   : > { %1866 = vmatmul.msk.bf16.gmra.mxu2 %vm319_vm3, %v504_v59  ;;  %1931 = vmatmul.msk.bf16.gmra.mxu3 %vm319_vm3, %v2084_v60  ;;  %v2426_v11 = vpop.f32.mrf.mxu0  ;;  %v1193_v10 = vunpack.c.l.b16 %v1153_v42  ;;  %v1365_v60 = vor.u32 %v1364_v50, %v1361_v43 }
  0xaa   : > { %v2447_v29 = vpack.c.b16 %v1194_v17, %v1193_v10  ;;  %v2125_v10 = vld [vmem:[%s2188_s25 + $0x5c] sm:$0xe] }
  0xab   : > { %v2420_v2 = vpop.f32.mrf.mxu2  ;;  %v2422_v5 = vpop.f32.mrf.mxu3  ;;  %1993 = vmatmul.msk.bf16.gmra.mxu0 %vm319_vm3, %v923_v7  ;;  %v2471_v7 = vld [vmem:[%s2188_s25 + $0x18] sm:$0xff]  ;;  %v2126_v41 = vor.u32 %v2125_v10, %v2255_v57  ;;  %v1223_v57 = vrot.slane %v2443_v25, 1 }
  0xac   : > { %v2424_v6 = vpop.f32.mrf.mxu1  ;;  %v1351_v4 = vshrl.u32 %v2447_v29, 16  ;;  %v1354_v34 = vshll.u32 %v2447_v29, 16  ;;  %v1368_v44 = vshrl.u32 %v2471_v7, 16  ;;  %v1371_v9 = vshll.u32 %v2471_v7, 16 }
  0xad   : > { %v1551_v19 = vrot.slane %v2471_v7, 2  ;;  %v1222_v50 = vrot.slane %v2447_v29, 1 }
  0xae   : > { %v1353_v27 = vrot.slane %v1351_v4, 1  ;;  %v1356_v45 = vrot.slane %v1354_v34, 2  ;;  %v1370_v31 = vrot.slane %v1368_v44, 1  ;;  %v1373_v4 = vrot.slane %v1371_v9, 2 }
  0xaf   : > { %v1552_v35 = vsel %vm1547_vm5, %v1549_v38, %v1551_v19  ;;  %v1224_v38 = vsel %vm489_vm4, %v1222_v50, %v1223_v57 }
  0xb0   : > { %v2445_v28 = vpop.f32.mrf.mxu0  ;;  %v1357_v59 = vor.u32 %v1356_v45, %v1353_v27  ;;  %v1032_v27 = vrot.slane %v2126_v41, 1  ;;  %v1033_v45 = vrot.slane %v2260_v1, 1 }
  0xb2   : > { %v1366_v8 = vsel %vm1349_vm6, %v1357_v59, %v1365_v60 }
  0xb3   : > { %v2434_v20 = vpop.f32.mrf.mxu2  ;;  %v2436_v21 = vpop.f32.mrf.mxu3 }
  0xb4   : > { %v2438_v22 = vpop.f32.mrf.mxu1 }
  0xb7   : > { %1857 = vmatmul.msk.bf16.gmra.mxu1 %vm319_vm3, %v2203_v15 }
  0xb8   : > { %1867 = vmatmul.msk.bf16.gmra.mxu2 %vm319_vm3, %v506_v23  ;;  %1932 = vmatmul.msk.bf16.gmra.mxu3 %vm319_vm3, %v2085_v24  ;;  %v2462_v51 = vpop.f32.mrf.mxu0 }
  0xbb   : > { %v2458_v13 = vpop.f32.mrf.mxu2  ;;  %v716_v40 = vpop.f32.mrf.mxu3  ;;  %2058 = vmatmul.msk.bf16.vlgmr.msra.gmra.mxu0 %vm319_vm3, %v1550_v14 }
  0xbc   : > { %v2460_v15 = vpop.f32.mrf.mxu1 }
  0xc0   : > { %v2476_v17 = vpop.f32.mrf.mxu0 }
  0xc3   : > { %v2467_v61 = vpop.f32.mrf.mxu2  ;;  %v718_v62 = vpop.f32.mrf.mxu3 }
  0xc4   : > { %v438_v63 = vpop.f32.mrf.mxu1 }
  0xc5   : > { %v439_v42 = vadd.f32 %v438_v63, %v2396_v49  ;;  %v1034_v63 = vsel %vm489_vm4, %v1032_v27, %v1033_v45 }
  0xc7   : > { %1858 = vmatmul.msk.bf16.gmra.mxu1 %vm319_vm3, %v2206_v16 }
  0xc8   : > { %1868 = vmatmul.msk.bf16.gmra.mxu2 %vm319_vm3, %v508_v0  ;;  %2048 = vmatmul.msk.bf16.vlgmr.msra.gmra.mxu3 %vm319_vm3, %v1366_v8  ;;  %v2487_v34 = vpop.f32.mrf.mxu0 }
  0xcb   : > { %v548_v12 = vpop.f32.mrf.mxu2  ;;  %v721_v23 = vpop.f32.mrf.mxu3  ;;  %2059 = vmatmul.msk.bf16.gmra.mxu0 %vm319_vm3, %v1552_v35 }
  0xcc   : > { %v593_v49 = vadd.f32 %v548_v12, %v439_v42  ;;  %v440_v24 = vpop.f32.mrf.mxu1 }
  0xcd   : > { %v441_v16 = vadd.f32 %v440_v24, %v2412_v39 }
  0xce   : > { %v761_v32 = vadd.f32 %v716_v40, %v593_v49  ;;  %v1374_v40 = vor.u32 %v1373_v4, %v1370_v31  ;;  %v1225_v4 = vrot.slane %v2471_v7, 1 }
  0xd0   : > { %v2491_v43 = vadd.f32 %v2426_v11, %v761_v32  ;;  %v2500_v11 = vld [vmem:[%s2188_s25 + $0x20] sm:$0xff]  ;;  %v1375_v29 = vsel %vm1349_vm6, %v1365_v60, %v1374_v40  ;;  %v2504_v42 = vpop.f32.mrf.mxu0 }
  0xd1   : > { %v1377_v8 = vshrl.u32 %v2500_v11, 16  ;;  %v1380_v10 = vshll.u32 %v2500_v11, 16 }
  0xd3   : > { %v550_v39 = vpop.f32.mrf.mxu2  ;;  %v723_v52 = vpop.f32.mrf.mxu3  ;;  %v1379_v12 = vrot.slane %v1377_v8, 1  ;;  %v1382_v41 = vrot.slane %v1380_v10, 2 }
  0xd4   : > { %v594_v14 = vadd.f32 %v550_v39, %v441_v16  ;;  %v443_v59 = vpop.f32.mrf.mxu1  ;;  %v1035_v16 = vrot.slane %v2290_v33, 1 }
  0xd5   : > { %v444_v1 = vadd.f32 %v443_v59, %v2380_v37  ;;  %v1383_v35 = vor.u32 %v1382_v41, %v1379_v12  ;;  %v2528_v59 = vld [vmem:[%s2188_s25 + $0x28] sm:$0xff]  ;;  %v1227_v12 = vrot.slane %v2500_v11, 1 }
  0xd6   : > { %v762_v0 = vadd.f32 %v718_v62, %v594_v14  ;;  %v1553_v62 = vrot.slane %v2500_v11, 2  ;;  %v1226_v14 = vsel %vm489_vm4, %v1223_v57, %v1225_v4  ;;  %v1389_v57 = vshll.u32 %v2528_v59, 16 }
  0xd7   : > { %1996 = vmatmul.msk.bf16.vlgmr.msra.gmra.mxu1 %vm319_vm3, %v1034_v63  ;;  %v1384_v33 = vsel %vm1349_vm6, %v1374_v40, %v1383_v35 }
  0xd8   : > { %2038 = vmatmul.msk.bf16.vlgmr.msra.gmra.mxu2 %vm319_vm3, %v1224_v38  ;;  %v2509_v25 = vadd.f32 %v2445_v28, %v762_v0  ;;  %2049 = vmatmul.msk.bf16.gmra.mxu3 %vm319_vm3, %v1375_v29  ;;  %v2516_v28 = vpop.f32.mrf.mxu0  ;;  %v1554_v31 = vsel %vm1547_vm5, %v1551_v19, %v1553_v62  ;;  %v1391_v10 = vrot.slane %v1389_v57, 2 }
  0xdb   : > { %v553_v37 = vpop.f32.mrf.mxu2  ;;  %v726_v60 = vpop.f32.mrf.mxu3  ;;  %2060 = vmatmul.msk.bf16.gmra.mxu0 %vm319_vm3, %v1554_v31 }
  0xdc   : > { %v595_v44 = vadd.f32 %v553_v37, %v444_v1  ;;  %v445_v9 = vpop.f32.mrf.mxu1 }
  0xdd   : > { %v446_v24 = vadd.f32 %v445_v9, %v2394_v47  ;;  %v1036_v47 = vsel %vm489_vm4, %v1033_v45, %v1035_v16  ;;  %v1386_v45 = vshrl.u32 %v2528_v59, 16  ;;  %v1037_v9 = vrot.slane %v2308_v48, 1 }
  0xde   : > { %v763_v49 = vadd.f32 %v721_v23, %v595_v44 }
  0xdf   : > { %v1388_v1 = vrot.slane %v1386_v45, 1 }
  0xe0   : > { %v2520_v32 = vadd.f32 %v2462_v51, %v763_v49  ;;  %v2532_v63 = vpop.f32.mrf.mxu0 }
  0xe1   : > { %v1392_v49 = vor.u32 %v1391_v10, %v1388_v1 }
  0xe3   : > { %v555_v27 = vpop.f32.mrf.mxu2  ;;  %v728_v50 = vpop.f32.mrf.mxu3  ;;  %v1393_v48 = vsel %vm1349_vm6, %v1383_v35, %v1392_v49 }
  0xe4   : > { %v596_v23 = vadd.f32 %v555_v27, %v446_v24  ;;  %v448_v39 = vpop.f32.mrf.mxu1  ;;  %v1228_v27 = vsel %vm489_vm4, %v1225_v4, %v1227_v12 }
  0xe5   : > { %v449_v51 = vadd.f32 %v448_v39, %v2408_v56 }
  0xe6   : > { %v764_v19 = vadd.f32 %v723_v52, %v596_v23  ;;  %v1555_v52 = vrot.slane %v2528_v59, 2  ;;  %v2556_v23 = vld [vmem:[%s2188_s25 + $0x30] sm:$0xff] }
  0xe7   : > { %1997 = vmatmul.msk.bf16.gmra.mxu1 %vm319_vm3, %v1036_v47  ;;  %v1398_v4 = vshll.u32 %v2556_v23, 16 }
  0xe8   : > { %2039 = vmatmul.msk.bf16.gmra.mxu2 %vm319_vm3, %v1226_v14  ;;  %v2537_v7 = vadd.f32 %v2476_v17, %v764_v19  ;;  %2050 = vmatmul.msk.bf16.gmra.mxu3 %vm319_vm3, %v1384_v33  ;;  %v2544_v17 = vpop.f32.mrf.mxu0  ;;  %v1556_v37 = vsel %vm1547_vm5, %v1553_v62, %v1555_v52 }
  0xe9   : > { %v1400_v45 = vrot.slane %v1398_v4, 2  ;;  %v1041_v4 = vrot.slane %v2336_v3, 1  ;;  %v2615_v3 = vld [vmem:[%s2188_s25 + $0x40] sm:$0xff] }
  0xeb   : > { %v558_v56 = vpop.f32.mrf.mxu2  ;;  %v731_v40 = vpop.f32.mrf.mxu3  ;;  %2061 = vmatmul.msk.bf16.gmra.mxu0 %vm319_vm3, %v1556_v37 }
  0xec   : > { %v597_v38 = vadd.f32 %v558_v56, %v449_v51  ;;  %v450_v0 = vpop.f32.mrf.mxu1 }
  0xed   : > { %v451_v8 = vadd.f32 %v450_v0, %v2424_v6  ;;  %v1038_v6 = vsel %vm489_vm4, %v1035_v16, %v1037_v9  ;;  %v1395_v16 = vshrl.u32 %v2556_v23, 16  ;;  %v1229_v0 = vrot.slane %v2528_v59, 1 }
  0xee   : > { %v765_v29 = vadd.f32 %v726_v60, %v597_v38  ;;  %v1039_v38 = vrot.slane %v2322_v58, 1 }
  0xef   : > { %v1397_v19 = vrot.slane %v1395_v16, 1  ;;  %v1230_v37 = vsel %vm489_vm4, %v1227_v12, %v1229_v0 }
  0xf0   : > { %v2548_v44 = vadd.f32 %v2487_v34, %v765_v29  ;;  %v2560_v39 = vpop.f32.mrf.mxu0  ;;  %v1040_v10 = vsel %vm489_vm4, %v1037_v9, %v1039_v38 }
  0xf1   : > { %v1401_v1 = vor.u32 %v1400_v45, %v1397_v19  ;;  %v1042_v45 = vsel %vm489_vm4, %v1039_v38, %v1041_v4  ;;  %v1413_v38 = vshrl.u32 %v2615_v3, 16 }
  0xf3   : > { %v560_v24 = vpop.f32.mrf.mxu2  ;;  %v733_v41 = vpop.f32.mrf.mxu3 }
  0xf4   : > { %v598_v60 = vadd.f32 %v560_v24, %v451_v8  ;;  %v453_v31 = vpop.f32.mrf.mxu1 }
  0xf5   : > { %v454_v34 = vadd.f32 %v453_v31, %v2438_v22 }
  0xf6   : > { %v766_v62 = vadd.f32 %v728_v50, %v598_v60  ;;  %v1557_v50 = vrot.slane %v2556_v23, 2  ;;  %v2587_v60 = vld [vmem:[%s2188_s25 + $0x38] sm:$0xff] }
  0xf7   : > { %1998 = vmatmul.msk.bf16.gmra.mxu1 %vm319_vm3, %v1038_v6  ;;  %v1404_v9 = vshrl.u32 %v2587_v60, 16  ;;  %v1407_v12 = vshll.u32 %v2587_v60, 16 }
  0xf8   : > { %2040 = vmatmul.msk.bf16.gmra.mxu2 %vm319_vm3, %v1228_v27  ;;  %v2565_v11 = vadd.f32 %v2504_v42, %v766_v62  ;;  %2051 = vmatmul.msk.bf16.gmra.mxu3 %vm319_vm3, %v1393_v48  ;;  %v2572_v57 = vpop.f32.mrf.mxu0  ;;  %v1558_v42 = vsel %vm1547_vm5, %v1555_v52, %v1557_v50  ;;  %v1402_v52 = vsel %vm1349_vm6, %v1392_v49, %v1401_v1  ;;  %v1559_v49 = vrot.slane %v2587_v60, 2 }
  0xf9   : > { %v1409_v48 = vrot.slane %v1407_v12, 2  ;;  %v1233_v12 = vrot.slane %v2587_v60, 1 }
  0xfb   : > { %v563_v22 = vpop.f32.mrf.mxu2  ;;  %v736_v35 = vpop.f32.mrf.mxu3  ;;  %2062 = vmatmul.msk.bf16.gmra.mxu0 %vm319_vm3, %v1558_v42 }
  0xfc   : > { %v599_v47 = vadd.f32 %v563_v22, %v454_v34  ;;  %v455_v14 = vpop.f32.mrf.mxu1  ;;  %v1406_v34 = vrot.slane %v1404_v9, 1  ;;  %v1231_v22 = vrot.slane %v2556_v23, 1  ;;  %v1043_v9 = vrot.slane %v2350_v18, 1  ;;  %v2643_v18 = vld [vmem:[%s2188_s25 + $0x48] sm:$0xff] }
  0xfd   : > { %v456_v33 = vadd.f32 %v455_v14, %v2460_v15 }
  0xfe   : > { %v767_v51 = vadd.f32 %v731_v40, %v599_v47  ;;  %v1410_v14 = vor.u32 %v1409_v48, %v1406_v34  ;;  %v1044_v48 = vsel %vm489_vm4, %v1041_v4, %v1043_v9  ;;  %v1422_v4 = vshrl.u32 %v2643_v18, 16 }
 0x100   : > { %v2576_v56 = vadd.f32 %v2516_v28, %v767_v51  ;;  %v2584_v28 = vpop.f32.mrf.mxu0 }
 0x103   : > { %v565_v29 = vpop.f32.mrf.mxu2  ;;  %v738_v8 = vpop.f32.mrf.mxu3 }
 0x104   : > { %v600_v40 = vadd.f32 %v565_v29, %v456_v33  ;;  %v458_v15 = vpop.f32.mrf.mxu1 }
 0x105   : > { %v459_v59 = vadd.f32 %v458_v15, %v2390_v30 }
 0x106   : > { %v768_v24 = vadd.f32 %v733_v41, %v600_v40 }
 0x107   : > { %1999 = vmatmul.msk.bf16.gmra.mxu1 %vm319_vm3, %v1040_v10 }
 0x108   : > { %2041 = vmatmul.msk.bf16.gmra.mxu2 %vm319_vm3, %v1230_v37  ;;  %v2592_v58 = vadd.f32 %v2532_v63, %v768_v24  ;;  %2052 = vmatmul.msk.bf16.gmra.mxu3 %vm319_vm3, %v1402_v52  ;;  %v2599_v16 = vpop.f32.mrf.mxu0  ;;  %v1560_v63 = vsel %vm1547_vm5, %v1557_v50, %v1559_v49  ;;  %v1232_v50 = vsel %vm489_vm4, %v1229_v0, %v1231_v22  ;;  %v1416_v0 = vshll.u32 %v2615_v3, 16 }
 0x109   : > { %v1415_v24 = vrot.slane %v1413_v38, 1  ;;  %v1045_v38 = vrot.slane %v2364_v26, 1 }
 0x10a   : > { %v1418_v52 = vrot.slane %v1416_v0, 2  ;;  %v1235_v0 = vrot.slane %v2615_v3, 1 }
 0x10b   : > { %v568_v41 = vpop.f32.mrf.mxu2  ;;  %v741_v6 = vpop.f32.mrf.mxu3  ;;  %2063 = vmatmul.msk.bf16.gmra.mxu0 %vm319_vm3, %v1560_v63 }
 0x10c   : > { %v601_v31 = vadd.f32 %v568_v41, %v459_v59  ;;  %v460_v27 = vpop.f32.mrf.mxu1 }
 0x10d   : > { %v461_v47 = vadd.f32 %v460_v27, %v2402_v53 }
 0x10e   : > { %v769_v62 = vadd.f32 %v736_v35, %v601_v31  ;;  %v1419_v31 = vor.u32 %v1418_v52, %v1415_v24 }
 0x110   : > { %v2603_v30 = vadd.f32 %v2544_v17, %v769_v62  ;;  %v1411_v17 = vsel %vm1349_vm6, %v1401_v1, %v1410_v14  ;;  %v2612_v29 = vpop.f32.mrf.mxu0  ;;  %v1561_v1 = vrot.slane %v2615_v3, 2 }
 0x113   : > { %v570_v35 = vpop.f32.mrf.mxu2  ;;  %v743_v51 = vpop.f32.mrf.mxu3 }
 0x114   : > { %v602_v19 = vadd.f32 %v570_v35, %v461_v47  ;;  %v463_v33 = vpop.f32.mrf.mxu1 }
 0x115   : > { %v464_v23 = vadd.f32 %v463_v33, %v2420_v2 }
 0x116   : > { %v770_v42 = vadd.f32 %v738_v8, %v602_v19 }
 0x117   : > { %2000 = vmatmul.msk.bf16.gmra.mxu1 %vm319_vm3, %v1042_v45 }
 0x118   : > { %2042 = vmatmul.msk.bf16.gmra.mxu2 %vm319_vm3, %v1232_v50  ;;  %v2620_v53 = vadd.f32 %v2560_v39, %v770_v42  ;;  %2053 = vmatmul.msk.bf16.gmra.mxu3 %vm319_vm3, %v1411_v17  ;;  %v2627_v59 = vpop.f32.mrf.mxu0  ;;  %v1562_v39 = vsel %vm1547_vm5, %v1559_v49, %v1561_v1  ;;  %v1234_v49 = vsel %vm489_vm4, %v1231_v22, %v1233_v12  ;;  %v1425_v22 = vshll.u32 %v2643_v18, 16 }
 0x119   : > { %v1424_v50 = vrot.slane %v1422_v4, 1 }
 0x11a   : > { %v1427_v42 = vrot.slane %v1425_v22, 2  ;;  %v1047_v22 = vrot.slane %v2378_v36, 1 }
 0x11b   : > { %v573_v40 = vpop.f32.mrf.mxu2  ;;  %v746_v15 = vpop.f32.mrf.mxu3  ;;  %2064 = vmatmul.msk.bf16.gmra.mxu0 %vm319_vm3, %v1562_v39  ;;  %v1236_v39 = vsel %vm489_vm4, %v1233_v12, %v1235_v0 }
 0x11c   : > { %v603_v8 = vadd.f32 %v573_v40, %v464_v23  ;;  %v465_v10 = vpop.f32.mrf.mxu1  ;;  %v1343_v23 = vld [vmem:[%s2188_s25 + $0x50] sm:$0x3] }
 0x11d   : > { %v466_v41 = vadd.f32 %v465_v10, %v2434_v20 }
 0x11e   : > { %v771_v37 = vadd.f32 %v741_v6, %v603_v8  ;;  %v1428_v8 = vor.u32 %v1427_v42, %v1424_v50  ;;  %v1048_v42 = vsel %vm489_vm4, %v1045_v38, %v1047_v22 }
 0x120   : > { %v2631_v2 = vadd.f32 %v2572_v57, %v771_v37  ;;  %v1420_v57 = vsel %vm1349_vm6, %v1410_v14, %v1419_v31  ;;  %v2640_v47 = vpop.f32.mrf.mxu0  ;;  %v1563_v14 = vrot.slane %v2643_v18, 2 }
 0x123   : > { %v575_v6 = vpop.f32.mrf.mxu2  ;;  %v748_v62 = vpop.f32.mrf.mxu3 }
 0x124   : > { %v604_v27 = vadd.f32 %v575_v6, %v466_v41  ;;  %v468_v34 = vpop.f32.mrf.mxu1  ;;  %v1429_v41 = vsel %vm1349_vm6, %v1419_v31, %v1428_v8 }
 0x125   : > { %v469_v60 = vadd.f32 %v468_v34, %v2458_v13 }
 0x126   : > { %v772_v63 = vadd.f32 %v743_v51, %v604_v27 }
 0x127   : > { %2001 = vmatmul.msk.bf16.gmra.mxu1 %vm319_vm3, %v1044_v48 }
 0x128   : > { %2043 = vmatmul.msk.bf16.gmra.mxu2 %vm319_vm3, %v1234_v49  ;;  %v2648_v20 = vadd.f32 %v2584_v28, %v772_v63  ;;  %2054 = vmatmul.msk.bf16.gmra.mxu3 %vm319_vm3, %v1420_v57  ;;  %v2655_v17 = vpop.f32.mrf.mxu0  ;;  %v1564_v28 = vsel %vm1547_vm5, %v1561_v1, %v1563_v14  ;;  %v1046_v1 = vsel %vm489_vm4, %v1043_v9, %v1045_v38 }
 0x12b   : > { %v578_v35 = vpop.f32.mrf.mxu2  ;;  %v751_v51 = vpop.f32.mrf.mxu3  ;;  %2065 = vmatmul.msk.bf16.gmra.mxu0 %vm319_vm3, %v1564_v28 }
 0x12c   : > { %v605_v19 = vadd.f32 %v578_v35, %v469_v60  ;;  %v470_v33 = vpop.f32.mrf.mxu1 }
 0x12d   : > { %v471_v40 = vadd.f32 %v470_v33, %v2467_v61 }
 0x12e   : > { %v773_v45 = vadd.f32 %v746_v15, %v605_v19  ;;  %v1347_v15 = vunpack.c.l.b16 %v1343_v23  ;;  %v1171_v23 = vld [vmem:[%s2188_s25 + $0x50] sm:$0x1] }
 0x130   : > { %v2660_v13 = vadd.f32 %v2599_v16, %v773_v45  ;;  %v1005_v26 = vpop.f32.mrf.mxu0  ;;  %v1348_v6 = vpack.c.b16 %v1347_v15, %v1347_v15 }
 0x132   : > { %v1431_v27 = vshrl.u32 %v1348_v6, 16  ;;  %v1434_v9 = vshll.u32 %v1348_v6, 16  ;;  %v1565_v34 = vrot.slane %v1348_v6, 2 }
 0x133   : > { %v580_v10 = vpop.f32.mrf.mxu2  ;;  %v753_v24 = vpop.f32.mrf.mxu3 }
 0x134   : > { %v606_v37 = vadd.f32 %v580_v10, %v471_v40  ;;  %v473_v52 = vpop.f32.mrf.mxu1  ;;  %v1433_v63 = vrot.slane %v1431_v27, 1  ;;  %v1436_v57 = vrot.slane %v1434_v9, 2  ;;  %v1566_v4 = vsel %vm1547_vm5, %v1563_v14, %v1565_v34 }
 0x135   : > { %v474_v3 = vadd.f32 %v473_v52, %v2392_v46  ;;  %v1237_v46 = vrot.slane %v2643_v18, 1  ;;  %v1211_v18 = vunpack.c.l.b16 %v1171_v23  ;;  %v1049_v52 = vrot.slane %v2404_v54, 1 }
 0x136   : > { %v774_v16 = vadd.f32 %v748_v62, %v606_v37  ;;  %v1437_v19 = vor.u32 %v1436_v57, %v1433_v63 }
 0x137   : > { %2002 = vmatmul.msk.bf16.gmra.mxu1 %vm319_vm3, %v1046_v1  ;;  %v1238_v14 = vsel %vm489_vm4, %v1235_v0, %v1237_v46  ;;  %v1221_v37 = vpack.c.b16 %v1211_v18, %v1211_v18 }
 0x138   : > { %2044 = vmatmul.msk.bf16.gmra.mxu2 %vm319_vm3, %v1236_v39  ;;  %v2672_v61 = vadd.f32 %v2612_v29, %v774_v16  ;;  %2055 = vmatmul.msk.bf16.gmra.mxu3 %vm319_vm3, %v1429_v41  ;;  %v1606_v60 = vpop.f32.mrf.mxu0 }
 0x139   : > { %v1239_v1 = vrot.slane %v1221_v37, 1 }
 0x13b   : > { %v583_v12 = vpop.f32.mrf.mxu2  ;;  %v756_v48 = vpop.f32.mrf.mxu3  ;;  %2066 = vmatmul.msk.bf16.gmra.mxu0 %vm319_vm3, %v1566_v4  ;;  %v1240_v27 = vsel %vm489_vm4, %v1237_v46, %v1239_v1 }
 0x13c   : > { %v607_v62 = vadd.f32 %v583_v12, %v474_v3  ;;  %v475_v31 = vpop.f32.mrf.mxu1 }
 0x13d   : > { %v476_v35 = vadd.f32 %v475_v31, %v2406_v55 }
 0x13e   : > { %v775_v49 = vadd.f32 %v751_v51, %v607_v62 }
 0x140   : > { %v2678_v29 = vadd.f32 %v2627_v59, %v775_v49  ;;  %v1438_v59 = vsel %vm1349_vm6, %v1428_v8, %v1437_v19  ;;  %v1608_v36 = vpop.f32.mrf.mxu0  ;;  %v2710_v49 = vld [vmem:[%s2794_s2] ss:$0 sm:$0xff] }
 0x143   : > { %v585_v33 = vpop.f32.mrf.mxu2  ;;  %v758_v45 = vpop.f32.mrf.mxu3 }
 0x144   : > { %v608_v51 = vadd.f32 %v585_v33, %v476_v35  ;;  %v478_v50 = vpop.f32.mrf.mxu1 }
 0x145   : > { %v479_v40 = vadd.f32 %v478_v50, %v2422_v5  ;;  %v1050_v5 = vsel %vm489_vm4, %v1047_v22, %v1049_v52 }
 0x146   : > { %v776_v28 = vadd.f32 %v753_v24, %v608_v51 }
 0x147   : > { %2003 = vmatmul.msk.bf16.gmra.mxu1 %vm319_vm3, %v1048_v42 }
 0x148   : > { %2045 = vmatmul.msk.bf16.gmra.mxu2 %vm319_vm3, %v1238_v14  ;;  %v2691_v55 = vadd.f32 %v2640_v47, %v776_v28  ;;  %2056 = vmatmul.msk.bf16.gmra.mxu3 %vm319_vm3, %v1438_v59  ;;  %v1611_v39 = vpop.f32.mrf.mxu0 }
 0x14b   : > { %v588_v38 = vpop.f32.mrf.mxu2  ;;  %v1478_v0 = vpop.f32.mrf.mxu3 }
 0x14c   : > { %v609_v15 = vadd.f32 %v588_v38, %v479_v40  ;;  %v480_v10 = vpop.f32.mrf.mxu1 }
 0x14d   : > { %v481_v47 = vadd.f32 %v480_v10, %v2436_v21 }
 0x14e   : > { %v777_v8 = vadd.f32 %v756_v48, %v609_v15 }
 0x150   : > { %v2696_v24 = vadd.f32 %v2655_v17, %v777_v8  ;;  %v1613_v21 = vpop.f32.mrf.mxu0 }
 0x153   : > { %v590_v16 = vpop.f32.mrf.mxu2  ;;  %v1480_v6 = vpop.f32.mrf.mxu3 }
 0x154   : > { %v610_v41 = vadd.f32 %v590_v16, %v481_v47  ;;  %v1090_v3 = vpop.f32.mrf.mxu1 }
 0x155   : > { %v1135_v54 = vadd.f32 %v1090_v3, %v2491_v43 }
 0x156   : > { %v778_v9 = vadd.f32 %v758_v45, %v610_v41 }
 0x157   : > { %2004 = vmatmul.msk.bf16.gmra.mxu1 %vm319_vm3, %v1050_v5 }
 0x158   : > { %2046 = vmatmul.msk.bf16.gmra.mxu2 %vm319_vm3, %v1240_v27  ;;  %v2704_v17 = vadd.f32 %v1005_v26, %v778_v9  ;;  %v1616_v19 = vpop.f32.mrf.mxu0 }
 0x15b   : > { %v1280_v34 = vpop.f32.mrf.mxu2  ;;  %v1483_v62 = vpop.f32.mrf.mxu3 }
 0x15c   : > { %v1325_v12 = vadd.f32 %v1280_v34, %v1135_v54  ;;  %v1092_v48 = vpop.f32.mrf.mxu1 }
 0x15d   : > { %v1136_v26 = vadd.f32 %v1092_v48, %v2509_v25 }
 0x15e   : > { %v1523_v31 = vadd.f32 %v1478_v0, %v1325_v12 }
 0x160   : > { %v1651_v63 = vadd.f32 %v1606_v60, %v1523_v31  ;;  %v1618_v40 = vpop.f32.mrf.mxu0 }
 0x162   : > { %v1673_v57 = vadd.f32 %v2710_v49, %v1651_v63 }
 0x163   : > { %v1282_v4 = vpop.f32.mrf.mxu2  ;;  %v1485_v46 = vpop.f32.mrf.mxu3 }
 0x164   : > { %v1691_v22 = vmax.f32 %v1673_v57, 0.0  ;;  %v1326_v43 = vadd.f32 %v1282_v4, %v1136_v26  ;;  %v1095_v35 = vpop.f32.mrf.mxu1 }
 0x165   : > { %v1137_v45 = vadd.f32 %v1095_v35, %v2520_v32 }
 0x166   : > { %v1709_v60 = vpack.c.bf16 %v1691_v22, %v1691_v22  ;;  %v1524_v33 = vadd.f32 %v1480_v6, %v1326_v43 }
 0x168   : > { %1728 = vst.msk [vmem:[%s2718_s16] sm:$0xf] %vm1727_vm7, %v1709_v60  ;;  %v1652_v51 = vadd.f32 %v1608_v36, %v1524_v33  ;;  %v1621_v16 = vpop.f32.mrf.mxu0 }
 0x16a   : > { %v1674_v25 = vadd.f32 %v2710_v49, %v1652_v51 }
 0x16b   : > { %v1285_v50 = vpop.f32.mrf.mxu2  ;;  %v1488_v28 = vpop.f32.mrf.mxu3 }
 0x16c   : > { %v1692_v42 = vmax.f32 %v1674_v25, 0.0  ;;  %v1327_v14 = vadd.f32 %v1285_v50, %v1137_v45  ;;  %v1097_v59 = vpop.f32.mrf.mxu1 }
 0x16d   : > { %v1138_v36 = vadd.f32 %v1097_v59, %v2537_v7 }
 0x16e   : > { %v1710_v23 = vpack.c.bf16 %v1692_v42, %v1692_v42  ;;  %v1525_v18 = vadd.f32 %v1483_v62, %v1327_v14 }
 0x170   : > { %1729 = vst.msk [vmem:[%s2718_s16 + $0x4] sm:$0xf] %vm1727_vm7, %v1710_v23  ;;  %v1653_v38 = vadd.f32 %v1611_v39, %v1525_v18  ;;  %v1623_v48 = vpop.f32.mrf.mxu0 }
 0x172   : > { %v1675_v15 = vadd.f32 %v2710_v49, %v1653_v38 }
 0x173   : > { %v1287_v0 = vpop.f32.mrf.mxu2  ;;  %v1490_v32 = vpop.f32.mrf.mxu3 }
 0x174   : > { %v1693_v10 = vmax.f32 %v1675_v15, 0.0  ;;  %v1328_v37 = vadd.f32 %v1287_v0, %v1138_v36  ;;  %v1100_v8 = vpop.f32.mrf.mxu1 }
 0x175   : > { %v1139_v39 = vadd.f32 %v1100_v8, %v2548_v44 }
 0x176   : > { %v1711_v52 = vpack.c.bf16 %v1693_v10, %v1693_v10  ;;  %v1526_v1 = vadd.f32 %v1485_v46, %v1328_v37 }
 0x178   : > { %1730 = vst.msk [vmem:[%s2718_s16 + $0x8] sm:$0xf] %vm1727_vm7, %v1711_v52  ;;  %v1654_v47 = vadd.f32 %v1613_v21, %v1526_v1  ;;  %v1626_v51 = vpop.f32.mrf.mxu0 }
 0x17a   : > { %v1676_v41 = vadd.f32 %v2710_v49, %v1654_v47 }
 0x17b   : > { %v1290_v6 = vpop.f32.mrf.mxu2  ;;  %v1493_v7 = vpop.f32.mrf.mxu3 }
 0x17c   : > { %v1694_v3 = vmax.f32 %v1676_v41, 0.0  ;;  %v1329_v5 = vadd.f32 %v1290_v6, %v1139_v39  ;;  %v1102_v27 = vpop.f32.mrf.mxu1 }
 0x17d   : > { %v1140_v21 = vadd.f32 %v1102_v27, %v2565_v11 }
 0x17e   : > { %v1712_v9 = vpack.c.bf16 %v1694_v3, %v1694_v3  ;;  %v1527_v54 = vadd.f32 %v1488_v28, %v1329_v5 }
 0x180   : > { %1731 = vst.msk [vmem:[%s2718_s16 + $0xc] sm:$0xf] %vm1727_vm7, %v1712_v9  ;;  %v1655_v34 = vadd.f32 %v1616_v19, %v1527_v54  ;;  %v1628_v15 = vpop.f32.mrf.mxu0 }
 0x182   : > { %v1677_v12 = vadd.f32 %v2710_v49, %v1655_v34 }
 0x183   : > { %v1292_v62 = vpop.f32.mrf.mxu2  ;;  %v1495_v44 = vpop.f32.mrf.mxu3 }
 0x184   : > { %v1695_v31 = vmax.f32 %v1677_v12, 0.0  ;;  %v1330_v63 = vadd.f32 %v1292_v62, %v1140_v21  ;;  %v1105_v57 = vpop.f32.mrf.mxu1 }
 0x185   : > { %v1141_v46 = vadd.f32 %v1105_v57, %v2576_v56 }
 0x186   : > { %v1713_v26 = vpack.c.bf16 %v1695_v31, %v1695_v31  ;;  %v1528_v4 = vadd.f32 %v1490_v32, %v1330_v63 }
 0x188   : > { %1732 = vst.msk [vmem:[%s2718_s16 + $0x10] sm:$0xf] %vm1727_vm7, %v1713_v26  ;;  %v1656_v22 = vadd.f32 %v1618_v40, %v1528_v4  ;;  %v1631_v41 = vpop.f32.mrf.mxu0 }
 0x18a   : > { %v1678_v43 = vadd.f32 %v2710_v49, %v1656_v22 }
 0x18b   : > { %v1295_v35 = vpop.f32.mrf.mxu2  ;;  %v1498_v11 = vpop.f32.mrf.mxu3 }
 0x18c   : > { %v1696_v19 = vmax.f32 %v1678_v43, 0.0  ;;  %v1331_v60 = vadd.f32 %v1295_v35, %v1141_v46  ;;  %v1107_v33 = vpop.f32.mrf.mxu1 }
 0x18d   : > { %v1142_v14 = vadd.f32 %v1107_v33, %v2592_v58 }
 0x18e   : > { %v1714_v25 = vpack.c.bf16 %v1696_v19, %v1696_v19  ;;  %v1529_v45 = vadd.f32 %v1493_v7, %v1331_v60 }
 0x190   : > { %1733 = vst.msk [vmem:[%s2718_s16 + $0x14] sm:$0xf] %vm1727_vm7, %v1714_v25  ;;  %v1657_v50 = vadd.f32 %v1621_v16, %v1529_v45 }
 0x192   : > { %v1679_v42 = vadd.f32 %v2710_v49, %v1657_v50 }
 0x193   : > { %v1297_v28 = vpop.f32.mrf.mxu2  ;;  %v1500_v18 = vpop.f32.mrf.mxu3 }
 0x194   : > { %v1697_v59 = vmax.f32 %v1679_v42, 0.0  ;;  %v1332_v23 = vadd.f32 %v1297_v28, %v1142_v14  ;;  %v1110_v56 = vpop.f32.mrf.mxu1 }
 0x195   : > { %v1143_v10 = vadd.f32 %v1110_v56, %v2603_v30 }
 0x196   : > { %v1715_v40 = vpack.c.bf16 %v1697_v59, %v1697_v59  ;;  %v1530_v38 = vadd.f32 %v1495_v44, %v1332_v23 }
 0x198   : > { %1734 = vst.msk [vmem:[%s2718_s16 + $0x18] sm:$0xf] %vm1727_vm7, %v1715_v40  ;;  %v1658_v36 = vadd.f32 %v1623_v48, %v1530_v38  ;;  %v1633_v48 = vpop.f32.mrf.mxu0 }
 0x19a   : > { %v1680_v0 = vadd.f32 %v2710_v49, %v1658_v36 }
 0x19b   : > { %v1300_v37 = vpop.f32.mrf.mxu2  ;;  %v1503_v47 = vpop.f32.mrf.mxu3 }
 0x19c   : > { %v1698_v32 = vmax.f32 %v1680_v0, 0.0  ;;  %v1333_v8 = vadd.f32 %v1300_v37, %v1143_v10  ;;  %v1112_v58 = vpop.f32.mrf.mxu1 }
 0x19d   : > { %v1144_v6 = vadd.f32 %v1112_v58, %v2620_v53 }
 0x19e   : > { %v1716_v52 = vpack.c.bf16 %v1698_v32, %v1698_v32  ;;  %v1531_v1 = vadd.f32 %v1498_v11, %v1333_v8 }
 0x1a0   : > { %1735 = vst.msk [vmem:[%s2718_s16 + $0x1c] sm:$0xf] %vm1727_vm7, %v1716_v52  ;;  %v1659_v16 = vadd.f32 %v1626_v51, %v1531_v1  ;;  %v1636_v60 = vpop.f32.mrf.mxu0 }
 0x1a2   : > { %v1681_v39 = vadd.f32 %v2710_v49, %v1659_v16 }
 0x1a3   : > { %v1302_v3 = vpop.f32.mrf.mxu2  ;;  %v1505_v34 = vpop.f32.mrf.mxu3 }
 0x1a4   : > { %v1699_v5 = vmax.f32 %v1681_v39, 0.0  ;;  %v1334_v7 = vadd.f32 %v1302_v3, %v1144_v6  ;;  %v1115_v30 = vpop.f32.mrf.mxu1 }
 0x1a5   : > { %v1145_v21 = vadd.f32 %v1115_v30, %v2631_v2 }
 0x1a6   : > { %v1717_v27 = vpack.c.bf16 %v1699_v5, %v1699_v5  ;;  %v1532_v9 = vadd.f32 %v1500_v18, %v1334_v7 }
 0x1a8   : > { %1736 = vst.msk [vmem:[%s2718_s16 + $0x20] sm:$0xf] %vm1727_vm7, %v1717_v27  ;;  %v1660_v54 = vadd.f32 %v1628_v15, %v1532_v9  ;;  %v1638_v56 = vpop.f32.mrf.mxu0 }
 0x1aa   : > { %v1682_v12 = vadd.f32 %v2710_v49, %v1660_v54 }
 0x1ab   : > { %v1305_v62 = vpop.f32.mrf.mxu2  ;;  %v1508_v46 = vpop.f32.mrf.mxu3 }
 0x1ac   : > { %v1700_v31 = vmax.f32 %v1682_v12, 0.0  ;;  %v1335_v63 = vadd.f32 %v1305_v62, %v1145_v21  ;;  %v1117_v53 = vpop.f32.mrf.mxu1 }
 0x1ad   : > { %v1146_v22 = vadd.f32 %v1117_v53, %v2648_v20 }
 0x1ae   : > { %v1718_v44 = vpack.c.bf16 %v1700_v31, %v1700_v31  ;;  %v1533_v57 = vadd.f32 %v1503_v47, %v1335_v63 }
 0x1b0   : > { %1737 = vst.msk [vmem:[%s2718_s16 + $0x24] sm:$0xf] %vm1727_vm7, %v1718_v44  ;;  %v1661_v26 = vadd.f32 %v1631_v41, %v1533_v57  ;;  %v1641_v58 = vpop.f32.mrf.mxu0 }
 0x1b2   : > { %v1683_v4 = vadd.f32 %v2710_v49, %v1661_v26 }
 0x1b3   : > { %v1307_v43 = vpop.f32.mrf.mxu2  ;;  %v1510_v28 = vpop.f32.mrf.mxu3 }
 0x1b4   : > { %v1701_v35 = vmax.f32 %v1683_v4, 0.0  ;;  %v1336_v19 = vadd.f32 %v1307_v43, %v1146_v22  ;;  %v1120_v2 = vpop.f32.mrf.mxu1 }
 0x1b5   : > { %v1147_v45 = vadd.f32 %v1120_v2, %v2660_v13 }
 0x1b6   : > { %v1719_v11 = vpack.c.bf16 %v1701_v35, %v1701_v35  ;;  %v1534_v33 = vadd.f32 %v1505_v34, %v1336_v19 }
 0x1b8   : > { %1738 = vst.msk [vmem:[%s2718_s16 + $0x28] sm:$0xf] %vm1727_vm7, %v1719_v11  ;;  %v1662_v51 = vadd.f32 %v1633_v48, %v1534_v33  ;;  %v1643_v27 = vpop.f32.mrf.mxu0 }
 0x1ba   : > { %v1684_v25 = vadd.f32 %v2710_v49, %v1662_v51 }
 0x1bb   : > { %v1310_v50 = vpop.f32.mrf.mxu2  ;;  %v1513_v32 = vpop.f32.mrf.mxu3 }
 0x1bc   : > { %v1702_v42 = vmax.f32 %v1684_v25, 0.0  ;;  %v1337_v14 = vadd.f32 %v1310_v50, %v1147_v45  ;;  %v1122_v20 = vpop.f32.mrf.mxu1 }
 0x1bd   : > { %v1148_v38 = vadd.f32 %v1122_v20, %v2672_v61 }
 0x1be   : > { %v1720_v59 = vpack.c.bf16 %v1702_v42, %v1702_v42  ;;  %v1535_v23 = vadd.f32 %v1508_v46, %v1337_v14 }
 0x1c0   : > { %1739 = vst.msk [vmem:[%s2718_s16 + $0x2c] sm:$0xf] %vm1727_vm7, %v1720_v59  ;;  %v1663_v18 = vadd.f32 %v1636_v60, %v1535_v23 }
 0x1c2   : > { %v1685_v40 = vadd.f32 %v2710_v49, %v1663_v18 }
 0x1c3   : > { %v1312_v15 = vpop.f32.mrf.mxu2  ;;  %v1515_v5 = vpop.f32.mrf.mxu3 }
 0x1c4   : > { %v1703_v36 = vmax.f32 %v1685_v40, 0.0  ;;  %v1338_v0 = vadd.f32 %v1312_v15, %v1148_v38  ;;  %v1125_v13 = vpop.f32.mrf.mxu1 }
 0x1c5   : > { %v1149_v1 = vadd.f32 %v1125_v13, %v2678_v29 }
 0x1c6   : > { %v1721_v10 = vpack.c.bf16 %v1703_v36, %v1703_v36  ;;  %v1536_v37 = vadd.f32 %v1510_v28, %v1338_v0 }
 0x1c8   : > { %1740 = vst.msk [vmem:[%s2718_s16 + $0x30] sm:$0xf] %vm1727_vm7, %v1721_v10  ;;  %v1664_v8 = vadd.f32 %v1638_v56, %v1536_v37 }
 0x1ca   : > { %v1686_v52 = vadd.f32 %v2710_v49, %v1664_v8 }
 0x1cb   : > { %v1315_v47 = vpop.f32.mrf.mxu2  ;;  %v1518_v63 = vpop.f32.mrf.mxu3 }
 0x1cc   : > { %v1704_v16 = vmax.f32 %v1686_v52, 0.0  ;;  %v1339_v41 = vadd.f32 %v1315_v47, %v1149_v1  ;;  %v1127_v61 = vpop.f32.mrf.mxu1 }
 0x1cd   : > { %v1150_v30 = vadd.f32 %v1127_v61, %v2691_v55  ;;  %v1646_v55 = vpop.f32.mrf.mxu0 }
 0x1ce   : > { %v1722_v39 = vpack.c.bf16 %v1704_v16, %v1704_v16  ;;  %v1537_v6 = vadd.f32 %v1513_v32, %v1339_v41 }
 0x1d0   : > { %1741 = vst.msk [vmem:[%s2718_s16 + $0x34] sm:$0xf] %vm1727_vm7, %v1722_v39  ;;  %v1665_v3 = vadd.f32 %v1641_v58, %v1537_v6 }
 0x1d2   : > { %v1687_v7 = vadd.f32 %v2710_v49, %v1665_v3 }
 0x1d3   : > { %v1317_v9 = vpop.f32.mrf.mxu2  ;;  %v1520_v60 = vpop.f32.mrf.mxu3 }
 0x1d4   : > { %v1705_v54 = vmax.f32 %v1687_v7, 0.0  ;;  %v1340_v34 = vadd.f32 %v1317_v9, %v1150_v30  ;;  %v1130_v29 = vpop.f32.mrf.mxu1 }
 0x1d5   : > { %v1151_v31 = vadd.f32 %v1130_v29, %v2696_v24  ;;  %v1648_v51 = vpop.f32.mrf.mxu0 }
 0x1d6   : > { %v1723_v12 = vpack.c.bf16 %v1705_v54, %v1705_v54  ;;  %v1538_v21 = vadd.f32 %v1515_v5, %v1340_v34 }
 0x1d8   : > { %1742 = vst.msk [vmem:[%s2718_s16 + $0x38] sm:$0xf] %vm1727_vm7, %v1723_v12  ;;  %v1666_v62 = vadd.f32 %v1643_v27, %v1538_v21 }
 0x1da   : > { %v1688_v48 = vadd.f32 %v2710_v49, %v1666_v62 }
 0x1db   : > { %v1320_v53 = vpop.f32.mrf.mxu2 }
 0x1dc   : > { %v1706_v44 = vmax.f32 %v1688_v48, 0.0  ;;  %v1341_v57 = vadd.f32 %v1320_v53, %v1151_v31  ;;  %v1132_v22 = vpop.f32.mrf.mxu1 }
 0x1dd   : > { %v1152_v35 = vadd.f32 %v1132_v22, %v2704_v17 }
 0x1de   : > { %v1724_v26 = vpack.c.bf16 %v1706_v44, %v1706_v44  ;;  %v1539_v4 = vadd.f32 %v1518_v63, %v1341_v57 }
 0x1e0   : > { %1743 = vst.msk [vmem:[%s2718_s16 + $0x3c] sm:$0xf] %vm1727_vm7, %v1724_v26  ;;  %v1667_v43 = vadd.f32 %v1646_v55, %v1539_v4 }
 0x1e2   : > { %v1689_v46 = vadd.f32 %v2710_v49, %v1667_v43 }
 0x1e3   : > { %v1322_v19 = vpop.f32.mrf.mxu2 }
 0x1e4   : > { %v1707_v2 = vmax.f32 %v1689_v46, 0.0  ;;  %v1342_v24 = vadd.f32 %v1322_v19, %v1152_v35 }
 0x1e6   : > { %v1725_v11 = vpack.c.bf16 %v1707_v2, %v1707_v2  ;;  %v1540_v33 = vadd.f32 %v1520_v60, %v1342_v24 }
 0x1e8   : > { %1744 = vst.msk [vmem:[%s2718_s16 + $0x40] sm:$0xf] %vm1727_vm7, %v1725_v11  ;;  %v1668_v25 = vadd.f32 %v1648_v51, %v1540_v33 }
 0x1ea   : > { %v1690_v45 = vadd.f32 %v2710_v49, %v1668_v25 }
 0x1ec   : > { %v1708_v50 = vmax.f32 %v1690_v45, 0.0 }
 0x1ee   : > { %v1726_v42 = vpack.c.bf16 %v1708_v50, %v1708_v50 }
 0x1f0   : > { %1745 = vst.msk [vmem:[%s2718_s16 + $0x44] sm:$0xf] %vm1727_vm7, %v1726_v42 }
 0x1f1 PF: > { %s13_s12 = sadd.s32 1, %s2133_s12  }
 0x1f2   : > { %p10_p4 = scmp.ge.s32.totalorder %s13_s12, 4  }
 0x1f4   :  { %12 = sbr.rel (!%p10_p4) target bundleno = 1 (0x1), region = 71 }

// kernel: deep_transfer_forward.8
= control target key start
LH: loop header
LB: loop body
LE: loop exit
PB: predicated region body
PF: predicated region fallthrough
CT: control target
= control target key end

     0   :  { %s1567_s12 = smov 0   ;;  %s1922_s0 = inlined_call_operand.vmem [shape: bf16[2,1,110,32], index: 0, kind: input, shape index: {}]   ;;  %s1923_s1 = inlined_call_operand.vmem [shape: bf16[9,32,32], index: 1, kind: input, shape index: {}]   ;;  %s1924_s2 = inlined_call_operand.vmem [shape: f32[1,32], index: 2, kind: input, shape index: {}]   ;;  %s1925_s3 = inlined_call_operand.vmem [shape: bf16[2,80,32], index: 3, kind: output, shape index: {}]  }
   0x1 LB: > { %s1279_s13 = sadd.s32 4294967295, %s1545_s12   ;;  %p1283_p0 = scmp.ge.s32.totalorder %s1545_s12, 1  ;;  %s1545_s12 = sphi %s1567_s12, %s13_s12  }
   0x2   : > { %p137_p1 = scmp.lt.s32.totalorder %s1545_s12, 3 }
   0x4   : > { %p138_p2 = pnand %p1283_p0, %p137_p1 }
   0x5   : > { %p161_p3 = scmp.lt.s32.totalorder (!%p138_p2), %s1279_s13, 1 }
   0x6   : > { %141 = sbr.rel (%p138_p2) target bundleno = 352 (0x160), region = 32 }
   0xb   : > { %v1492_v0 = vld [vmem:[%s1923_s1 + $0x18] sm:$0xff]  ;;  %v1491_v1 = vld [vmem:[%s1923_s1 + $0x10] sm:$0xff]  ;;  %s1927_s13 = smov (!%p161_p3, %s1279_s13), 1  ;;  %v1494_v2 = vld [vmem:[%s1923_s1 + $0x28] sm:$0xff]  ;;  %vm220_vm0 = vsmask.f32 7424 }
   0xc   : > { %1522 = vmatpush.bf16.msra.mxu1 %v1492_v0  ;;  %1523 = vmatpush.bf16.msra.mxu2 %v1492_v0  ;;  %s1528_s20 = smul.u32 56, %s1927_s13  ;;  %v1490_v3 = vld [vmem:[%s1923_s1 + $0x8] sm:$0xff]  ;;  %v1500_v4 = vld [vmem:[%s1923_s1 + $0x38] sm:$0xff]  ;;  %v1489_v6 = vld [vmem:[%s1923_s1] sm:$0xff]  ;;  %vm277_vm1 = vcmask 261120   ;;  %vm392_vm2 = vcmask 1046528  }
   0xd   : > { %1524 = vmatpush.bf16.msra.mxu3 %v1492_v0  ;;  %299 = vmatpush.bf16.msra.mxu0 %v1492_v0  ;;  %v1502_v5 = vld [vmem:[%s1923_s1 + $0x48] sm:$0xff]  ;;  %v1493_v7 = vld [vmem:[%s1923_s1 + $0x20] sm:$0xff]  ;;  %v1499_v13 = vld [vmem:[%s1923_s1 + $0x30] sm:$0xff]  ;;  %vm610_vm3 = vsmask.f32 6400  ;;  %vm744_vm4 = vcmask 1045504  }
   0xe   : > { %s1599_s29 = scalar_lea.vmem %s1922_s0, %s1528_s20  ;;  %v1501_v19 = vld [vmem:[%s1923_s1 + $0x40] sm:$0xff]  ;;  %v1510_v44 = vld [vmem:[%s1923_s1 + $0x68] sm:$0xff]  ;;  %v1512_v45 = vld [vmem:[%s1923_s1 + $0x78] sm:$0xff]  ;;  %vm962_vm5 = vsmask.f32 5376  ;;  %vm1096_vm6 = vcmask 1044480  }
   0xf   : > { %v1608_v8 = vld [vmem:[%s1599_s29 + $0x8] sm:$0xff]  ;;  %v1611_v9 = vld [vmem:[%s1599_s29 + $0x10] sm:$0xff]  ;;  %v1614_v10 = vld [vmem:[%s1599_s29 + $0x18] sm:$0xff]  ;;  %s1529_s4 = smul.u32 40, %s1927_s13  ;;  %vm1213_vm7 = vcmask 257024  }
  0x10   : > { %1525 = vmatpush.bf16.msra.mxu1 %v1491_v1  ;;  %1526 = vmatpush.bf16.msra.mxu2 %v1491_v1  ;;  %v1617_v11 = vld [vmem:[%s1599_s29 + $0x20] sm:$0xff]  ;;  %v186_v12 = vld [vmem:[%s1599_s29 + $0x28] sm:$0x1]  ;;  %v229_v14 = vshll.u32 %v1608_v8, 16  ;;  %v233_v15 = vshrl.u32 %v1608_v8, 16  ;;  %v237_v16 = vshll.u32 %v1611_v9, 16 }
  0x11   : > { %1527 = vmatpush.bf16.msra.mxu3 %v1491_v1  ;;  %300 = vmatpush.bf16.msra.mxu0 %v1491_v1  ;;  %v241_v17 = vshrl.u32 %v1611_v9, 16  ;;  %v1628_v18 = vld [vmem:[%s1599_s29] sm:$0xff]   ;;  %v245_v20 = vshll.u32 %v1614_v10, 16  ;;  %v213_v21 = vunpack.c.l.b16 %v186_v12  ;;  %v253_v22 = vshll.u32 %v1617_v11, 16  ;;  %v1639_v28 = vld [vmem:[%s1599_s29 + $0x8] sm:$0xff]   ;;  %v1504_v46 = vld [vmem:[%s1923_s1 + $0x58] sm:$0xff]  ;;  %s1880_s7 = scalar_lea.vmem %s1925_s3, %s1529_s4 }
  0x12   : > { %v257_v23 = vshrl.u32 %v1617_v11, 16  ;;  %v475_v24 = vld [vmem:[%s1599_s29 + $0x4] sm:$0xe]  ;;  %v231_v25 = vrot.slane %v229_v14, 1  ;;  %v239_v26 = vrot.slane %v237_v16, 1  ;;  %v222_v27 = vshrl.u32 %v1628_v18, 16 }
  0x13   : > { %v247_v29 = vrot.slane %v245_v20, 1  ;;  %v1641_v30 = vpack.c.b16 %v213_v21, %v213_v21  ;;  %v255_v31 = vrot.slane %v253_v22, 1  ;;  %v224_v32 = vshll.u32 %v1628_v18, 16  ;;  %v1662_v49 = vld [vmem:[%s1599_s29 + $0xc] sm:$0xff] }
  0x14   : > { %437 = vmatpush.bf16.msrb.mxu2 %v1494_v2  ;;  %355 = vmatpush.bf16.msrb.mxu1 %v1490_v3  ;;  %v235_v33 = vor.u32 %v233_v15, %v231_v25  ;;  %v243_v34 = vor.u32 %v241_v17, %v239_v26  ;;  %v502_v35 = vunpack.c.l.b16 %v475_v24  ;;  %v503_v39 = vunpack.c.l.b16 %v1639_v28  ;;  %v1514_v51 = vld [vmem:[%s1923_s1 + $0x88] sm:$0xff]  ;;  %v1509_v24 = vld [vmem:[%s1923_s1 + $0x60] sm:$0xff] }
  0x15   : > { %563 = vmatpush.bf16.msrb.mxu3 %v1500_v4  ;;  %697 = vmatpush.bf16.msrb.mxu0 %v1502_v5  ;;  %v259_v36 = vor.u32 %v257_v23, %v255_v31  ;;  %v261_v37 = vshll.u32 %v1641_v30, 16  ;;  %v226_v38 = vrot.slane %v224_v32, 1  ;;  %v620_v54 = vshrl.u32 %v1662_v49, 16  ;;  %v1519_v5 = vld [vmem:[%s1599_s29] sm:$0xf0] }
  0x16   : > { %v240_v40 = vsel %vm220_vm0, %v235_v33, %v239_v26  ;;  %v248_v41 = vsel %vm220_vm0, %v243_v34, %v247_v29  ;;  %v513_v50 = vpack.c.b16 %v503_v39, %v502_v35  ;;  %v623_v55 = vshll.u32 %v1662_v49, 16  ;;  %v1503_v26 = vld [vmem:[%s1923_s1 + $0x50] sm:$0xff] }
  0x17   : > { %1315 = vmatmul.msk.bf16.vlgmr.msra.gmra.mxu1 %vm277_vm1, %v240_v40  ;;  %1316 = vmatmul.msk.bf16.vlgmr.msra.gmra.mxu2 %vm277_vm1, %v248_v41  ;;  %v263_v42 = vrot.slane %v261_v37, 1  ;;  %v227_v43 = vor.u32 %v226_v38, %v222_v27  ;;  %v249_v56 = vshrl.u32 %v1614_v10, 16  ;;  %v622_v59 = vrot.slane %v620_v54, 1  ;;  %v1513_v40 = vld [vmem:[%s1923_s1 + $0x80] sm:$0xff] }
  0x18   : > { %438 = vmatpush.bf16.msrb.mxu2 %v1493_v7  ;;  %356 = vmatpush.bf16.msrb.mxu1 %v1489_v6  ;;  %v612_v52 = vshrl.u32 %v513_v50, 16  ;;  %v615_v53 = vshll.u32 %v513_v50, 16  ;;  %v625_v60 = vrot.slane %v623_v55, 2  ;;  %v519_v62 = vrot.slane %v513_v50, 1  ;;  %v1520_v6 = vld [vmem:[%s1599_s29] sm:$0xe] }
  0x19   : > { %564 = vmatpush.bf16.msrb.mxu3 %v1499_v13  ;;  %698 = vmatpush.bf16.msrb.mxu0 %v1501_v19  ;;  %v264_v47 = vsel %vm220_vm0, %v259_v36, %v263_v42  ;;  %v232_v48 = vsel %vm220_vm0, %v227_v43, %v231_v25  ;;  %v251_v61 = vor.u32 %v249_v56, %v247_v29  ;;  %v520_v63 = vrot.slane %v1662_v49, 1  ;;  %v1684_v7 = vld [vmem:[%s1599_s29 + $0x14] sm:$0xff]  ;;  %v1702_v25 = vld [vmem:[%s1599_s29 + $0x1c] sm:$0xff]  ;;  %v1726_v41 = vld [vmem:[%s1599_s29 + $0x24] sm:$0xff] }
  0x1a   : > { %1318 = vmatmul.msk.bf16.vlgmr.msra.gmra.mxu3 %vm277_vm1, %v264_v47  ;;  %1314 = vmatmul.msk.bf16.vlgmr.msra.gmra.mxu0 %vm277_vm1, %v232_v48  ;;  %v614_v57 = vrot.slane %v612_v52, 1  ;;  %v617_v58 = vrot.slane %v615_v53, 2  ;;  %v626_v1 = vor.u32 %v625_v60, %v622_v59  ;;  %v629_v12 = vshrl.u32 %v1684_v7, 16  ;;  %v735_v48 = vld [vmem:[%s1599_s29 + $0x4] sm:$0xc] }
  0x1b   : > { %v256_v2 = vsel %vm220_vm0, %v251_v61, %v255_v31  ;;  %v521_v3 = vsel %vm392_vm2, %v519_v62, %v520_v63  ;;  %v632_v13 = vshll.u32 %v1684_v7, 16  ;;  %v1521_v14 = vor.u32 %v1520_v6, %v1519_v5  ;;  %v601_v52 = vld [vmem:[%s1599_s29 + $0x2c] sm:$0x3]  ;;  %v827_v5 = vld [vmem:[%s1599_s29 + $0x8] sm:$0xc] }
  0x1c   : > { %915 = vmatpush.bf16.msra.mxu2 %v1510_v44  ;;  %789 = vmatpush.bf16.msra.mxu1 %v1504_v46  ;;  %v618_v0 = vor.u32 %v617_v58, %v614_v57  ;;  %v631_v15 = vrot.slane %v629_v12, 1  ;;  %v522_v19 = vrot.slane %v1684_v7, 1  ;;  %v638_v27 = vshrl.u32 %v1702_v25, 16  ;;  %v485_v62 = vld [vmem:[%s1599_s29 + $0x2c] sm:$0x1] }
  0x1d   : > { %1049 = vmatpush.bf16.msra.mxu3 %v1512_v45  ;;  %1141 = vmatpush.bf16.msra.mxu0 %v1514_v51  ;;  %v634_v16 = vrot.slane %v632_v13, 2  ;;  %v393_v17 = vrot.slane %v1521_v14, 1  ;;  %v641_v29 = vshll.u32 %v1702_v25, 16  ;;  %v396_v33 = vrot.slane %v1611_v9, 1 }
  0x1e   : > { %v627_v4 = vsel %vm610_vm3, %v618_v0, %v626_v1  ;;  %v523_v22 = vsel %vm392_vm2, %v520_v63, %v522_v19  ;;  %v640_v31 = vrot.slane %v638_v27, 1  ;;  %v524_v34 = vrot.slane %v1702_v25, 1 }
  0x1f   : > { %v635_v20 = vor.u32 %v634_v16, %v631_v15  ;;  %v643_v32 = vrot.slane %v641_v29, 2  ;;  %v402_v42 = vrot.slane %v1641_v30, 1  ;;  %v647_v43 = vshrl.u32 %v1726_v41, 16  ;;  %v1505_v16 = vld [vmem:[%s1599_s29 + $0x10] sm:$0xff] }
  0x20   : > { %916 = vmatpush.bf16.msra.mxu2 %v1509_v24  ;;  %790 = vmatpush.bf16.msra.mxu1 %v1503_v26  ;;  %v525_v37 = vsel %vm392_vm2, %v522_v19, %v524_v34  ;;  %v650_v44 = vshll.u32 %v1726_v41, 16  ;;  %v398_v50 = vrot.slane %v1614_v10, 1  ;;  %v742_v51 = vunpack.c.l.b16 %v735_v48 }
  0x21   : > { %v636_v23 = vsel %vm610_vm3, %v626_v1, %v635_v20  ;;  %v644_v35 = vor.u32 %v643_v32, %v640_v31  ;;  %1142 = vmatpush.bf16.msra.mxu0 %v1513_v40  ;;  %v649_v46 = vrot.slane %v647_v43, 1  ;;  %v526_v30 = vrot.slane %v1726_v41, 1 }
  0x22   : > { %v652_v47 = vrot.slane %v650_v44, 2  ;;  %v743_v53 = vpack.c.b16 %v503_v39, %v742_v51  ;;  %v608_v55 = vunpack.c.l.b16 %v601_v52  ;;  %v399_v56 = vsel %vm392_vm2, %v396_v33, %v398_v50  ;;  %v1788_v51 = vld [vmem:[%s1599_s29 + $0x20] sm:$0xff] }
  0x23   : > { %v645_v38 = vsel %vm610_vm3, %v635_v20, %v644_v35  ;;  %v746_v58 = vrot.slane %v1662_v49, 2  ;;  %v527_v39 = vsel %vm392_vm2, %v524_v34, %v526_v30  ;;  %v748_v49 = vrot.slane %v1684_v7, 2  ;;  %v1087_v20 = vld [vmem:[%s1599_s29 + $0x8] sm:$0x8] }
  0x24   : > { %v653_v54 = vor.u32 %v652_v47, %v649_v46  ;;  %v745_v57 = vrot.slane %v743_v53, 2  ;;  %v1751_v61 = vpack.c.b16 %v608_v55, %v608_v55  ;;  %v512_v63 = vunpack.c.l.b16 %v485_v62 }
  0x25   : > { %v749_v1 = vsel %vm744_vm4, %v746_v58, %v748_v49  ;;  %v854_v13 = vunpack.c.l.b16 %v827_v5  ;;  %v855_v14 = vunpack.c.h.b16 %v1639_v28  ;;  %v1094_v24 = vunpack.c.l.b16 %v1087_v20 }
  0x26   : > { %v747_v59 = vsel %vm744_vm4, %v745_v57, %v746_v58  ;;  %v654_v60 = vsel %vm610_vm3, %v644_v35, %v653_v54  ;;  %v659_v0 = vshll.u32 %v1751_v61, 16  ;;  %v1098_v34 = vrot.slane %v1505_v16, 3 }
  0x27   : > { %1317 = vmatmul.msk.bf16.gmra.mxu2 %vm277_vm1, %v256_v2  ;;  %1327 = vmatmul.msk.bf16.vlgmr.msrb.gmra.mxu1 %vm277_vm1, %v1628_v18  ;;  %v394_v18 = vrot.slane %v1608_v8, 1  ;;  %v518_v2 = vpack.c.b16 %v512_v63, %v512_v63  ;;  %v865_v19 = vpack.c.b16 %v855_v14, %v854_v13  ;;  %v1095_v29 = vpack.c.b16 %v855_v14, %v1094_v24  ;;  %v953_v13 = vld [vmem:[%s1599_s29 + $0x30] sm:$0x7] }
  0x28   : > { %v872_v44 = vrot.slane %v1505_v16, 2  ;;  %v990_v52 = vshrl.u32 %v1788_v51, 16  ;;  %v993_v53 = vshll.u32 %v1788_v51, 16  ;;  %v750_v55 = vrot.slane %v1702_v25, 2 }
  0x29   : > { %v395_v21 = vsel %vm392_vm2, %v393_v17, %v394_v18  ;;  %v397_v36 = vsel %vm392_vm2, %v394_v18, %v396_v33  ;;  %v528_v6 = vrot.slane %v518_v2, 1  ;;  %v964_v28 = vshrl.u32 %v865_v19, 16 }
  0x2a   : > { %1377 = vmatmul.msk.bf16.vlgmr.msrb.gmra.mxu3 %vm277_vm1, %v521_v3  ;;  %1394 = vmatmul.msk.bf16.vlgmr.msrb.gmra.mxu0 %vm277_vm1, %v627_v4  ;;  %v661_v4 = vrot.slane %v659_v0, 2  ;;  %v1097_v33 = vrot.slane %v1095_v29, 3  ;;  %v871_v43 = vrot.slane %v865_v19, 2  ;;  %v1102_v58 = vrot.slane %v1788_v51, 3 }
  0x2b   : > { %v529_v17 = vsel %vm392_vm2, %v526_v30, %v528_v6  ;;  %v992_v30 = vrot.slane %v990_v52, 2  ;;  %v752_v6 = vrot.slane %v1726_v41, 2 }
  0x2c   : > { %v873_v47 = vsel %vm744_vm4, %v871_v43, %v872_v44 }
  0x37   : > { %1328 = vmatmul.msk.bf16.gmra.mxu1 %vm277_vm1, %v1608_v8  ;;  %1344 = vmatmul.msk.bf16.vlgmr.msrb.gmra.mxu2 %vm277_vm1, %v395_v21  ;;  %v1511_v8 = vld [vmem:[%s1923_s1 + $0x70] sm:$0xff]  ;;  %v972_v21 = vshrl.u32 %v1505_v16, 16 }
  0x38   : > { %1050 = vmatpush.bf16.msra.mxu3 %v1511_v8 }
  0x39   : > { %v974_v8 = vrot.slane %v972_v21, 2 }
  0x3a   : > { %1378 = vmatmul.msk.bf16.gmra.mxu3 %vm277_vm1, %v523_v22  ;;  %1395 = vmatmul.msk.bf16.gmra.mxu0 %vm277_vm1, %v636_v23  ;;  %v967_v22 = vshll.u32 %v865_v19, 16  ;;  %v975_v23 = vshll.u32 %v1505_v16, 16  ;;  %v753_v19 = vsel %vm744_vm4, %v750_v55, %v752_v6 }
  0x3c   : > { %v969_v26 = vrot.slane %v967_v22, 3  ;;  %v977_v27 = vrot.slane %v975_v23, 3 }
  0x3e   : > { %v978_v32 = vor.u32 %v977_v27, %v974_v8 }
  0x47   : > { %1329 = vmatmul.msk.bf16.gmra.mxu1 %vm277_vm1, %v1611_v9  ;;  %1345 = vmatmul.msk.bf16.gmra.mxu2 %vm277_vm1, %v397_v36  ;;  %v400_v9 = vrot.slane %v1617_v11, 1  ;;  %v1099_v36 = vsel %vm1096_vm6, %v1097_v33, %v1098_v34 }
  0x49   : > { %v1735_v45 = vsel %vm392_vm2, %v400_v9, %v402_v42  ;;  %v401_v15 = vsel %vm392_vm2, %v398_v50, %v400_v9 }
  0x4a   : > { %1379 = vmatmul.msk.bf16.gmra.mxu3 %vm277_vm1, %v525_v37  ;;  %1396 = vmatmul.msk.bf16.gmra.mxu0 %vm277_vm1, %v645_v38  ;;  %v1506_v37 = vld [vmem:[%s1599_s29 + $0x18] sm:$0xff] }
  0x4b   : > { %v981_v38 = vshrl.u32 %v1506_v37, 16  ;;  %v984_v40 = vshll.u32 %v1506_v37, 16 }
  0x4d   : > { %v983_v9 = vrot.slane %v981_v38, 2  ;;  %v986_v42 = vrot.slane %v984_v40, 3 }
  0x4f   : > { %v987_v46 = vor.u32 %v986_v42, %v983_v9 }
  0x51   : > { %v988_v48 = vsel %vm962_vm5, %v978_v32, %v987_v46 }
  0x57   : > { %1330 = vmatmul.msk.bf16.gmra.mxu1 %vm277_vm1, %v1614_v10  ;;  %1346 = vmatmul.msk.bf16.gmra.mxu2 %vm277_vm1, %v399_v56  ;;  %v656_v10 = vshrl.u32 %v1751_v61, 16  ;;  %v874_v56 = vrot.slane %v1506_v37, 2 }
  0x59   : > { %v658_v3 = vrot.slane %v656_v10, 1  ;;  %v1805_v10 = vld [vmem:[%s1599_s29 + $0x28] sm:$0xff] }
  0x5a   : > { %1380 = vmatmul.msk.bf16.gmra.mxu3 %vm277_vm1, %v527_v39  ;;  %1397 = vmatmul.msk.bf16.gmra.mxu0 %vm277_vm1, %v654_v60  ;;  %v751_v39 = vsel %vm744_vm4, %v748_v49, %v750_v55  ;;  %v875_v60 = vsel %vm744_vm4, %v872_v44, %v874_v56  ;;  %v999_v7 = vshrl.u32 %v1805_v10, 16  ;;  %v1002_v49 = vshll.u32 %v1805_v10, 16 }
  0x5b   : > { %v662_v12 = vor.u32 %v661_v4, %v658_v3  ;;  %v1104_v16 = vrot.slane %v1805_v10, 3 }
  0x5c   : > { %v1001_v4 = vrot.slane %v999_v7, 2  ;;  %v1004_v5 = vrot.slane %v1002_v49, 3 }
  0x5d   : > { %v663_v18 = vsel %vm610_vm3, %v653_v54, %v662_v12  ;;  %v995_v54 = vrot.slane %v993_v53, 3  ;;  %v876_v12 = vrot.slane %v1788_v51, 2  ;;  %v1105_v23 = vsel %vm1096_vm6, %v1102_v58, %v1104_v16 }
  0x5f   : > { %v996_v57 = vor.u32 %v995_v54, %v992_v30  ;;  %v877_v20 = vsel %vm744_vm4, %v874_v56, %v876_v12 }
  0x61   : > { %v997_v62 = vsel %vm962_vm5, %v987_v46, %v996_v57 }
  0x67   : > { %1331 = vmatmul.msk.bf16.gmra.mxu1 %vm277_vm1, %v1617_v11  ;;  %1347 = vmatmul.msk.bf16.gmra.mxu2 %vm277_vm1, %v401_v15  ;;  %v966_v11 = vrot.slane %v964_v28, 2  ;;  %v1005_v15 = vor.u32 %v1004_v5, %v1001_v4 }
  0x69   : > { %v970_v31 = vor.u32 %v969_v26, %v966_v11  ;;  %v1006_v41 = vsel %vm962_vm5, %v996_v57, %v1005_v15 }
  0x6a   : > { %1381 = vmatmul.msk.bf16.gmra.mxu3 %vm277_vm1, %v529_v17  ;;  %1398 = vmatmul.msk.bf16.gmra.mxu0 %vm277_vm1, %v663_v18  ;;  %v960_v17 = vunpack.c.l.b16 %v953_v13 }
  0x6b   : > { %v979_v35 = vsel %vm962_vm5, %v970_v31, %v978_v32 }
  0x6c   : > { %v961_v24 = vpack.c.b16 %v960_v17, %v960_v17 }
  0x6e   : > { %v1008_v11 = vshrl.u32 %v961_v24, 16  ;;  %v1011_v26 = vshll.u32 %v961_v24, 16  ;;  %v1106_v40 = vrot.slane %v961_v24, 3 }
  0x70   : > { %v1010_v33 = vrot.slane %v1008_v11, 2 }
  0x77   : > { %1348 = vmatmul.msk.bf16.gmra.mxu2 %vm277_vm1, %v1735_v45  ;;  %1411 = vmatmul.msk.bf16.vlgmr.msra.gmra.mxu1 %vm277_vm1, %v747_v59  ;;  %v1100_v45 = vrot.slane %v1506_v37, 3 }
  0x79   : > { %v1101_v50 = vsel %vm1096_vm6, %v1098_v34, %v1100_v45  ;;  %v1103_v25 = vsel %vm1096_vm6, %v1100_v45, %v1102_v58  ;;  %v1013_v34 = vrot.slane %v1011_v26, 3  ;;  %v837_v45 = vld [vmem:[%s1599_s29 + $0x30] sm:$0x3] }
  0x7a   : > { %1461 = vmatmul.msk.bf16.vlgmr.msra.gmra.mxu3 %vm277_vm1, %v979_v35  ;;  %1478 = vmatmul.msk.bf16.vlgmr.msra.gmra.mxu0 %vm277_vm1, %v1099_v36  ;;  %v754_v35 = vrot.slane %v1751_v61, 2  ;;  %v878_v36 = vrot.slane %v1805_v10, 2 }
  0x7b   : > { %v1014_v38 = vor.u32 %v1013_v34, %v1010_v33 }
  0x7c   : > { %v755_v42 = vsel %vm744_vm4, %v752_v6, %v754_v35  ;;  %v879_v43 = vsel %vm744_vm4, %v876_v12, %v878_v36 }
  0x87   : > { %1412 = vmatmul.msk.bf16.gmra.mxu1 %vm277_vm1, %v749_v1  ;;  %1444 = vmatmul.msk.bf16.vlgmr.msra.gmra.mxu2 %vm277_vm1, %v873_v47  ;;  %v1015_v47 = vsel %vm962_vm5, %v1005_v15, %v1014_v38 }
  0x8a   : > { %1462 = vmatmul.msk.bf16.gmra.mxu3 %vm277_vm1, %v988_v48  ;;  %1479 = vmatmul.msk.bf16.gmra.mxu0 %vm277_vm1, %v1101_v50  ;;  %v1107_v48 = vsel %vm1096_vm6, %v1104_v16, %v1106_v40  ;;  %v864_v50 = vunpack.c.l.b16 %v837_v45 }
  0x8c   : > { %v870_v30 = vpack.c.b16 %v864_v50, %v864_v50 }
  0x94   : > { %v307_v59 = vpop.f32.mrf.mxu1 }
  0x97   : > { %1413 = vmatmul.msk.bf16.gmra.mxu1 %vm277_vm1, %v751_v39  ;;  %1445 = vmatmul.msk.bf16.gmra.mxu2 %vm277_vm1, %v875_v60  ;;  %v302_v63 = vpop.f32.mrf.mxu0 }
  0x9a   : > { %v1807_v0 = vpop.f32.mrf.mxu2  ;;  %1463 = vmatmul.msk.bf16.gmra.mxu3 %vm277_vm1, %v997_v62  ;;  %1480 = vmatmul.msk.bf16.gmra.mxu0 %vm277_vm1, %v1103_v25 }
  0x9c   : > { %v309_v1 = vpop.f32.mrf.mxu1 }
  0x9d   : > { %v1813_v2 = vpop.f32.mrf.mxu3 }
  0x9f   : > { %v304_v3 = vpop.f32.mrf.mxu0 }
  0xa2   : > { %v1818_v14 = vpop.f32.mrf.mxu2 }
  0xa4   : > { %v358_v18 = vpop.f32.mrf.mxu1 }
  0xa5   : > { %v359_v21 = vadd.f32 %v358_v18, %v302_v63  ;;  %v1823_v28 = vpop.f32.mrf.mxu3 }
  0xa7   : > { %1414 = vmatmul.msk.bf16.gmra.mxu1 %vm277_vm1, %v753_v19  ;;  %1446 = vmatmul.msk.bf16.gmra.mxu2 %vm277_vm1, %v877_v20  ;;  %v700_v22 = vpop.f32.mrf.mxu0 }
  0xaa   : > { %v317_v8 = vpop.f32.mrf.mxu2  ;;  %1464 = vmatmul.msk.bf16.gmra.mxu3 %vm277_vm1, %v1006_v41  ;;  %1481 = vmatmul.msk.bf16.gmra.mxu0 %vm277_vm1, %v1105_v23 }
  0xac   : > { %v360_v27 = vpop.f32.mrf.mxu1 }
  0xad   : > { %v361_v29 = vadd.f32 %v360_v27, %v304_v3  ;;  %v566_v31 = vpop.f32.mrf.mxu3 }
  0xaf   : > { %v702_v32 = vpop.f32.mrf.mxu0 }
  0xb2   : > { %v319_v37 = vpop.f32.mrf.mxu2 }
  0xb4   : > { %v363_v9 = vpop.f32.mrf.mxu1 }
  0xb5   : > { %v364_v44 = vadd.f32 %v363_v9, %v307_v59  ;;  %v568_v46 = vpop.f32.mrf.mxu3  ;;  %v880_v59 = vrot.slane %v870_v30, 2 }
  0xb7   : > { %1415 = vmatmul.msk.bf16.gmra.mxu1 %vm277_vm1, %v755_v42  ;;  %1447 = vmatmul.msk.bf16.gmra.mxu2 %vm277_vm1, %v879_v43  ;;  %v705_v61 = vpop.f32.mrf.mxu0  ;;  %v881_v63 = vsel %vm744_vm4, %v878_v36, %v880_v59 }
  0xba   : > { %v440_v51 = vpop.f32.mrf.mxu2  ;;  %1465 = vmatmul.msk.bf16.gmra.mxu3 %vm277_vm1, %v1015_v47  ;;  %1482 = vmatmul.msk.bf16.gmra.mxu0 %vm277_vm1, %v1107_v48 }
  0xbb   : > { %v465_v52 = vadd.f32 %v440_v51, %v359_v21 }
  0xbc   : > { %v365_v53 = vpop.f32.mrf.mxu1 }
  0xbd   : > { %v591_v54 = vadd.f32 %v566_v31, %v465_v52  ;;  %v366_v55 = vadd.f32 %v365_v53, %v309_v1  ;;  %v571_v56 = vpop.f32.mrf.mxu3 }
  0xbf   : > { %v707_v57 = vpop.f32.mrf.mxu0  ;;  %v1842_v58 = vadd.f32 %v700_v22, %v591_v54 }
  0xc2   : > { %v442_v39 = vpop.f32.mrf.mxu2 }
  0xc3   : > { %v466_v60 = vadd.f32 %v442_v39, %v361_v29 }
  0xc4   : > { %v368_v62 = vpop.f32.mrf.mxu1 }
  0xc5   : > { %v592_v25 = vadd.f32 %v568_v46, %v466_v60  ;;  %v369_v10 = vadd.f32 %v368_v62, %v1807_v0  ;;  %v573_v7 = vpop.f32.mrf.mxu3 }
  0xc7   : > { %1448 = vmatmul.msk.bf16.gmra.mxu2 %vm277_vm1, %v881_v63  ;;  %v710_v49 = vpop.f32.mrf.mxu0  ;;  %v1847_v3 = vadd.f32 %v702_v32, %v592_v25 }
  0xca   : > { %v445_v1 = vpop.f32.mrf.mxu2 }
  0xcb   : > { %v467_v4 = vadd.f32 %v445_v1, %v364_v44 }
  0xcc   : > { %v370_v5 = vpop.f32.mrf.mxu1 }
  0xcd   : > { %v593_v6 = vadd.f32 %v571_v56, %v467_v4  ;;  %v371_v12 = vadd.f32 %v370_v5, %v1818_v14  ;;  %v576_v13 = vpop.f32.mrf.mxu3  ;;  %v1872_v5 = vld [vmem:[%s1924_s2] ss:$0 sm:$0xff] }
  0xcf   : > { %v712_v15 = vpop.f32.mrf.mxu0  ;;  %v1850_v16 = vadd.f32 %v705_v61, %v593_v6 }
  0xd2   : > { %v447_v17 = vpop.f32.mrf.mxu2 }
  0xd3   : > { %v468_v18 = vadd.f32 %v447_v17, %v366_v55 }
  0xd4   : > { %v373_v19 = vpop.f32.mrf.mxu1 }
  0xd5   : > { %v594_v0 = vadd.f32 %v573_v7, %v468_v18  ;;  %v374_v20 = vadd.f32 %v373_v19, %v317_v8  ;;  %v578_v21 = vpop.f32.mrf.mxu3 }
  0xd7   : > { %v715_v41 = vpop.f32.mrf.mxu0  ;;  %v1852_v22 = vadd.f32 %v707_v57, %v594_v0 }
  0xda   : > { %v450_v23 = vpop.f32.mrf.mxu2 }
  0xdb   : > { %v469_v24 = vadd.f32 %v450_v23, %v369_v10 }
  0xdc   : > { %v375_v11 = vpop.f32.mrf.mxu1 }
  0xdd   : > { %v595_v26 = vadd.f32 %v576_v13, %v469_v24  ;;  %v376_v27 = vadd.f32 %v375_v11, %v319_v37  ;;  %v581_v29 = vpop.f32.mrf.mxu3 }
  0xdf   : > { %v717_v14 = vpop.f32.mrf.mxu0  ;;  %v1854_v31 = vadd.f32 %v710_v49, %v595_v26 }
  0xe2   : > { %v452_v32 = vpop.f32.mrf.mxu2 }
  0xe3   : > { %v470_v33 = vadd.f32 %v452_v32, %v371_v12 }
  0xe4   : > { %v378_v34 = vpop.f32.mrf.mxu1 }
  0xe5   : > { %v596_v35 = vadd.f32 %v578_v21, %v470_v33  ;;  %v379_v36 = vadd.f32 %v378_v34, %v1813_v2  ;;  %v583_v8 = vpop.f32.mrf.mxu3 }
  0xe7   : > { %v1857_v38 = vadd.f32 %v712_v15, %v596_v35  ;;  %v720_v40 = vpop.f32.mrf.mxu0 }
  0xea   : > { %v455_v9 = vpop.f32.mrf.mxu2 }
  0xeb   : > { %v471_v42 = vadd.f32 %v455_v9, %v374_v20 }
  0xec   : > { %v380_v43 = vpop.f32.mrf.mxu1 }
  0xed   : > { %v597_v44 = vadd.f32 %v581_v29, %v471_v42  ;;  %v381_v37 = vadd.f32 %v380_v43, %v1823_v28  ;;  %v586_v46 = vpop.f32.mrf.mxu3 }
  0xef   : > { %v1860_v45 = vadd.f32 %v715_v41, %v597_v44  ;;  %v722_v61 = vpop.f32.mrf.mxu0 }
  0xf2   : > { %v457_v47 = vpop.f32.mrf.mxu2 }
  0xf3   : > { %v472_v48 = vadd.f32 %v457_v47, %v376_v27 }
  0xf4   : > { %v792_v50 = vpop.f32.mrf.mxu1 }
  0xf5   : > { %v598_v51 = vadd.f32 %v583_v8, %v472_v48  ;;  %v588_v52 = vpop.f32.mrf.mxu3  ;;  %v817_v7 = vadd.f32 %v792_v50, %v1842_v58 }
  0xf7   : > { %v1862_v2 = vadd.f32 %v717_v14, %v598_v51  ;;  %v1144_v54 = vpop.f32.mrf.mxu0 }
  0xfa   : > { %v460_v53 = vpop.f32.mrf.mxu2 }
  0xfb   : > { %v473_v30 = vadd.f32 %v460_v53, %v379_v36 }
  0xfc   : > { %v794_v57 = vpop.f32.mrf.mxu1 }
  0xfd   : > { %v599_v55 = vadd.f32 %v586_v46, %v473_v30  ;;  %v1052_v56 = vpop.f32.mrf.mxu3  ;;  %v818_v15 = vadd.f32 %v794_v57, %v1847_v3 }
  0xff   : > { %v1864_v59 = vadd.f32 %v720_v40, %v599_v55  ;;  %v1146_v63 = vpop.f32.mrf.mxu0 }
 0x102   : > { %v462_v28 = vpop.f32.mrf.mxu2 }
 0x103   : > { %v474_v39 = vadd.f32 %v462_v28, %v381_v37 }
 0x104   : > { %v797_v10 = vpop.f32.mrf.mxu1 }
 0x105   : > { %v600_v60 = vadd.f32 %v588_v52, %v474_v39  ;;  %v1054_v62 = vpop.f32.mrf.mxu3  ;;  %v819_v23 = vadd.f32 %v797_v10, %v1850_v16 }
 0x107   : > { %v1866_v25 = vadd.f32 %v722_v61, %v600_v60  ;;  %v1149_v13 = vpop.f32.mrf.mxu0 }
 0x10a   : > { %v918_v49 = vpop.f32.mrf.mxu2 }
 0x10b   : > { %v943_v1 = vadd.f32 %v918_v49, %v817_v7 }
 0x10c   : > { %v799_v18 = vpop.f32.mrf.mxu1 }
 0x10d   : > { %v1077_v4 = vadd.f32 %v1052_v56, %v943_v1  ;;  %v1057_v6 = vpop.f32.mrf.mxu3  ;;  %v820_v35 = vadd.f32 %v799_v18, %v1852_v22 }
 0x10f   : > { %v1169_v12 = vadd.f32 %v1144_v54, %v1077_v4  ;;  %v1151_v26 = vpop.f32.mrf.mxu0 }
 0x111   : > { %v1183_v17 = vadd.f32 %v1872_v5, %v1169_v12 }
 0x112   : > { %v920_v19 = vpop.f32.mrf.mxu2 }
 0x113   : > { %v1193_v0 = vmax.f32 %v1183_v17, 0.0  ;;  %v944_v58 = vadd.f32 %v920_v19, %v818_v15 }
 0x114   : > { %v802_v14 = vpop.f32.mrf.mxu1 }
 0x115   : > { %v1203_v20 = vpack.c.bf16 %v1193_v0, %v1193_v0  ;;  %v1078_v21 = vadd.f32 %v1054_v62, %v944_v58  ;;  %v1059_v3 = vpop.f32.mrf.mxu3  ;;  %v821_v47 = vadd.f32 %v802_v14, %v1854_v31 }
 0x117   : > { %1214 = vst.msk [vmem:[%s1880_s7] sm:$0xf] %vm1213_vm7, %v1203_v20  ;;  %v1170_v41 = vadd.f32 %v1146_v63, %v1078_v21  ;;  %v1154_v42 = vpop.f32.mrf.mxu0 }
 0x119   : > { %v1184_v24 = vadd.f32 %v1872_v5, %v1170_v41 }
 0x11a   : > { %v923_v11 = vpop.f32.mrf.mxu2 }
 0x11b   : > { %v1194_v27 = vmax.f32 %v1184_v24, 0.0  ;;  %v945_v29 = vadd.f32 %v923_v11, %v819_v23 }
 0x11c   : > { %v804_v37 = vpop.f32.mrf.mxu1 }
 0x11d   : > { %v1204_v32 = vpack.c.bf16 %v1194_v27, %v1194_v27  ;;  %v1079_v33 = vadd.f32 %v1057_v6, %v945_v29  ;;  %v1062_v40 = vpop.f32.mrf.mxu3  ;;  %v822_v56 = vadd.f32 %v804_v37, %v1857_v38 }
 0x11f   : > { %1215 = vst.msk [vmem:[%s1880_s7 + $0x4] sm:$0xf] %vm1213_vm7, %v1204_v32  ;;  %v1171_v34 = vadd.f32 %v1149_v13, %v1079_v33  ;;  %v1156_v30 = vpop.f32.mrf.mxu0 }
 0x121   : > { %v1185_v36 = vadd.f32 %v1872_v5, %v1171_v34 }
 0x122   : > { %v925_v8 = vpop.f32.mrf.mxu2 }
 0x123   : > { %v1195_v16 = vmax.f32 %v1185_v36, 0.0  ;;  %v946_v9 = vadd.f32 %v925_v8, %v820_v35 }
 0x124   : > { %v807_v55 = vpop.f32.mrf.mxu1 }
 0x125   : > { %v1205_v43 = vpack.c.bf16 %v1195_v16, %v1195_v16  ;;  %v1080_v44 = vadd.f32 %v1059_v3, %v946_v9  ;;  %v1064_v51 = vpop.f32.mrf.mxu3  ;;  %v823_v49 = vadd.f32 %v807_v55, %v1860_v45 }
 0x127   : > { %1216 = vst.msk [vmem:[%s1880_s7 + $0x8] sm:$0xf] %vm1213_vm7, %v1205_v43  ;;  %v1172_v46 = vadd.f32 %v1151_v26, %v1080_v44  ;;  %v1159_v7 = vpop.f32.mrf.mxu0 }
 0x129   : > { %v1186_v61 = vadd.f32 %v1872_v5, %v1172_v46 }
 0x12a   : > { %v928_v48 = vpop.f32.mrf.mxu2 }
 0x12b   : > { %v1196_v22 = vmax.f32 %v1186_v61, 0.0  ;;  %v947_v50 = vadd.f32 %v928_v48, %v821_v47 }
 0x12c   : > { %v809_v4 = vpop.f32.mrf.mxu1 }
 0x12d   : > { %v1206_v52 = vpack.c.bf16 %v1196_v22, %v1196_v22  ;;  %v1081_v53 = vadd.f32 %v1062_v40, %v947_v50  ;;  %v1067_v63 = vpop.f32.mrf.mxu3  ;;  %v824_v19 = vadd.f32 %v809_v4, %v1862_v2 }
 0x12f   : > { %1217 = vst.msk [vmem:[%s1880_s7 + $0xc] sm:$0xf] %vm1213_vm7, %v1206_v52  ;;  %v1173_v54 = vadd.f32 %v1154_v42, %v1081_v53  ;;  %v1161_v58 = vpop.f32.mrf.mxu0 }
 0x131   : > { %v1187_v57 = vadd.f32 %v1872_v5, %v1173_v54 }
 0x132   : > { %v930_v28 = vpop.f32.mrf.mxu2 }
 0x133   : > { %v1197_v31 = vmax.f32 %v1187_v57, 0.0  ;;  %v948_v39 = vadd.f32 %v930_v28, %v822_v56 }
 0x134   : > { %v812_v41 = vpop.f32.mrf.mxu1 }
 0x135   : > { %v1207_v60 = vpack.c.bf16 %v1197_v31, %v1197_v31  ;;  %v1082_v62 = vadd.f32 %v1064_v51, %v948_v39  ;;  %v1069_v18 = vpop.f32.mrf.mxu3  ;;  %v825_v11 = vadd.f32 %v812_v41, %v1864_v59 }
 0x137   : > { %1218 = vst.msk [vmem:[%s1880_s7 + $0x10] sm:$0xf] %vm1213_vm7, %v1207_v60  ;;  %v1174_v10 = vadd.f32 %v1156_v30, %v1082_v62  ;;  %v1164_v32 = vpop.f32.mrf.mxu0 }
 0x139   : > { %v1188_v1 = vadd.f32 %v1872_v5, %v1174_v10 }
 0x13a   : > { %v933_v6 = vpop.f32.mrf.mxu2 }
 0x13b   : > { %v1198_v38 = vmax.f32 %v1188_v1, 0.0  ;;  %v949_v12 = vadd.f32 %v933_v6, %v823_v49 }
 0x13c   : > { %v814_v35 = vpop.f32.mrf.mxu1 }
 0x13d   : > { %v1208_v13 = vpack.c.bf16 %v1198_v38, %v1198_v38  ;;  %v1083_v15 = vadd.f32 %v1067_v63, %v949_v12  ;;  %v1072_v27 = vpop.f32.mrf.mxu3  ;;  %v826_v8 = vadd.f32 %v814_v35, %v1866_v25 }
 0x13f   : > { %1219 = vst.msk [vmem:[%s1880_s7 + $0x14] sm:$0xf] %vm1213_vm7, %v1208_v13  ;;  %v1175_v17 = vadd.f32 %v1159_v7, %v1083_v15  ;;  %v1166_v37 = vpop.f32.mrf.mxu0 }
 0x141   : > { %v1189_v0 = vadd.f32 %v1872_v5, %v1175_v17 }
 0x142   : > { %v935_v20 = vpop.f32.mrf.mxu2 }
 0x143   : > { %v1199_v45 = vmax.f32 %v1189_v0, 0.0  ;;  %v950_v21 = vadd.f32 %v935_v20, %v824_v19 }
 0x145   : > { %v1209_v3 = vpack.c.bf16 %v1199_v45, %v1199_v45  ;;  %v1084_v23 = vadd.f32 %v1069_v18, %v950_v21  ;;  %v1074_v42 = vpop.f32.mrf.mxu3 }
 0x147   : > { %1220 = vst.msk [vmem:[%s1880_s7 + $0x18] sm:$0xf] %vm1213_vm7, %v1209_v3  ;;  %v1176_v24 = vadd.f32 %v1161_v58, %v1084_v23 }
 0x149   : > { %v1190_v26 = vadd.f32 %v1872_v5, %v1176_v24 }
 0x14a   : > { %v938_v29 = vpop.f32.mrf.mxu2 }
 0x14b   : > { %v1200_v2 = vmax.f32 %v1190_v26, 0.0  ;;  %v951_v14 = vadd.f32 %v938_v29, %v825_v11 }
 0x14d   : > { %v1210_v33 = vpack.c.bf16 %v1200_v2, %v1200_v2  ;;  %v1085_v34 = vadd.f32 %v1072_v27, %v951_v14 }
 0x14f   : > { %1221 = vst.msk [vmem:[%s1880_s7 + $0x1c] sm:$0xf] %vm1213_vm7, %v1210_v33  ;;  %v1177_v36 = vadd.f32 %v1164_v32, %v1085_v34 }
 0x151   : > { %v1191_v40 = vadd.f32 %v1872_v5, %v1177_v36 }
 0x152   : > { %v940_v59 = vpop.f32.mrf.mxu2 }
 0x153   : > { %v1201_v16 = vmax.f32 %v1191_v40, 0.0  ;;  %v952_v9 = vadd.f32 %v940_v59, %v826_v8 }
 0x155   : > { %v1211_v43 = vpack.c.bf16 %v1201_v16, %v1201_v16  ;;  %v1086_v44 = vadd.f32 %v1074_v42, %v952_v9 }
 0x157   : > { %1222 = vst.msk [vmem:[%s1880_s7 + $0x20] sm:$0xf] %vm1213_vm7, %v1211_v43  ;;  %v1178_v46 = vadd.f32 %v1166_v37, %v1086_v44 }
 0x159   : > { %v1192_v47 = vadd.f32 %v1872_v5, %v1178_v46 }
 0x15b   : > { %v1202_v61 = vmax.f32 %v1192_v47, 0.0 }
 0x15d   : > { %v1212_v48 = vpack.c.bf16 %v1202_v61, %v1202_v61 }
 0x15f   : > { %1223 = vst.msk [vmem:[%s1880_s7 + $0x24] sm:$0xf] %vm1213_vm7, %v1212_v48 }
 0x160 PF: > { %s13_s12 = sadd.s32 1, %s1545_s12  }
 0x161   : > { %p10_p4 = scmp.ge.s32.totalorder %s13_s12, 4  }
 0x163   :  { %12 = sbr.rel (!%p10_p4) target bundleno = 1 (0x1), region = 70 }

// kernel: deep_transfer_forward.9
= control target key start
LH: loop header
LB: loop body
LE: loop exit
PB: predicated region body
PF: predicated region fallthrough
CT: control target
= control target key end

     0   :  { %s1180_s12 = smov 0   ;;  %s1379_s0 = inlined_call_operand.vmem [shape: bf16[2,2,60,32], index: 0, kind: input, shape index: {}]   ;;  %s1380_s1 = inlined_call_operand.vmem [shape: bf16[9,32,64], index: 1, kind: input, shape index: {}]   ;;  %s1381_s2 = inlined_call_operand.vmem [shape: f32[1,64], index: 2, kind: input, shape index: {}]   ;;  %s1382_s3 = inlined_call_operand.vmem [shape: bf16[2,40,64], index: 3, kind: output, shape index: {}]  }
   0x1 LB: > { %s921_s13 = sadd.s32 4294967295, %s1158_s12   ;;  %p925_p0 = scmp.ge.s32.totalorder %s1158_s12, 1  ;;  %s1158_s12 = sphi %s1180_s12, %s13_s12  }
   0x2   : > { %p137_p1 = scmp.lt.s32.totalorder %s1158_s12, 3 }
   0x4   : > { %p138_p2 = pnand %p925_p0, %p137_p1 }
   0x5   : > { %p161_p3 = scmp.lt.s32.totalorder (!%p138_p2), %s921_s13, 1 }
   0x6   : > { %141 = sbr.rel (%p138_p2) target bundleno = 267 (0x10b), region = 32 }
   0xb   : > { %v1103_v0 = vld [vmem:[%s1380_s1 + $0x18] sm:$0xff]  ;;  %v1102_v2 = vld [vmem:[%s1380_s1 + $0x10] sm:$0xff]  ;;  %s1384_s13 = smov (!%p161_p3, %s921_s13), 1  ;;  %v1105_v3 = vld [vmem:[%s1380_s1 + $0x28] sm:$0xff]  ;;  %vm238_vm0 = vcmask 261120   ;;  %vm323_vm2 = vcmask 1046528  }
   0xc   : > { %v1109_v1 = vld [vmem:[%s1380_s1 + $0x38] sm:$0xff]  ;;  %1138 = vmatpush.bf16.msra.mxu1 %v1103_v0  ;;  %1139 = vmatpush.bf16.msra.mxu2 %v1103_v0  ;;  %s1098_s22 = sshll.u32 %s1384_s13, 6  ;;  %v1101_v4 = vld [vmem:[%s1380_s1 + $0x8] sm:$0xff]  ;;  %v1108_v5 = vld [vmem:[%s1380_s1 + $0x30] sm:$0xff]  ;;  %vm202_vm1 = vsmask.f32 7424 }
   0xd   : > { %254 = vmatpush.bf16.msra.mxu0 %v1103_v0  ;;  %429 = vmatpush.bf16.msra.mxu3 %v1109_v1  ;;  %s1212_s29 = scalar_lea.vmem %s1379_s0, %s1098_s22  ;;  %v1113_v6 = vld [vmem:[%s1380_s1 + $0x48] sm:$0xff]  ;;  %v1120_v7 = vld [vmem:[%s1380_s1 + $0x78] sm:$0xff]  ;;  %v1104_v14 = vld [vmem:[%s1380_s1 + $0x20] sm:$0xff]  ;;  %vm701_vm3 = vsmask.f32 6400  ;;  %vm786_vm4 = vcmask 1045504  }
   0xe   : > { %v1221_v8 = vld [vmem:[%s1212_s29 + $0x8] sm:$0xff]  ;;  %v1224_v9 = vld [vmem:[%s1212_s29 + $0x10] sm:$0xff]   ;;  %v1231_v13 = vld [vmem:[%s1212_s29] sm:$0xff]   ;;  %s1142_s4 = smul.u32 20, %s1384_s13  ;;  %vm860_vm5 = vcmask 519168  }
   0xf   : > { %v181_v10 = vld [vmem:[%s1212_s29 + $0x14] sm:$0x1]  ;;  %v1228_v11 = vunpack.c.l.b16 %v1224_v9  ;;  %v1106_v15 = vld [vmem:[%s1212_s29 + $0x20] sm:$0xff]  ;;  %v211_v16 = vshll.u32 %v1221_v8, 16  ;;  %v215_v17 = vshrl.u32 %v1221_v8, 16  ;;  %v204_v18 = vshrl.u32 %v1231_v13, 16 }
  0x10   : > { %1140 = vmatpush.bf16.msra.mxu1 %v1102_v2  ;;  %1141 = vmatpush.bf16.msra.mxu2 %v1102_v2  ;;  %v198_v12 = vunpack.c.l.b16 %v181_v10  ;;  %v206_v19 = vshll.u32 %v1231_v13, 16  ;;  %v1100_v20 = vld [vmem:[%s1380_s1] sm:$0xff]  ;;  %v1122_v29 = vld [vmem:[%s1380_s1 + $0x88] sm:$0xff]  ;;  %v1115_v32 = vld [vmem:[%s1380_s1 + $0x58] sm:$0xff]  ;;  %v325_v52 = vrot.slane %v1221_v8, 1  ;;  %s1362_s7 = scalar_lea.vmem %s1382_s3, %s1142_s4 }
  0x11   : > { %255 = vmatpush.bf16.msra.mxu0 %v1102_v2  ;;  %430 = vmatpush.bf16.msra.mxu3 %v1108_v5  ;;  %v1112_v22 = vld [vmem:[%s1380_s1 + $0x40] sm:$0xff]  ;;  %v213_v23 = vrot.slane %v211_v16, 1  ;;  %v1118_v34 = vld [vmem:[%s1380_s1 + $0x68] sm:$0xff]  ;;  %v1119_v39 = vld [vmem:[%s1380_s1 + $0x70] sm:$0xff] }
  0x12   : > { %v1245_v21 = vpack.c.b16 %v198_v12, %v1228_v11  ;;  %v208_v24 = vrot.slane %v206_v19, 1  ;;  %v1134_v31 = vld [vmem:[%s1212_s29 + $0x20] sm:$0xff]   ;;  %v1268_v37 = vld [vmem:[%s1212_s29 + $0x28] sm:$0xff]  ;;  %v1114_v41 = vld [vmem:[%s1380_s1 + $0x50] sm:$0xff] }
  0x13   : > { %v217_v27 = vor.u32 %v215_v17, %v213_v23  ;;  %v480_v38 = vshll.u32 %v1134_v31, 16  ;;  %v1117_v40 = vld [vmem:[%s1380_s1 + $0x60] sm:$0xff]  ;;  %v478_v44 = vshrl.u32 %v1134_v31, 16  ;;  %v485_v46 = vshll.u32 %v1268_v37, 16  ;;  %v1107_v48 = vld [vmem:[%s1212_s29 + $0x28] sm:$0xff] }
  0x14   : > { %356 = vmatpush.bf16.msrb.mxu2 %v1105_v3  ;;  %297 = vmatpush.bf16.msrb.mxu1 %v1101_v4  ;;  %v219_v25 = vshll.u32 %v1245_v21, 16  ;;  %v223_v26 = vshrl.u32 %v1245_v21, 16  ;;  %v209_v28 = vor.u32 %v208_v24, %v204_v18  ;;  %v1131_v42 = vld [vmem:[%s1212_s29] sm:$0xf0]  ;;  %v1132_v43 = vld [vmem:[%s1212_s29] sm:$0xe] }
  0x15   : > { %527 = vmatpush.bf16.msrb.mxu0 %v1113_v6  ;;  %755 = vmatpush.bf16.msrb.mxu3 %v1120_v7  ;;  %v482_v45 = vrot.slane %v480_v38, 1  ;;  %v1133_v47 = vor.u32 %v1132_v43, %v1131_v42  ;;  %v487_v50 = vrot.slane %v485_v46, 1  ;;  %v1018_v54 = vld [vmem:[%s1212_s29 + $0x30] sm:$0xf]  ;;  %v1111_v55 = vld [vmem:[%s1212_s29 + $0x30] sm:$0x10] }
  0x16   : > { %999 = vmatmul.msk.bf16.vlgmr.msra.gmra.mxu3 %vm238_vm0, %v1106_v15  ;;  %v221_v30 = vrot.slane %v219_v25, 1  ;;  %v214_v33 = vsel %vm202_vm1, %v209_v28, %v213_v23  ;;  %v1291_v57 = vor.u32 %v1111_v55, %v1018_v54  ;;  %v978_v58 = vld [vmem:[%s1212_s29 + $0x30] sm:$0xf]  ;;  %v1121_v59 = vld [vmem:[%s1380_s1 + $0x80] sm:$0xff]  ;;  %v613_v61 = vld [vmem:[%s1212_s29 + $0x8] sm:$0xf]  ;;  %v633_v25 = vunpack.c.h.b16 %v1224_v9 }
  0x17   : > { %945 = vmatmul.msk.bf16.vlgmr.msra.gmra.mxu0 %vm238_vm0, %v214_v33  ;;  %v483_v49 = vor.u32 %v482_v45, %v478_v44  ;;  %v324_v51 = vrot.slane %v1133_v47, 1  ;;  %v612_v60 = vld [vmem:[%s1212_s29 + $0x4] sm:$0xe]  ;;  %v489_v62 = vshrl.u32 %v1268_v37, 16  ;;  %v398_v0 = vunpack.c.l.b16 %v978_v58  ;;  %v1305_v6 = vld [vmem:[%s1212_s29 + $0xc] sm:$0xff] }
  0x18   : > { %357 = vmatpush.bf16.msrb.mxu2 %v1104_v14  ;;  %298 = vmatpush.bf16.msrb.mxu1 %v1100_v20  ;;  %v222_v35 = vsel %vm202_vm1, %v217_v27, %v221_v30  ;;  %v225_v36 = vor.u32 %v223_v26, %v221_v30  ;;  %v493_v63 = vshll.u32 %v1291_v57, 16  ;;  %v629_v1 = vunpack.c.l.b16 %v612_v60  ;;  %v1135_v43 = vld [vmem:[%s1212_s29 + $0x20] sm:$0xf0] }
  0x19   : > { %528 = vmatpush.bf16.msrb.mxu0 %v1112_v22  ;;  %946 = vmatmul.msk.bf16.vlgmr.msra.gmra.mxu1 %vm238_vm0, %v222_v35  ;;  %v488_v53 = vsel %vm202_vm1, %v483_v49, %v487_v50  ;;  %v326_v56 = vsel %vm323_vm2, %v324_v51, %v325_v52  ;;  %v630_v2 = vunpack.c.l.b16 %v613_v61  ;;  %v491_v3 = vor.u32 %v489_v62, %v487_v50  ;;  %v692_v22 = vld [vmem:[%s1212_s29 + $0x18] sm:$0x3]  ;;  %v777_v35 = vld [vmem:[%s1212_s29 + $0x4] sm:$0xc] }
  0x1a   : > { %947 = vmatmul.msk.bf16.vlgmr.msra.gmra.mxu2 %vm238_vm0, %v225_v36  ;;  %756 = vmatpush.bf16.msrb.mxu3 %v1119_v39  ;;  %v495_v4 = vrot.slane %v493_v63, 1  ;;  %v401_v5 = vpack.c.b16 %v398_v0, %v398_v0  ;;  %v327_v10 = vrot.slane %v1245_v21, 1  ;;  %v711_v15 = vshrl.u32 %v1305_v6, 16 }
  0x1b   : > { %v635_v7 = vpack.c.b16 %v630_v2, %v629_v1  ;;  %v714_v16 = vshll.u32 %v1305_v6, 16  ;;  %v699_v26 = vunpack.c.l.b16 %v692_v22  ;;  %v497_v27 = vshrl.u32 %v1291_v57, 16 }
  0x1c   : > { %590 = vmatpush.bf16.msra.mxu1 %v1115_v32  ;;  %670 = vmatpush.bf16.msra.mxu2 %v1118_v34  ;;  %v496_v12 = vsel %vm202_vm1, %v491_v3, %v495_v4  ;;  %v328_v17 = vsel %vm323_vm2, %v325_v52, %v327_v10  ;;  %v713_v20 = vrot.slane %v711_v15, 1  ;;  %v271_v32 = vpack.c.b16 %v1228_v11, %v1228_v11  ;;  %v1136_v11 = vld [vmem:[%s1212_s29 + $0x20] sm:$0xe] }
  0x1d   : > { %819 = vmatpush.bf16.msra.mxu0 %v1122_v29  ;;  %v706_v14 = vshll.u32 %v635_v7, 16  ;;  %v716_v21 = vrot.slane %v714_v16, 2  ;;  %v700_v29 = vpack.c.b16 %v699_v26, %v633_v25  ;;  %v499_v31 = vor.u32 %v497_v27, %v495_v4 }
  0x1e   : > { %v639_v36 = vrot.slane %v1305_v6, 1  ;;  %v784_v39 = vunpack.c.l.b16 %v777_v35  ;;  %v1137_v46 = vor.u32 %v1136_v11, %v1135_v43  ;;  %v559_v51 = vrot.slane %v1268_v37, 1 }
  0x1f   : > { %v708_v19 = vrot.slane %v706_v14, 2  ;;  %v717_v24 = vor.u32 %v716_v21, %v713_v20  ;;  %v720_v33 = vshrl.u32 %v700_v29, 16  ;;  %v723_v34 = vshll.u32 %v700_v29, 16 }
  0x20   : > { %591 = vmatpush.bf16.msra.mxu1 %v1114_v41  ;;  %671 = vmatpush.bf16.msra.mxu2 %v1117_v40  ;;  %v785_v44 = vpack.c.b16 %v630_v2, %v784_v39  ;;  %v558_v50 = vrot.slane %v1137_v46, 1  ;;  %v638_v52 = vrot.slane %v635_v7, 1  ;;  %v561_v58 = vrot.slane %v1291_v57, 1 }
  0x21   : > { %820 = vmatpush.bf16.msra.mxu0 %v1121_v59  ;;  %v722_v40 = vrot.slane %v720_v33, 1  ;;  %v725_v41 = vrot.slane %v723_v34, 2 }
  0x22   : > { %v787_v47 = vrot.slane %v785_v44, 2  ;;  %v560_v54 = vsel %vm323_vm2, %v558_v50, %v559_v51  ;;  %v640_v55 = vsel %vm323_vm2, %v638_v52, %v639_v36  ;;  %v562_v59 = vsel %vm323_vm2, %v559_v51, %v561_v58 }
  0x23   : > { %v726_v45 = vor.u32 %v725_v41, %v722_v40 }
  0x25   : > { %v727_v49 = vsel %vm701_vm3, %v717_v24, %v726_v45 }
  0x26   : > { %1000 = vmatmul.msk.bf16.gmra.mxu3 %vm238_vm0, %v1107_v48  ;;  %v788_v48 = vrot.slane %v1305_v6, 2 }
  0x27   : > { %1028 = vmatmul.msk.bf16.vlgmr.msrb.gmra.mxu0 %vm238_vm0, %v488_v53 }
  0x28   : > { %v789_v53 = vsel %vm786_vm4, %v787_v47, %v788_v48 }
  0x29   : > { %956 = vmatmul.msk.bf16.vlgmr.msrb.gmra.mxu1 %vm238_vm0, %v1231_v13  ;;  %v703_v13 = vshrl.u32 %v635_v7, 16 }
  0x2a   : > { %971 = vmatmul.msk.bf16.vlgmr.msrb.gmra.mxu2 %vm238_vm0, %v326_v56  ;;  %v790_v56 = vrot.slane %v700_v29, 2 }
  0x2b   : > { %v705_v18 = vrot.slane %v703_v13, 1 }
  0x2c   : > { %v791_v37 = vsel %vm786_vm4, %v788_v48, %v790_v56 }
  0x2d   : > { %v709_v23 = vor.u32 %v708_v19, %v705_v18 }
  0x2f   : > { %v718_v28 = vsel %vm701_vm3, %v709_v23, %v717_v24 }
  0x36   : > { %1001 = vmatmul.msk.bf16.gmra.mxu3 %vm238_vm0, %v401_v5 }
  0x37   : > { %1029 = vmatmul.msk.bf16.gmra.mxu0 %vm238_vm0, %v496_v12 }
  0x39   : > { %957 = vmatmul.msk.bf16.gmra.mxu1 %vm238_vm0, %v1221_v8  ;;  %v617_v8 = vld [vmem:[%s1212_s29 + $0x18] sm:$0x1] }
  0x3a   : > { %972 = vmatmul.msk.bf16.gmra.mxu2 %vm238_vm0, %v328_v17  ;;  %v634_v30 = vunpack.c.l.b16 %v617_v8 }
  0x3c   : > { %v637_v9 = vpack.c.b16 %v634_v30, %v633_v25 }
  0x3e   : > { %v641_v38 = vrot.slane %v637_v9, 1 }
  0x40   : > { %v642_v42 = vsel %vm323_vm2, %v639_v36, %v641_v38 }
  0x46   : > { %1078 = vmatmul.msk.bf16.vlgmr.msrb.gmra.mxu3 %vm238_vm0, %v718_v28 }
  0x47   : > { %1030 = vmatmul.msk.bf16.gmra.mxu0 %vm238_vm0, %v499_v31 }
  0x49   : > { %958 = vmatmul.msk.bf16.gmra.mxu1 %vm238_vm0, %v271_v32 }
  0x4a   : > { %973 = vmatmul.msk.bf16.gmra.mxu2 %vm238_vm0, %v327_v10 }
  0x56   : > { %1079 = vmatmul.msk.bf16.gmra.mxu3 %vm238_vm0, %v727_v49 }
  0x57   : > { %1093 = vmatmul.msk.bf16.vlgmr.msra.gmra.mxu0 %vm238_vm0, %v789_v53 }
  0x59   : > { %1044 = vmatmul.msk.bf16.vlgmr.msra.gmra.mxu1 %vm238_vm0, %v560_v54  ;;  %v1151_v54 = vld [vmem:[%s1381_s2] ss:$0 sm:$0xff] }
  0x5a   : > { %1063 = vmatmul.msk.bf16.vlgmr.msra.gmra.mxu2 %vm238_vm0, %v640_v55 }
  0x66   : > { %1080 = vmatmul.msk.bf16.gmra.mxu3 %vm238_vm0, %v726_v45 }
  0x67   : > { %1094 = vmatmul.msk.bf16.gmra.mxu0 %vm238_vm0, %v791_v37 }
  0x69   : > { %1045 = vmatmul.msk.bf16.gmra.mxu1 %vm238_vm0, %v562_v59 }
  0x6a   : > { %1064 = vmatmul.msk.bf16.gmra.mxu2 %vm238_vm0, %v642_v42 }
  0x77   : > { %1095 = vmatmul.msk.bf16.gmra.mxu0 %vm238_vm0, %v790_v56 }
  0x79   : > { %1046 = vmatmul.msk.bf16.gmra.mxu1 %vm238_vm0, %v561_v58 }
  0x7a   : > { %1065 = vmatmul.msk.bf16.gmra.mxu2 %vm238_vm0, %v641_v38 }
  0x94   : > { %v257_v60 = vpop.f32.mrf.mxu0 }
  0x96   : > { %v262_v61 = vpop.f32.mrf.mxu1 }
  0x99   : > { %v432_v57 = vpop.f32.mrf.mxu3 }
  0x9c   : > { %v259_v63 = vpop.f32.mrf.mxu0 }
  0x9d   : > { %v267_v62 = vpop.f32.mrf.mxu2 }
  0x9e   : > { %v264_v0 = vpop.f32.mrf.mxu1 }
  0xa1   : > { %v434_v1 = vpop.f32.mrf.mxu3 }
  0xa4   : > { %v530_v3 = vpop.f32.mrf.mxu0 }
  0xa5   : > { %v269_v2 = vpop.f32.mrf.mxu2 }
  0xa6   : > { %v300_v4 = vpop.f32.mrf.mxu1 }
  0xa7   : > { %v301_v35 = vadd.f32 %v300_v4, %v257_v60 }
  0xa9   : > { %v437_v5 = vpop.f32.mrf.mxu3 }
  0xac   : > { %v532_v7 = vpop.f32.mrf.mxu0 }
  0xad   : > { %v359_v6 = vpop.f32.mrf.mxu2 }
  0xae   : > { %v302_v10 = vpop.f32.mrf.mxu1  ;;  %v373_v38 = vadd.f32 %v359_v6, %v301_v35 }
  0xaf   : > { %v303_v11 = vadd.f32 %v302_v10, %v259_v63 }
  0xb0   : > { %v446_v41 = vadd.f32 %v432_v57, %v373_v38 }
  0xb1   : > { %v439_v12 = vpop.f32.mrf.mxu3 }
  0xb2   : > { %v544_v45 = vadd.f32 %v530_v3, %v446_v41 }
  0xb4   : > { %v535_v14 = vpop.f32.mrf.mxu0 }
  0xb5   : > { %v361_v13 = vpop.f32.mrf.mxu2 }
  0xb6   : > { %v305_v15 = vpop.f32.mrf.mxu1  ;;  %v374_v44 = vadd.f32 %v361_v13, %v303_v11 }
  0xb7   : > { %v306_v17 = vadd.f32 %v305_v15, %v262_v61 }
  0xb8   : > { %v447_v49 = vadd.f32 %v434_v1, %v374_v44 }
  0xb9   : > { %v442_v16 = vpop.f32.mrf.mxu3 }
  0xba   : > { %v545_v56 = vadd.f32 %v532_v7, %v447_v49 }
  0xbc   : > { %v1351_v19 = vpop.f32.mrf.mxu0 }
  0xbd   : > { %v364_v18 = vpop.f32.mrf.mxu2 }
  0xbe   : > { %v375_v20 = vadd.f32 %v364_v18, %v306_v17  ;;  %v307_v21 = vpop.f32.mrf.mxu1 }
  0xbf   : > { %v308_v24 = vadd.f32 %v307_v21, %v264_v0 }
  0xc0   : > { %v448_v23 = vadd.f32 %v437_v5, %v375_v20 }
  0xc1   : > { %v444_v22 = vpop.f32.mrf.mxu3 }
  0xc2   : > { %v546_v3 = vadd.f32 %v535_v14, %v448_v23 }
  0xc4   : > { %v1353_v26 = vpop.f32.mrf.mxu0 }
  0xc5   : > { %v366_v25 = vpop.f32.mrf.mxu2 }
  0xc6   : > { %v376_v27 = vadd.f32 %v366_v25, %v308_v24  ;;  %v310_v28 = vpop.f32.mrf.mxu1 }
  0xc7   : > { %v311_v30 = vadd.f32 %v310_v28, %v267_v62 }
  0xc8   : > { %v449_v8 = vadd.f32 %v439_v12, %v376_v27 }
  0xc9   : > { %v758_v29 = vpop.f32.mrf.mxu3 }
  0xca   : > { %v547_v20 = vadd.f32 %v1351_v19, %v449_v8 }
  0xcc   : > { %v542_v32 = vpop.f32.mrf.mxu0 }
  0xcd   : > { %v369_v31 = vpop.f32.mrf.mxu2 }
  0xce   : > { %v377_v33 = vadd.f32 %v369_v31, %v311_v30  ;;  %v312_v34 = vpop.f32.mrf.mxu1 }
  0xd0   : > { %v450_v36 = vadd.f32 %v442_v16, %v377_v33 }
  0xd1   : > { %v760_v9 = vpop.f32.mrf.mxu3 }
  0xd2   : > { %v548_v31 = vadd.f32 %v1353_v26, %v450_v36 }
  0xd4   : > { %v822_v40 = vpop.f32.mrf.mxu0 }
  0xd5   : > { %v371_v39 = vpop.f32.mrf.mxu2 }
  0xd6   : > { %v593_v42 = vpop.f32.mrf.mxu1 }
  0xd7   : > { %v607_v46 = vadd.f32 %v593_v42, %v544_v45 }
  0xd9   : > { %v763_v43 = vpop.f32.mrf.mxu3 }
  0xdc   : > { %v824_v48 = vpop.f32.mrf.mxu0 }
  0xdd   : > { %v673_v47 = vpop.f32.mrf.mxu2 }
  0xde   : > { %v687_v50 = vadd.f32 %v673_v47, %v607_v46  ;;  %v595_v51 = vpop.f32.mrf.mxu1 }
  0xdf   : > { %v608_v37 = vadd.f32 %v595_v51, %v545_v56 }
  0xe0   : > { %v772_v53 = vadd.f32 %v758_v29, %v687_v50 }
  0xe1   : > { %v765_v52 = vpop.f32.mrf.mxu3 }
  0xe2   : > { %v836_v55 = vadd.f32 %v822_v40, %v772_v53 }
  0xe4   : > { %v845_v58 = vadd.f32 %v1151_v54, %v836_v55  ;;  %v827_v60 = vpop.f32.mrf.mxu0 }
  0xe5   : > { %v675_v59 = vpop.f32.mrf.mxu2 }
  0xe6   : > { %v850_v61 = vmax.f32 %v845_v58, 0.0  ;;  %v688_v57 = vadd.f32 %v675_v59, %v608_v37  ;;  %v598_v62 = vpop.f32.mrf.mxu1 }
  0xe7   : > { %v609_v5 = vadd.f32 %v598_v62, %v546_v3 }
  0xe8   : > { %v855_v0 = vpack.c.bf16 %v850_v61, %v850_v61  ;;  %v773_v1 = vadd.f32 %v760_v9, %v688_v57 }
  0xe9   : > { %v768_v63 = vpop.f32.mrf.mxu3 }
  0xea   : > { %861 = vst.msk [vmem:[%s1362_s7] sm:$0xf] %vm860_vm5, %v855_v0  ;;  %v837_v2 = vadd.f32 %v824_v48, %v773_v1 }
  0xec   : > { %v846_v4 = vadd.f32 %v1151_v54, %v837_v2  ;;  %v829_v7 = vpop.f32.mrf.mxu0 }
  0xed   : > { %v678_v6 = vpop.f32.mrf.mxu2 }
  0xee   : > { %v851_v10 = vmax.f32 %v846_v4, 0.0  ;;  %v689_v12 = vadd.f32 %v678_v6, %v609_v5  ;;  %v600_v13 = vpop.f32.mrf.mxu1 }
  0xef   : > { %v610_v22 = vadd.f32 %v600_v13, %v547_v20 }
  0xf0   : > { %v856_v16 = vpack.c.bf16 %v851_v10, %v851_v10  ;;  %v774_v17 = vadd.f32 %v763_v43, %v689_v12 }
  0xf1   : > { %v770_v15 = vpop.f32.mrf.mxu3 }
  0xf2   : > { %862 = vst.msk [vmem:[%s1362_s7 + $0x4] sm:$0xf] %vm860_vm5, %v856_v16  ;;  %v838_v18 = vadd.f32 %v827_v60, %v774_v17 }
  0xf4   : > { %v847_v21 = vadd.f32 %v1151_v54, %v838_v18  ;;  %v832_v14 = vpop.f32.mrf.mxu0 }
  0xf5   : > { %v680_v24 = vpop.f32.mrf.mxu2 }
  0xf6   : > { %v852_v23 = vmax.f32 %v847_v21, 0.0  ;;  %v690_v25 = vadd.f32 %v680_v24, %v610_v22  ;;  %v603_v27 = vpop.f32.mrf.mxu1 }
  0xf7   : > { %v611_v33 = vadd.f32 %v603_v27, %v548_v31 }
  0xf8   : > { %v857_v28 = vpack.c.bf16 %v852_v23, %v852_v23  ;;  %v775_v29 = vadd.f32 %v765_v52, %v690_v25 }
  0xfa   : > { %863 = vst.msk [vmem:[%s1362_s7 + $0x8] sm:$0xf] %vm860_vm5, %v857_v28  ;;  %v839_v30 = vadd.f32 %v829_v7, %v775_v29 }
  0xfc   : > { %v848_v32 = vadd.f32 %v1151_v54, %v839_v30  ;;  %v834_v19 = vpop.f32.mrf.mxu0 }
  0xfd   : > { %v683_v34 = vpop.f32.mrf.mxu2 }
  0xfe   : > { %v853_v8 = vmax.f32 %v848_v32, 0.0  ;;  %v691_v9 = vadd.f32 %v683_v34, %v611_v33  ;;  %v605_v35 = vpop.f32.mrf.mxu1 }
 0x100   : > { %v858_v38 = vpack.c.bf16 %v853_v8, %v853_v8  ;;  %v776_v39 = vadd.f32 %v768_v63, %v691_v9 }
 0x102   : > { %864 = vst.msk [vmem:[%s1362_s7 + $0xc] sm:$0xf] %vm860_vm5, %v858_v38  ;;  %v840_v40 = vadd.f32 %v832_v14, %v776_v39 }
 0x104   : > { %v849_v41 = vadd.f32 %v1151_v54, %v840_v40 }
 0x105   : > { %v685_v42 = vpop.f32.mrf.mxu2 }
 0x106   : > { %v854_v43 = vmax.f32 %v849_v41, 0.0 }
 0x108   : > { %v859_v11 = vpack.c.bf16 %v854_v43, %v854_v43 }
 0x10a   : > { %865 = vst.msk [vmem:[%s1362_s7 + $0x10] sm:$0xf] %vm860_vm5, %v859_v11 }
 0x10b PF: > { %s13_s12 = sadd.s32 1, %s1158_s12  }
 0x10c   : > { %p10_p4 = scmp.ge.s32.totalorder %s13_s12, 4  }
 0x10e   :  { %12 = sbr.rel (!%p10_p4) target bundleno = 1 (0x1), region = 71 }

// kernel: deep_transfer_forward.10
= control target key start
LH: loop header
LB: loop body
LE: loop exit
PB: predicated region body
PF: predicated region fallthrough
CT: control target
= control target key end

     0   :  { %s1222_s12 = smov 0   ;;  %s1438_s0 = inlined_call_operand.vmem [shape: bf16[2,1,42,64], index: 0, kind: input, shape index: {}]   ;;  %s1439_s1 = inlined_call_operand.vmem [shape: bf16[9,64,64], index: 1, kind: input, shape index: {}]   ;;  %s1440_s2 = inlined_call_operand.vmem [shape: f32[1,64], index: 2, kind: input, shape index: {}]   ;;  %s1441_s3 = inlined_call_operand.vmem [shape: bf16[2,24,64], index: 3, kind: output, shape index: {}]  }
   0x1 LB: > { %s899_s13 = sadd.s32 4294967295, %s1200_s12   ;;  %p903_p0 = scmp.ge.s32.totalorder %s1200_s12, 1  ;;  %s1200_s12 = sphi %s1222_s12, %s13_s12  }
   0x2   : > { %p137_p1 = scmp.lt.s32.totalorder %s1200_s12, 3 }
   0x4   : > { %p138_p2 = pnand %p903_p0, %p137_p1 }
   0x5   : > { %p161_p3 = scmp.lt.s32.totalorder (!%p138_p2), %s899_s13, 1 }
   0x6   : > { %141 = sbr.rel (%p138_p2) target bundleno = 233 (0xe9), region = 32 }
   0xb   : > { %v1141_v0 = vld [vmem:[%s1439_s1 + $0x38] sm:$0xff]  ;;  %v1140_v3 = vld [vmem:[%s1439_s1 + $0x30] sm:$0xff]  ;;  %s1443_s13 = smov (!%p161_p3, %s899_s13), 1  ;;  %v1139_v6 = vld [vmem:[%s1439_s1 + $0x28] sm:$0xff]  ;;  %vm329_vm0 = vcmask 1046528   ;;  %vm243_vm2 = vcmask 523264  }
   0xc   : > { %v1145_v1 = vld [vmem:[%s1439_s1 + $0x58] sm:$0xff]  ;;  %254 = vmatpush.bf16.msra.mxu0 %v1141_v0  ;;  %1179 = vmatpush.bf16.msra.mxu1 %v1141_v0  ;;  %v1144_v4 = vld [vmem:[%s1439_s1 + $0x50] sm:$0xff]  ;;  %s1183_s26 = smul.u32 24, %s1443_s13  ;;  %v1143_v7 = vld [vmem:[%s1439_s1 + $0x48] sm:$0xff]  ;;  %vm203_vm1 = vsmask.f32 7424 }
   0xd   : > { %v1149_v2 = vld [vmem:[%s1439_s1 + $0x78] sm:$0xff]  ;;  %367 = vmatpush.bf16.msra.mxu2 %v1145_v1  ;;  %v1148_v5 = vld [vmem:[%s1439_s1 + $0x70] sm:$0xff]  ;;  %v1147_v8 = vld [vmem:[%s1439_s1 + $0x68] sm:$0xff]  ;;  %vm401_vm3 = vcmask 1044480   ;;  %vm469_vm4 = vsmask.f32 4352 }
   0xe   : > { %439 = vmatpush.bf16.msra.mxu3 %v1149_v2  ;;  %s1263_s8 = scalar_lea.vmem %s1438_s0, %s1183_s26  ;;  %v1138_v22 = vld [vmem:[%s1439_s1 + $0x20] sm:$0xff]  ;;  %v1137_v27 = vld [vmem:[%s1439_s1 + $0x18] sm:$0xff]  ;;  %v1136_v42 = vld [vmem:[%s1439_s1 + $0x10] sm:$0xff]  ;;  %vm623_vm5 = vcmask 1045504   ;;  %vm691_vm6 = vsmask.f32 5376 }
   0xf   : > { %v1266_v9 = vld [vmem:[%s1263_s8] sm:$0xff]   ;;  %v1269_v10 = vld [vmem:[%s1263_s8 + $0x8] sm:$0xff]   ;;  %v1153_v34 = vld [vmem:[%s1439_s1 + $0x98] sm:$0xff]  ;;  %s1184_s18 = smul.u32 12, %s1443_s13  ;;  %vm840_vm7 = vcmask 519168  }
  0x10   : > { %255 = vmatpush.bf16.msra.mxu0 %v1140_v3  ;;  %1180 = vmatpush.bf16.msra.mxu1 %v1140_v3  ;;  %v183_v11 = vld [vmem:[%s1263_s8 + $0xc] sm:$0x1]  ;;  %v1273_v12 = vunpack.c.l.b16 %v1269_v10  ;;  %v205_v14 = vshrl.u32 %v1266_v9, 16  ;;  %v207_v15 = vshll.u32 %v1266_v9, 16  ;;  %v316_v16 = vld [vmem:[%s1263_s8] sm:$0xe]  ;;  %v1280_v18 = vunpack.c.h.b16 %v1266_v9 }
  0x11   : > { %368 = vmatpush.bf16.msra.mxu2 %v1144_v4  ;;  %v200_v13 = vunpack.c.l.b16 %v183_v11  ;;  %v384_v17 = vld [vmem:[%s1263_s8] sm:$0x8]  ;;  %v327_v19 = vunpack.c.l.b16 %v316_v16  ;;  %v385_v20 = vld [vmem:[%s1263_s8 + $0xc] sm:$0x7]  ;;  %v467_v26 = vunpack.c.h.b16 %v1269_v10  ;;  %v1161_v40 = vld [vmem:[%s1439_s1 + $0xd8] sm:$0xff]  ;;  %v479_v53 = vshrl.u32 %v1269_v10, 16  ;;  %s170_s21 = scalar_lea.vmem %s1441_s3, %s1184_s18 }
  0x12   : > { %440 = vmatpush.bf16.msra.mxu3 %v1148_v5  ;;  %v397_v21 = vunpack.c.l.b16 %v384_v17  ;;  %v209_v24 = vrot.slane %v207_v15, 1  ;;  %v398_v25 = vunpack.c.l.b16 %v385_v20  ;;  %v1142_v28 = vld [vmem:[%s1439_s1 + $0x40] sm:$0xff]  ;;  %v1152_v47 = vld [vmem:[%s1439_s1 + $0x90] sm:$0xff]  ;;  %v1165_v48 = vld [vmem:[%s1439_s1 + $0xf8] sm:$0xff]  ;;  %v482_v54 = vshll.u32 %v1269_v10, 16 }
  0x13   : > { %v1287_v23 = vpack.c.b16 %v200_v13, %v1273_v12  ;;  %v328_v29 = vpack.c.b16 %v1280_v18, %v327_v19  ;;  %v1146_v35 = vld [vmem:[%s1439_s1 + $0x60] sm:$0xff]  ;;  %v1160_v50 = vld [vmem:[%s1439_s1 + $0xd0] sm:$0xff]  ;;  %v1135_v55 = vld [vmem:[%s1439_s1 + $0x8] sm:$0xff]  ;;  %v481_v61 = vrot.slane %v479_v53, 3  ;;  %v548_v53 = vpack.c.b16 %v467_v26, %v467_v26 }
  0x14   : > { %256 = vmatpush.bf16.msra.mxu0 %v1139_v6  ;;  %1181 = vmatpush.bf16.msra.mxu1 %v1139_v6  ;;  %v399_v30 = vpack.c.b16 %v1280_v18, %v397_v21  ;;  %v210_v31 = vor.u32 %v209_v24, %v205_v14  ;;  %v1308_v38 = vpack.c.b16 %v398_v25, %v1273_v12  ;;  %v1151_v56 = vld [vmem:[%s1439_s1 + $0x88] sm:$0xff]  ;;  %v1164_v57 = vld [vmem:[%s1439_s1 + $0xf0] sm:$0xff]  ;;  %v484_v62 = vrot.slane %v482_v54, 4  ;;  %v1134_v63 = vld [vmem:[%s1439_s1] sm:$0xff] }
  0x15   : > { %369 = vmatpush.bf16.msra.mxu2 %v1143_v7  ;;  %v212_v32 = vshll.u32 %v1287_v23, 16  ;;  %v216_v33 = vshrl.u32 %v1287_v23, 16  ;;  %v331_v36 = vrot.slane %v1287_v23, 1  ;;  %v330_v37 = vrot.slane %v328_v29, 1  ;;  %v1159_v58 = vld [vmem:[%s1439_s1 + $0xc8] sm:$0xff]  ;;  %v1150_v0 = vld [vmem:[%s1439_s1 + $0x80] sm:$0xff] }
  0x16   : > { %441 = vmatpush.bf16.msra.mxu3 %v1147_v8  ;;  %v402_v39 = vrot.slane %v399_v30, 3  ;;  %v403_v44 = vrot.slane %v1308_v38, 3  ;;  %v471_v51 = vshrl.u32 %v399_v30, 16  ;;  %v474_v52 = vshll.u32 %v399_v30, 16  ;;  %v1157_v1 = vld [vmem:[%s1439_s1 + $0xb8] sm:$0xff]  ;;  %v1163_v3 = vld [vmem:[%s1439_s1 + $0xe8] sm:$0xff] }
  0x17   : > { %v214_v41 = vrot.slane %v212_v32, 1  ;;  %v332_v43 = vsel %vm329_vm0, %v330_v37, %v331_v36  ;;  %v1169_v2 = vld [vmem:[%s1439_s1 + $0x118] sm:$0xff]  ;;  %v600_v4 = vld [vmem:[%s1263_s8 + $0x4] sm:$0xc]  ;;  %v1367_v5 = vld [vmem:[%s1263_s8 + $0x8] sm:$0xff]   ;;  %v485_v8 = vor.u32 %v484_v62, %v481_v61 }
  0x18   : > { %257 = vmatpush.bf16.msra.mxu0 %v1138_v22  ;;  %1182 = vmatpush.bf16.msra.mxu1 %v1138_v22  ;;  %v404_v49 = vsel %vm401_vm3, %v402_v39, %v403_v44  ;;  %v473_v59 = vrot.slane %v471_v51, 3  ;;  %v476_v60 = vrot.slane %v474_v52, 4  ;;  %v678_v6 = vld [vmem:[%s1263_s8 + $0x10] sm:$0x7]  ;;  %v1158_v11 = vld [vmem:[%s1439_s1 + $0xc0] sm:$0xff]  ;;  %v1176_v14 = vunpack.c.l.b16 %v1367_v5  ;;  %v1155_v22 = vld [vmem:[%s1439_s1 + $0xa8] sm:$0xff] }
  0x19   : > { %370 = vmatpush.bf16.msra.mxu2 %v1142_v28  ;;  %v215_v45 = vsel %vm203_vm1, %v210_v31, %v214_v41  ;;  %v218_v46 = vor.u32 %v216_v33, %v214_v41  ;;  %v1156_v13 = vld [vmem:[%s1439_s1 + $0xb0] sm:$0xff]  ;;  %v1177_v15 = vunpack.c.h.b16 %v1367_v5  ;;  %v617_v16 = vunpack.c.l.b16 %v600_v4  ;;  %v1162_v19 = vld [vmem:[%s1439_s1 + $0xe0] sm:$0xff]  ;;  %v1167_v29 = vld [vmem:[%s1439_s1 + $0x108] sm:$0xff] }
  0x1a   : > { %442 = vmatpush.bf16.msra.mxu3 %v1146_v35  ;;  %v477_v7 = vor.u32 %v476_v60, %v473_v59  ;;  %v689_v17 = vunpack.c.l.b16 %v678_v6  ;;  %v1168_v21 = vld [vmem:[%s1439_s1 + $0x110] sm:$0xff]  ;;  %v547_v51 = vpack.c.b16 %v1273_v12, %v1280_v18 }
  0x1b   : > { %930 = vmatmul.msk.bf16.vlgmr.msra.gmra.mxu0 %vm243_vm2, %v215_v45  ;;  %931 = vmatmul.msk.bf16.vlgmr.msra.gmra.mxu1 %vm243_vm2, %v218_v46  ;;  %v603_v24 = vld [vmem:[%s1263_s8 + $0x10] sm:$0x3]  ;;  %v621_v25 = vpack.c.b16 %v1176_v14, %v617_v16  ;;  %v760_v45 = vld [vmem:[%s1263_s8 + $0x4] sm:$0x8] }
  0x1c   : > { %302 = vmatpush.bf16.msrb.mxu1 %v1137_v27  ;;  %521 = vmatpush.bf16.msrb.mxu0 %v1153_v34  ;;  %v486_v20 = vsel %vm469_vm4, %v477_v7, %v485_v8  ;;  %v690_v27 = vpack.c.b16 %v689_v17, %v1177_v15  ;;  %v620_v28 = vunpack.c.l.b16 %v603_v24  ;;  %v1166_v34 = vld [vmem:[%s1439_s1 + $0x100] sm:$0xff] }
  0x1d   : > { %661 = vmatpush.bf16.msrb.mxu2 %v1161_v40  ;;  %1000 = vmatmul.msk.bf16.vlgmr.msra.gmra.mxu3 %vm243_vm2, %v404_v49  ;;  %v693_v30 = vshrl.u32 %v621_v25, 16  ;;  %v696_v31 = vshll.u32 %v621_v25, 16  ;;  %v624_v39 = vrot.slane %v621_v25, 2 }
  0x1e   : > { %974 = vmatmul.msk.bf16.vlgmr.msra.gmra.mxu2 %vm243_vm2, %v332_v43  ;;  %743 = vmatpush.bf16.msrb.mxu3 %v1165_v48  ;;  %v701_v32 = vshrl.u32 %v690_v27, 16  ;;  %v704_v33 = vshll.u32 %v690_v27, 16  ;;  %v622_v23 = vpack.c.b16 %v620_v28, %v1177_v15  ;;  %v268_v43 = vpack.c.b16 %v1273_v12, %v1273_v12 }
  0x1f   : > { %v695_v35 = vrot.slane %v693_v30, 2 }
  0x20   : > { %303 = vmatpush.bf16.msrb.mxu1 %v1136_v42  ;;  %522 = vmatpush.bf16.msrb.mxu0 %v1152_v47  ;;  %v703_v37 = vrot.slane %v701_v32, 2  ;;  %v706_v38 = vrot.slane %v704_v33, 3  ;;  %v625_v40 = vrot.slane %v622_v23, 2  ;;  %v771_v47 = vunpack.c.l.b16 %v760_v45 }
  0x21   : > { %662 = vmatpush.bf16.msrb.mxu2 %v1160_v50  ;;  %v774_v50 = vrot.slane %v690_v27, 3 }
  0x22   : > { %744 = vmatpush.bf16.msrb.mxu3 %v1164_v57  ;;  %v707_v42 = vor.u32 %v706_v38, %v703_v37  ;;  %v772_v48 = vpack.c.b16 %v1176_v14, %v771_v47 }
  0x24   : > { %304 = vmatpush.bf16.msrb.mxu1 %v1135_v55  ;;  %523 = vmatpush.bf16.msrb.mxu0 %v1151_v56  ;;  %v773_v49 = vrot.slane %v772_v48, 3 }
  0x25   : > { %663 = vmatpush.bf16.msrb.mxu2 %v1159_v58 }
  0x26   : > { %745 = vmatpush.bf16.msrb.mxu3 %v1163_v3  ;;  %v775_v52 = vsel %vm401_vm3, %v773_v49, %v774_v50 }
  0x28   : > { %305 = vmatpush.bf16.msrb.mxu1 %v1134_v63  ;;  %524 = vmatpush.bf16.msrb.mxu0 %v1150_v0 }
  0x29   : > { %664 = vmatpush.bf16.msrb.mxu2 %v1158_v11 }
  0x2a   : > { %746 = vmatpush.bf16.msrb.mxu3 %v1162_v19 }
  0x2b   : > { %1026 = vmatmul.msk.bf16.vlgmr.msrb.gmra.mxu0 %vm243_vm2, %v486_v20  ;;  %948 = vmatmul.msk.bf16.vlgmr.msrb.gmra.mxu1 %vm243_vm2, %v1266_v9  ;;  %v1154_v9 = vld [vmem:[%s1439_s1 + $0xa0] sm:$0xff] }
  0x2c   : > { %583 = vmatpush.bf16.msra.mxu1 %v1157_v1  ;;  %810 = vmatpush.bf16.msra.mxu0 %v1169_v2 }
  0x2d   : > { %1001 = vmatmul.msk.bf16.gmra.mxu3 %vm243_vm2, %v403_v44  ;;  %v626_v44 = vsel %vm623_vm5, %v624_v39, %v625_v40 }
  0x2e   : > { %975 = vmatmul.msk.bf16.gmra.mxu2 %vm243_vm2, %v331_v36  ;;  %v698_v36 = vrot.slane %v696_v31, 3 }
  0x30   : > { %584 = vmatpush.bf16.msra.mxu1 %v1156_v13  ;;  %811 = vmatpush.bf16.msra.mxu0 %v1168_v21  ;;  %v699_v41 = vor.u32 %v698_v36, %v695_v35 }
  0x32   : > { %v708_v46 = vsel %vm691_vm6, %v699_v41, %v707_v42 }
  0x34   : > { %585 = vmatpush.bf16.msra.mxu1 %v1155_v22  ;;  %812 = vmatpush.bf16.msra.mxu0 %v1167_v29  ;;  %v1193_v29 = vld [vmem:[%s1440_s2] ss:$0 sm:$0xff] }
  0x38   : > { %586 = vmatpush.bf16.msra.mxu1 %v1154_v9  ;;  %813 = vmatpush.bf16.msra.mxu0 %v1166_v34 }
  0x3b   : > { %1027 = vmatmul.msk.bf16.gmra.mxu0 %vm243_vm2, %v485_v8  ;;  %949 = vmatmul.msk.bf16.gmra.mxu1 %vm243_vm2, %v268_v43 }
  0x3d   : > { %1104 = vmatmul.msk.bf16.vlgmr.msrb.gmra.mxu3 %vm243_vm2, %v708_v46 }
  0x3e   : > { %1078 = vmatmul.msk.bf16.vlgmr.msrb.gmra.mxu2 %vm243_vm2, %v626_v44 }
  0x4b   : > { %1130 = vmatmul.msk.bf16.vlgmr.msra.gmra.mxu0 %vm243_vm2, %v775_v52  ;;  %1052 = vmatmul.msk.bf16.vlgmr.msra.gmra.mxu1 %vm243_vm2, %v547_v51 }
  0x4d   : > { %1105 = vmatmul.msk.bf16.gmra.mxu3 %vm243_vm2, %v707_v42 }
  0x4e   : > { %1079 = vmatmul.msk.bf16.gmra.mxu2 %vm243_vm2, %v625_v40 }
  0x5b   : > { %1131 = vmatmul.msk.bf16.gmra.mxu0 %vm243_vm2, %v774_v50  ;;  %1053 = vmatmul.msk.bf16.gmra.mxu1 %vm243_vm2, %v548_v53 }
  0x98   : > { %v259_v54 = vpop.f32.mrf.mxu0  ;;  %v264_v12 = vpop.f32.mrf.mxu1 }
  0xa0   : > { %v261_v55 = vpop.f32.mrf.mxu0  ;;  %v444_v56 = vpop.f32.mrf.mxu3 }
  0xa1   : > { %v372_v18 = vpop.f32.mrf.mxu2  ;;  %v266_v57 = vpop.f32.mrf.mxu1 }
  0xa8   : > { %v526_v59 = vpop.f32.mrf.mxu0  ;;  %v446_v60 = vpop.f32.mrf.mxu3 }
  0xa9   : > { %v374_v58 = vpop.f32.mrf.mxu2  ;;  %v307_v61 = vpop.f32.mrf.mxu1 }
  0xaa   : > { %v308_v4 = vadd.f32 %v307_v61, %v259_v54 }
  0xac   : > { %v381_v6 = vadd.f32 %v372_v18, %v308_v4 }
  0xae   : > { %v453_v13 = vadd.f32 %v444_v56, %v381_v6 }
  0xb0   : > { %v528_v63 = vpop.f32.mrf.mxu0  ;;  %v449_v0 = vpop.f32.mrf.mxu3  ;;  %v535_v16 = vadd.f32 %v526_v59, %v453_v13 }
  0xb1   : > { %v377_v62 = vpop.f32.mrf.mxu2  ;;  %v309_v10 = vpop.f32.mrf.mxu1 }
  0xb2   : > { %v310_v14 = vadd.f32 %v309_v10, %v261_v55 }
  0xb4   : > { %v382_v17 = vadd.f32 %v374_v58, %v310_v14 }
  0xb6   : > { %v454_v24 = vadd.f32 %v446_v60, %v382_v17 }
  0xb8   : > { %v531_v26 = vpop.f32.mrf.mxu0  ;;  %v451_v2 = vpop.f32.mrf.mxu3  ;;  %v536_v31 = vadd.f32 %v528_v63, %v454_v24 }
  0xb9   : > { %v379_v1 = vpop.f32.mrf.mxu2  ;;  %v312_v3 = vpop.f32.mrf.mxu1 }
  0xba   : > { %v313_v25 = vadd.f32 %v312_v3, %v264_v12 }
  0xbc   : > { %v383_v32 = vadd.f32 %v377_v62, %v313_v25 }
  0xbe   : > { %v455_v37 = vadd.f32 %v449_v0, %v383_v32 }
  0xc0   : > { %v533_v7 = vpop.f32.mrf.mxu0  ;;  %v748_v8 = vpop.f32.mrf.mxu3  ;;  %v537_v43 = vadd.f32 %v531_v26, %v455_v37 }
  0xc1   : > { %v666_v5 = vpop.f32.mrf.mxu2  ;;  %v314_v11 = vpop.f32.mrf.mxu1 }
  0xc8   : > { %v815_v19 = vpop.f32.mrf.mxu0  ;;  %v750_v20 = vpop.f32.mrf.mxu3 }
  0xc9   : > { %v668_v15 = vpop.f32.mrf.mxu2  ;;  %v588_v21 = vpop.f32.mrf.mxu1 }
  0xca   : > { %v597_v22 = vadd.f32 %v588_v21, %v535_v16 }
  0xcc   : > { %v675_v27 = vadd.f32 %v666_v5, %v597_v22 }
  0xce   : > { %v757_v28 = vadd.f32 %v748_v8, %v675_v27 }
  0xd0   : > { %v824_v33 = vadd.f32 %v815_v19, %v757_v28  ;;  %v817_v9 = vpop.f32.mrf.mxu0  ;;  %v753_v23 = vpop.f32.mrf.mxu3 }
  0xd1   : > { %v671_v30 = vpop.f32.mrf.mxu2  ;;  %v590_v34 = vpop.f32.mrf.mxu1 }
  0xd2   : > { %v831_v35 = vadd.f32 %v1193_v29, %v824_v33  ;;  %v598_v36 = vadd.f32 %v590_v34, %v536_v31 }
  0xd4   : > { %v834_v38 = vmax.f32 %v831_v35, 0.0  ;;  %v676_v39 = vadd.f32 %v668_v15, %v598_v36 }
  0xd6   : > { %v837_v40 = vpack.c.bf16 %v834_v38, %v834_v38  ;;  %v758_v41 = vadd.f32 %v750_v20, %v676_v39 }
  0xd8   : > { %841 = vst.msk [vmem:[%s170_s21] sm:$0xf] %vm840_vm7, %v837_v40  ;;  %v825_v44 = vadd.f32 %v817_v9, %v758_v41  ;;  %v820_v45 = vpop.f32.mrf.mxu0  ;;  %v755_v46 = vpop.f32.mrf.mxu3 }
  0xd9   : > { %v673_v42 = vpop.f32.mrf.mxu2  ;;  %v593_v47 = vpop.f32.mrf.mxu1 }
  0xda   : > { %v832_v48 = vadd.f32 %v1193_v29, %v825_v44  ;;  %v599_v49 = vadd.f32 %v593_v47, %v537_v43 }
  0xdc   : > { %v835_v50 = vmax.f32 %v832_v48, 0.0  ;;  %v677_v51 = vadd.f32 %v671_v30, %v599_v49 }
  0xde   : > { %v838_v52 = vpack.c.bf16 %v835_v50, %v835_v50  ;;  %v759_v53 = vadd.f32 %v753_v23, %v677_v51 }
  0xe0   : > { %842 = vst.msk [vmem:[%s170_s21 + $0x4] sm:$0xf] %vm840_vm7, %v838_v52  ;;  %v826_v54 = vadd.f32 %v820_v45, %v759_v53  ;;  %v822_v12 = vpop.f32.mrf.mxu0 }
  0xe1   : > { %v595_v18 = vpop.f32.mrf.mxu1 }
  0xe2   : > { %v833_v55 = vadd.f32 %v1193_v29, %v826_v54 }
  0xe4   : > { %v836_v56 = vmax.f32 %v833_v55, 0.0 }
  0xe6   : > { %v839_v57 = vpack.c.bf16 %v836_v56, %v836_v56 }
  0xe8   : > { %843 = vst.msk [vmem:[%s170_s21 + $0x8] sm:$0xf] %vm840_vm7, %v839_v57 }
  0xe9 PF: > { %s13_s12 = sadd.s32 1, %s1200_s12  }
  0xea   : > { %p10_p4 = scmp.ge.s32.totalorder %s13_s12, 4  }
  0xec   :  { %12 = sbr.rel (!%p10_p4) target bundleno = 1 (0x1), region = 70 }

// kernel: deep_transfer_forward.11
= control target key start
LH: loop header
LB: loop body
LE: loop exit
PB: predicated region body
PF: predicated region fallthrough
CT: control target
= control target key end

     0   :  { %s1094_s12 = smov 0   ;;  %s1264_s0 = inlined_call_operand.vmem [shape: bf16[2,2,24,64], index: 0, kind: input, shape index: {}]   ;;  %s1265_s1 = inlined_call_operand.vmem [shape: bf16[9,64,128], index: 1, kind: input, shape index: {}]   ;;  %s1266_s2 = inlined_call_operand.vmem [shape: f32[1,128], index: 2, kind: input, shape index: {}]   ;;  %s1267_s3 = inlined_call_operand.vmem [shape: bf16[2,12,128], index: 3, kind: output, shape index: {}]  }
   0x1 LB: > { %s788_s13 = sadd.s32 4294967295, %s1072_s12   ;;  %p792_p0 = scmp.ge.s32.totalorder %s1072_s12, 1  ;;  %s1072_s12 = sphi %s1094_s12, %s13_s12  }
   0x2   : > { %p137_p1 = scmp.lt.s32.totalorder %s1072_s12, 3 }
   0x4   : > { %p138_p2 = pnand %p792_p0, %p137_p1 }
   0x5   : > { %p161_p3 = scmp.lt.s32.totalorder (!%p138_p2), %s788_s13, 1 }
   0x6   : > { %141 = sbr.rel (%p138_p2) target bundleno = 202 (0xca), region = 32 }
   0xb   : > { %v1027_v0 = vld [vmem:[%s1265_s1 + $0x38] sm:$0xff]  ;;  %v1026_v4 = vld [vmem:[%s1265_s1 + $0x30] sm:$0xff]  ;;  %s1269_s13 = smov (!%p161_p3, %s788_s13), 1  ;;  %v1025_v8 = vld [vmem:[%s1265_s1 + $0x28] sm:$0xff]  ;;  %vm228_vm0 = vcmask 523264   ;;  %vm547_vm1 = vcmask 1044480  }
   0xc   : > { %v1023_v1 = vld [vmem:[%s1265_s1 + $0x18] sm:$0xff]  ;;  %236 = vmatpush.bf16.msra.mxu0 %v1027_v0  ;;  %v1022_v5 = vld [vmem:[%s1265_s1 + $0x10] sm:$0xff]  ;;  %s1056_s30 = smul.u32 24, %s1269_s13  ;;  %v1021_v9 = vld [vmem:[%s1265_s1 + $0x8] sm:$0xff]  ;;  %vm607_vm2 = vsmask.f32 4352 }
   0xd   : > { %v1031_v2 = vld [vmem:[%s1265_s1 + $0x58] sm:$0xff]  ;;  %280 = vmatpush.bf16.msra.mxu1 %v1023_v1  ;;  %v1030_v6 = vld [vmem:[%s1265_s1 + $0x50] sm:$0xff]  ;;  %v1029_v10 = vld [vmem:[%s1265_s1 + $0x48] sm:$0xff]  ;;  %s1019_s18 = sshll.u32 %s1269_s13, 3 }
   0xe   : > { %v1035_v3 = vld [vmem:[%s1265_s1 + $0x78] sm:$0xff]  ;;  %335 = vmatpush.bf16.msra.mxu2 %v1031_v2  ;;  %v1034_v7 = vld [vmem:[%s1265_s1 + $0x70] sm:$0xff]  ;;  %v1033_v11 = vld [vmem:[%s1265_s1 + $0x68] sm:$0xff]  ;;  %s1144_s16 = scalar_lea.vmem %s1264_s0, %s1056_s30  ;;  %s170_s21 = scalar_lea.vmem %s1267_s3, %s1019_s18 }
   0xf   : > { %395 = vmatpush.bf16.msra.mxu3 %v1035_v3  ;;  %v1147_v12 = vld [vmem:[%s1144_s16] sm:$0xff]   ;;  %v863_v18 = vld [vmem:[%s1144_s16 + $0xc] sm:$0xf]  ;;  %v864_v19 = vld [vmem:[%s1144_s16 + $0x10] sm:$0x3] }
  0x10   : > { %237 = vmatpush.bf16.msra.mxu0 %v1026_v4  ;;  %v182_v13 = vld [vmem:[%s1144_s16 + $0x4] sm:$0x7]  ;;  %v194_v15 = vunpack.c.l.b16 %v1147_v12  ;;  %v290_v17 = vld [vmem:[%s1144_s16] sm:$0xe]  ;;  %v361_v28 = vunpack.c.l.b16 %v863_v18  ;;  %v362_v29 = vunpack.c.l.b16 %v864_v19  ;;  %v1168_v30 = vld [vmem:[%s1144_s16 + $0x10] sm:$0x7]  ;;  %v543_v35 = vunpack.c.h.b16 %v1147_v12 }
  0x11   : > { %281 = vmatpush.bf16.msra.mxu1 %v1022_v5  ;;  %v173_v14 = vld [vmem:[%s1144_s16 + $0x4] sm:$0x3]  ;;  %v195_v16 = vunpack.c.l.b16 %v182_v13  ;;  %v301_v21 = vunpack.c.l.b16 %v290_v17  ;;  %v1039_v33 = vld [vmem:[%s1265_s1 + $0x98] sm:$0xff]  ;;  %v527_v38 = vld [vmem:[%s1144_s16] sm:$0x8]  ;;  %v418_v41 = vunpack.c.l.b16 %v1168_v30 }
  0x12   : > { %336 = vmatpush.bf16.msra.mxu2 %v1030_v6  ;;  %v247_v20 = vunpack.c.l.b16 %v173_v14  ;;  %v1024_v22 = vld [vmem:[%s1265_s1 + $0x20] sm:$0xff]  ;;  %v1047_v34 = vld [vmem:[%s1265_s1 + $0xd8] sm:$0xff]  ;;  %v542_v42 = vunpack.c.l.b16 %v527_v38  ;;  %v594_v43 = vld [vmem:[%s1144_s16 + $0x8] sm:$0x3]  ;;  %v363_v44 = vpack.c.b16 %v362_v29, %v361_v28 }
  0x13   : > { %396 = vmatpush.bf16.msra.mxu3 %v1034_v7  ;;  %v1020_v23 = vld [vmem:[%s1265_s1] sm:$0xff]  ;;  %v196_v24 = vpack.c.b16 %v195_v16, %v194_v15  ;;  %v302_v27 = vpack.c.b16 %v195_v16, %v301_v21  ;;  %v1051_v37 = vld [vmem:[%s1265_s1 + $0xf8] sm:$0xff]  ;;  %v1038_v46 = vld [vmem:[%s1265_s1 + $0x90] sm:$0xff]  ;;  %v1189_v47 = vunpack.c.l.b16 %v594_v43  ;;  %v419_v54 = vpack.c.b16 %v418_v41, %v361_v28 }
  0x14   : > { %238 = vmatpush.bf16.msra.mxu0 %v1025_v8  ;;  %v1028_v25 = vld [vmem:[%s1265_s1 + $0x40] sm:$0xff]  ;;  %v248_v36 = vpack.c.b16 %v247_v20, %v194_v15  ;;  %v1043_v45 = vld [vmem:[%s1265_s1 + $0xb8] sm:$0xff]  ;;  %v1046_v49 = vld [vmem:[%s1265_s1 + $0xd0] sm:$0xff]  ;;  %v545_v51 = vpack.c.b16 %v543_v35, %v542_v42 }
  0x15   : > { %282 = vmatpush.bf16.msra.mxu1 %v1021_v9  ;;  %v1032_v26 = vld [vmem:[%s1265_s1 + $0x60] sm:$0xff]  ;;  %v198_v31 = vshrl.u32 %v196_v24, 16  ;;  %v200_v32 = vshll.u32 %v196_v24, 16  ;;  %v303_v40 = vrot.slane %v302_v27, 1  ;;  %v529_v50 = vld [vmem:[%s1144_s16 + $0x8] sm:$0x1]  ;;  %v606_v53 = vpack.c.b16 %v1189_v47, %v1189_v47 }
  0x16   : > { %337 = vmatpush.bf16.msra.mxu2 %v1029_v10  ;;  %v1050_v52 = vld [vmem:[%s1265_s1 + $0xf0] sm:$0xff]  ;;  %v1037_v56 = vld [vmem:[%s1265_s1 + $0x88] sm:$0xff]  ;;  %v544_v58 = vunpack.c.l.b16 %v529_v50  ;;  %v609_v59 = vshrl.u32 %v545_v51, 16  ;;  %v612_v60 = vshll.u32 %v545_v51, 16  ;;  %v423_v1 = vshll.u32 %v419_v54, 16  ;;  %v1036_v5 = vld [vmem:[%s1265_s1 + $0x80] sm:$0xff] }
  0x17   : > { %397 = vmatpush.bf16.msra.mxu3 %v1033_v11  ;;  %v202_v39 = vrot.slane %v200_v32, 1  ;;  %v1042_v55 = vld [vmem:[%s1265_s1 + $0xb0] sm:$0xff]  ;;  %v1045_v57 = vld [vmem:[%s1265_s1 + $0xc8] sm:$0xff]  ;;  %v617_v61 = vshrl.u32 %v606_v53, 16  ;;  %v620_v62 = vshll.u32 %v606_v53, 16  ;;  %v1044_v6 = vld [vmem:[%s1265_s1 + $0xc0] sm:$0xff]  ;;  %v677_v29 = vpack.c.b16 %v1189_v47, %v543_v35 }
  0x18   : > { %239 = vmatpush.bf16.msra.mxu0 %v1024_v22  ;;  %v916_v63 = vld [vmem:[%s1144_s16 + $0xc] sm:$0xe]  ;;  %v546_v3 = vpack.c.b16 %v544_v58, %v544_v58  ;;  %v611_v7 = vrot.slane %v609_v59, 3  ;;  %v614_v8 = vrot.slane %v612_v60, 4  ;;  %v1048_v11 = vld [vmem:[%s1265_s1 + $0xe0] sm:$0xff]  ;;  %v1055_v13 = vld [vmem:[%s1265_s1 + $0x118] sm:$0xff] }
  0x19   : > { %283 = vmatpush.bf16.msra.mxu1 %v1020_v23  ;;  %v203_v48 = vor.u32 %v202_v39, %v198_v31  ;;  %v1049_v0 = vld [vmem:[%s1265_s1 + $0xe8] sm:$0xff]  ;;  %v481_v4 = vunpack.c.l.b16 %v916_v63  ;;  %v619_v9 = vrot.slane %v617_v61, 3  ;;  %v622_v10 = vrot.slane %v620_v62, 4  ;;  %v1040_v16 = vld [vmem:[%s1265_s1 + $0xa0] sm:$0xff]  ;;  %v1054_v22 = vld [vmem:[%s1265_s1 + $0x110] sm:$0xff] }
  0x1a   : > { %338 = vmatpush.bf16.msra.mxu2 %v1028_v25  ;;  %v1041_v2 = vld [vmem:[%s1265_s1 + $0xa8] sm:$0xff]  ;;  %v421_v14 = vshrl.u32 %v419_v54, 16  ;;  %v425_v15 = vrot.slane %v423_v1, 1  ;;  %v548_v17 = vrot.slane %v545_v51, 3  ;;  %v549_v18 = vrot.slane %v546_v3, 3  ;;  %v1052_v28 = vld [vmem:[%s1265_s1 + $0x100] sm:$0xff] }
  0x1b   : > { %398 = vmatpush.bf16.msra.mxu3 %v1032_v26  ;;  %820 = vmatmul.msk.bf16.vlgmr.msra.gmra.mxu0 %vm228_vm0, %v203_v48  ;;  %v482_v19 = vpack.c.b16 %v418_v41, %v481_v4  ;;  %v615_v20 = vor.u32 %v614_v8, %v611_v7  ;;  %v623_v21 = vor.u32 %v622_v10, %v619_v9  ;;  %v1053_v27 = vld [vmem:[%s1265_s1 + $0x108] sm:$0xff] }
  0x1c   : > { %458 = vmatpush.bf16.msrb.mxu0 %v1039_v33  ;;  %837 = vmatmul.msk.bf16.vlgmr.msra.gmra.mxu1 %vm228_vm0, %v248_v36  ;;  %v426_v23 = vor.u32 %v425_v15, %v421_v14  ;;  %v550_v24 = vsel %vm547_vm1, %v548_v17, %v549_v18 }
  0x1d   : > { %862 = vmatmul.msk.bf16.vlgmr.msra.gmra.mxu2 %vm228_vm0, %v303_v40  ;;  %515 = vmatpush.bf16.msrb.mxu1 %v1043_v45  ;;  %v483_v25 = vrot.slane %v482_v19, 1  ;;  %v624_v26 = vsel %vm607_vm2, %v615_v20, %v623_v21 }
  0x1e   : > { %582 = vmatpush.bf16.msrb.mxu2 %v1047_v34  ;;  %889 = vmatmul.msk.bf16.vlgmr.msra.gmra.mxu3 %vm228_vm0, %v363_v44 }
  0x1f   : > { %656 = vmatpush.bf16.msrb.mxu3 %v1051_v37 }
  0x20   : > { %459 = vmatpush.bf16.msrb.mxu0 %v1038_v46 }
  0x21   : > { %516 = vmatpush.bf16.msrb.mxu1 %v1042_v55  ;;  %v1065_v55 = vld [vmem:[%s1266_s2] ss:$0 sm:$0xff] }
  0x22   : > { %583 = vmatpush.bf16.msrb.mxu2 %v1046_v49 }
  0x23   : > { %657 = vmatpush.bf16.msrb.mxu3 %v1050_v52 }
  0x24   : > { %460 = vmatpush.bf16.msrb.mxu0 %v1037_v56 }
  0x25   : > { %517 = vmatpush.bf16.msrb.mxu1 %v1041_v2 }
  0x26   : > { %584 = vmatpush.bf16.msrb.mxu2 %v1045_v57 }
  0x27   : > { %658 = vmatpush.bf16.msrb.mxu3 %v1049_v0 }
  0x28   : > { %461 = vmatpush.bf16.msrb.mxu0 %v1036_v5 }
  0x29   : > { %518 = vmatpush.bf16.msrb.mxu1 %v1040_v16 }
  0x2a   : > { %585 = vmatpush.bf16.msrb.mxu2 %v1044_v6 }
  0x2b   : > { %659 = vmatpush.bf16.msrb.mxu3 %v1048_v11  ;;  %915 = vmatmul.msk.bf16.vlgmr.msrb.gmra.mxu0 %vm228_vm0, %v426_v23 }
  0x2c   : > { %709 = vmatpush.bf16.msra.mxu0 %v1055_v13  ;;  %941 = vmatmul.msk.bf16.vlgmr.msrb.gmra.mxu1 %vm228_vm0, %v483_v25 }
  0x2d   : > { %966 = vmatmul.msk.bf16.vlgmr.msrb.gmra.mxu2 %vm228_vm0, %v550_v24 }
  0x2e   : > { %991 = vmatmul.msk.bf16.vlgmr.msrb.gmra.mxu3 %vm228_vm0, %v624_v26 }
  0x30   : > { %710 = vmatpush.bf16.msra.mxu0 %v1054_v22 }
  0x34   : > { %711 = vmatpush.bf16.msra.mxu0 %v1053_v27 }
  0x38   : > { %712 = vmatpush.bf16.msra.mxu0 %v1052_v28 }
  0x3b   : > { %1016 = vmatmul.msk.bf16.vlgmr.msra.gmra.mxu0 %vm228_vm0, %v677_v29 }
  0x98   : > { %v241_v30 = vpop.f32.mrf.mxu0 }
  0x99   : > { %v285_v31 = vpop.f32.mrf.mxu1 }
  0x9a   : > { %v286_v37 = vadd.f32 %v285_v31, %v241_v30 }
  0xa0   : > { %v340_v32 = vpop.f32.mrf.mxu2  ;;  %v243_v34 = vpop.f32.mrf.mxu0 }
  0xa1   : > { %v400_v33 = vpop.f32.mrf.mxu3  ;;  %v287_v36 = vpop.f32.mrf.mxu1  ;;  %v345_v38 = vadd.f32 %v340_v32, %v286_v37 }
  0xa2   : > { %v288_v44 = vadd.f32 %v287_v36, %v243_v34 }
  0xa3   : > { %v405_v42 = vadd.f32 %v400_v33, %v345_v38 }
  0xa8   : > { %v342_v39 = vpop.f32.mrf.mxu2  ;;  %v463_v41 = vpop.f32.mrf.mxu0 }
  0xa9   : > { %v402_v40 = vpop.f32.mrf.mxu3  ;;  %v520_v43 = vpop.f32.mrf.mxu1  ;;  %v468_v45 = vadd.f32 %v463_v41, %v405_v42  ;;  %v346_v12 = vadd.f32 %v342_v39, %v288_v44 }
  0xab   : > { %v525_v46 = vadd.f32 %v520_v43, %v468_v45  ;;  %v406_v48 = vadd.f32 %v402_v40, %v346_v12 }
  0xb0   : > { %v587_v35 = vpop.f32.mrf.mxu2  ;;  %v465_v47 = vpop.f32.mrf.mxu0 }
  0xb1   : > { %v661_v49 = vpop.f32.mrf.mxu3  ;;  %v592_v50 = vadd.f32 %v587_v35, %v525_v46  ;;  %v469_v51 = vadd.f32 %v465_v47, %v406_v48  ;;  %v522_v52 = vpop.f32.mrf.mxu1 }
  0xb3   : > { %v666_v53 = vadd.f32 %v661_v49, %v592_v50  ;;  %v526_v54 = vadd.f32 %v522_v52, %v469_v51 }
  0xb8   : > { %v589_v56 = vpop.f32.mrf.mxu2  ;;  %v714_v57 = vpop.f32.mrf.mxu0 }
  0xb9   : > { %v719_v58 = vadd.f32 %v714_v57, %v666_v53  ;;  %v593_v59 = vadd.f32 %v589_v56, %v526_v54  ;;  %v663_v61 = vpop.f32.mrf.mxu3 }
  0xbb   : > { %v725_v60 = vadd.f32 %v1065_v55, %v719_v58  ;;  %v667_v63 = vadd.f32 %v663_v61, %v593_v59 }
  0xbd   : > { %v727_v62 = vmax.f32 %v725_v60, 0.0 }
  0xbf   : > { %v729_v0 = vpack.c.bf16 %v727_v62, %v727_v62 }
  0xc0   : > { %v716_v1 = vpop.f32.mrf.mxu0 }
  0xc1   : > { %731 = vst [vmem:[%s170_s21] sm:$0xf] %v729_v0  ;;  %v720_v2 = vadd.f32 %v716_v1, %v667_v63 }
  0xc3   : > { %v726_v3 = vadd.f32 %v1065_v55, %v720_v2 }
  0xc5   : > { %v728_v4 = vmax.f32 %v726_v3, 0.0 }
  0xc7   : > { %v730_v5 = vpack.c.bf16 %v728_v4, %v728_v4 }
  0xc9   : > { %732 = vst [vmem:[%s170_s21 + $0x4] sm:$0x3] %v730_v5 }
  0xca PF: > { %s13_s12 = sadd.s32 1, %s1072_s12  }
  0xcb   : > { %p10_p4 = scmp.ge.s32.totalorder %s13_s12, 4  }
  0xcd   :  { %12 = sbr.rel (!%p10_p4) target bundleno = 1 (0x1), region = 71 }

// kernel: deep_transfer_forward.12
= control target key start
LH: loop header
LB: loop body
LE: loop exit
PB: predicated region body
PF: predicated region fallthrough
CT: control target
= control target key end

     0   :  { %s1544_s12 = smov 0   ;;  %s1815_s0 = inlined_call_operand.vmem [shape: bf16[2,1,20,128], index: 0, kind: input, shape index: {}]   ;;  %s1816_s1 = inlined_call_operand.vmem [shape: bf16[9,128,128], index: 1, kind: input, shape index: {}]   ;;  %s1817_s2 = inlined_call_operand.vmem [shape: f32[1,128], index: 2, kind: input, shape index: {}]   ;;  %s1818_s3 = inlined_call_operand.vmem [shape: bf16[2,8,128], index: 3, kind: output, shape index: {}]  }
   0x1 LB: > { %s1009_s13 = sadd.s32 4294967295, %s1522_s12   ;;  %p1013_p0 = scmp.ge.s32.totalorder %s1522_s12, 1  ;;  %s1522_s12 = sphi %s1544_s12, %s13_s12  }
   0x2   : > { %p137_p1 = scmp.lt.s32.totalorder %s1522_s12, 3 }
   0x4   : > { %p138_p2 = pnand %p1013_p0, %p137_p1 }
   0x5   : > { %p160_p3 = scmp.lt.s32.totalorder (!%p138_p2), %s1009_s13, 1 }
   0x6   : > { %141 = sbr.rel (%p138_p2) target bundleno = 242 (0xf2), region = 32 }
   0xb   : > { %v1449_v0 = vld [vmem:[%s1816_s1 + $0x78] sm:$0xff]  ;;  %v1448_v4 = vld [vmem:[%s1816_s1 + $0x70] sm:$0xff]  ;;  %s1820_s13 = smov (!%p160_p3, %s1009_s13), 1  ;;  %v1447_v8 = vld [vmem:[%s1816_s1 + $0x68] sm:$0xff] }
   0xc   : > { %v1457_v1 = vld [vmem:[%s1816_s1 + $0xb8] sm:$0xff]  ;;  %265 = vmatpush.bf16.msra.mxu0 %v1449_v0  ;;  %v1456_v5 = vld [vmem:[%s1816_s1 + $0xb0] sm:$0xff]  ;;  %v1455_v9 = vld [vmem:[%s1816_s1 + $0xa8] sm:$0xff]  ;;  %s1506_s11 = smul.u32 12, %s1820_s13  ;;  %s1015_s17 = sshll.u32 %s1820_s13, 2 }
   0xd   : > { %v1465_v2 = vld [vmem:[%s1816_s1 + $0xf8] sm:$0xff]  ;;  %410 = vmatpush.bf16.msra.mxu2 %v1457_v1  ;;  %v1464_v6 = vld [vmem:[%s1816_s1 + $0xf0] sm:$0xff]  ;;  %v1463_v10 = vld [vmem:[%s1816_s1 + $0xe8] sm:$0xff]  ;;  %s168_s20 = scalar_lea.vmem %s1818_s3, %s1015_s17 }
   0xe   : > { %v1441_v3 = vld [vmem:[%s1816_s1 + $0x38] sm:$0xff]  ;;  %498 = vmatpush.bf16.msra.mxu3 %v1465_v2  ;;  %v1440_v7 = vld [vmem:[%s1816_s1 + $0x30] sm:$0xff]  ;;  %v1439_v11 = vld [vmem:[%s1816_s1 + $0x28] sm:$0xff]  ;;  %s1606_s24 = scalar_lea.vmem %s1815_s0, %s1506_s11 }
   0xf   : > { %326 = vmatpush.bf16.msra.mxu1 %v1441_v3  ;;  %v1446_v12 = vld [vmem:[%s1816_s1 + $0x60] sm:$0xff]  ;;  %v1445_v16 = vld [vmem:[%s1816_s1 + $0x58] sm:$0xff]  ;;  %v1444_v23 = vld [vmem:[%s1816_s1 + $0x50] sm:$0xff] }
  0x10   : > { %266 = vmatpush.bf16.msra.mxu0 %v1448_v4  ;;  %v1454_v13 = vld [vmem:[%s1816_s1 + $0xa0] sm:$0xff]  ;;  %v1453_v17 = vld [vmem:[%s1816_s1 + $0x98] sm:$0xff]  ;;  %v1452_v24 = vld [vmem:[%s1816_s1 + $0x90] sm:$0xff] }
  0x11   : > { %411 = vmatpush.bf16.msra.mxu2 %v1456_v5  ;;  %v1462_v14 = vld [vmem:[%s1816_s1 + $0xe0] sm:$0xff]  ;;  %v1461_v18 = vld [vmem:[%s1816_s1 + $0xd8] sm:$0xff]  ;;  %v1460_v26 = vld [vmem:[%s1816_s1 + $0xd0] sm:$0xff] }
  0x12   : > { %499 = vmatpush.bf16.msra.mxu3 %v1464_v6  ;;  %v1438_v15 = vld [vmem:[%s1816_s1 + $0x20] sm:$0xff]  ;;  %v1437_v19 = vld [vmem:[%s1816_s1 + $0x18] sm:$0xff]  ;;  %v1436_v27 = vld [vmem:[%s1816_s1 + $0x10] sm:$0xff] }
  0x13   : > { %327 = vmatpush.bf16.msra.mxu1 %v1440_v7  ;;  %v186_v20 = vld [vmem:[%s1606_s24 + $0x4] sm:$0x1]  ;;  %v1622_v22 = vld [vmem:[%s1606_s24] sm:$0xf]  ;;  %v1443_v32 = vld [vmem:[%s1816_s1 + $0x48] sm:$0xff] }
  0x14   : > { %267 = vmatpush.bf16.msra.mxu0 %v1447_v8  ;;  %v207_v21 = vunpack.c.l.b16 %v186_v20  ;;  %v206_v25 = vunpack.c.l.b16 %v1622_v22  ;;  %v339_v28 = vld [vmem:[%s1606_s24] sm:$0xe]  ;;  %v425_v31 = vld [vmem:[%s1606_s24 + $0x4] sm:$0x3]  ;;  %v1451_v33 = vld [vmem:[%s1816_s1 + $0x88] sm:$0xff] }
  0x15   : > { %412 = vmatpush.bf16.msra.mxu2 %v1455_v9  ;;  %v1639_v30 = vld [vmem:[%s1606_s24] sm:$0xc]  ;;  %v358_v34 = vunpack.c.l.b16 %v339_v28  ;;  %v1459_v36 = vld [vmem:[%s1816_s1 + $0xc8] sm:$0xff]  ;;  %v446_v39 = vunpack.c.l.b16 %v425_v31  ;;  %v1473_v45 = vld [vmem:[%s1816_s1 + $0x138] sm:$0xff] }
  0x16   : > { %500 = vmatpush.bf16.msra.mxu3 %v1463_v10  ;;  %v208_v29 = vpack.c.b16 %v207_v21, %v206_v25  ;;  %v1435_v37 = vld [vmem:[%s1816_s1 + $0x8] sm:$0xff]  ;;  %v445_v38 = vunpack.c.l.b16 %v1639_v30  ;;  %v1442_v40 = vld [vmem:[%s1816_s1 + $0x40] sm:$0xff]  ;;  %v1489_v46 = vld [vmem:[%s1816_s1 + $0x1b8] sm:$0xff] }
  0x17   : > { %328 = vmatpush.bf16.msra.mxu1 %v1439_v11  ;;  %v1450_v41 = vld [vmem:[%s1816_s1 + $0x80] sm:$0xff]  ;;  %v359_v42 = vpack.c.b16 %v207_v21, %v358_v34  ;;  %v1497_v50 = vld [vmem:[%s1816_s1 + $0x1f8] sm:$0xff]  ;;  %v1472_v54 = vld [vmem:[%s1816_s1 + $0x130] sm:$0xff] }
  0x18   : > { %268 = vmatpush.bf16.msra.mxu0 %v1446_v12  ;;  %v212_v35 = vshll.u32 %v208_v29, 16  ;;  %v210_v43 = vshrl.u32 %v208_v29, 16  ;;  %v1458_v47 = vld [vmem:[%s1816_s1 + $0xc0] sm:$0xff]  ;;  %v447_v49 = vpack.c.b16 %v446_v39, %v445_v38  ;;  %v1481_v51 = vld [vmem:[%s1816_s1 + $0x178] sm:$0xff]  ;;  %v1488_v55 = vld [vmem:[%s1816_s1 + $0x1b0] sm:$0xff] }
  0x19   : > { %413 = vmatpush.bf16.msra.mxu2 %v1454_v13  ;;  %v1434_v48 = vld [vmem:[%s1816_s1] sm:$0xff]  ;;  %v360_v52 = vrot.slane %v359_v42, 1  ;;  %v1496_v57 = vld [vmem:[%s1816_s1 + $0x1f0] sm:$0xff]  ;;  %v1471_v59 = vld [vmem:[%s1816_s1 + $0x128] sm:$0xff] }
  0x1a   : > { %501 = vmatpush.bf16.msra.mxu3 %v1462_v14  ;;  %v214_v44 = vrot.slane %v212_v35, 1  ;;  %v448_v56 = vrot.slane %v447_v49, 2  ;;  %v1480_v58 = vld [vmem:[%s1816_s1 + $0x170] sm:$0xff]  ;;  %v1487_v60 = vld [vmem:[%s1816_s1 + $0x1a8] sm:$0xff]  ;;  %v1470_v63 = vld [vmem:[%s1816_s1 + $0x120] sm:$0xff] }
  0x1b   : > { %329 = vmatpush.bf16.msra.mxu1 %v1438_v15  ;;  %v1495_v61 = vld [vmem:[%s1816_s1 + $0x1e8] sm:$0xff]  ;;  %v1486_v0 = vld [vmem:[%s1816_s1 + $0x1a0] sm:$0xff]  ;;  %v1469_v7 = vld [vmem:[%s1816_s1 + $0x118] sm:$0xff] }
  0x1c   : > { %269 = vmatpush.bf16.msra.mxu0 %v1445_v16  ;;  %v215_v53 = vor.u32 %v214_v44, %v210_v43  ;;  %v1479_v62 = vld [vmem:[%s1816_s1 + $0x168] sm:$0xff]  ;;  %v512_v1 = vld [vmem:[%s1606_s24 + $0x4] sm:$0x7]  ;;  %v1485_v8 = vld [vmem:[%s1816_s1 + $0x198] sm:$0xff] }
  0x1d   : > { %414 = vmatpush.bf16.msra.mxu2 %v1453_v17  ;;  %v1494_v2 = vld [vmem:[%s1816_s1 + $0x1e0] sm:$0xff]  ;;  %v1721_v5 = vld [vmem:[%s1606_s24 + $0x8] sm:$0x1]  ;;  %v531_v6 = vunpack.c.l.b16 %v512_v1  ;;  %v1493_v11 = vld [vmem:[%s1816_s1 + $0x1d8] sm:$0xff] }
  0x1e   : > { %502 = vmatpush.bf16.msra.mxu3 %v1461_v18  ;;  %v1478_v3 = vld [vmem:[%s1816_s1 + $0x160] sm:$0xff]  ;;  %v791_v10 = vunpack.c.l.b16 %v1721_v5  ;;  %v1477_v12 = vld [vmem:[%s1816_s1 + $0x158] sm:$0xff]  ;;  %v1468_v14 = vld [vmem:[%s1816_s1 + $0x110] sm:$0xff] }
  0x1f   : > { %330 = vmatpush.bf16.msra.mxu1 %v1437_v19  ;;  %v769_v4 = vld [vmem:[%s1606_s24 + $0x4] sm:$0xf]  ;;  %v532_v13 = vpack.c.b16 %v531_v6, %v445_v38  ;;  %v1484_v15 = vld [vmem:[%s1816_s1 + $0x190] sm:$0xff]  ;;  %v604_v21 = vld [vmem:[%s1606_s24] sm:$0x8] }
  0x20   : > { %270 = vmatpush.bf16.msra.mxu0 %v1444_v23  ;;  %v790_v9 = vunpack.c.l.b16 %v769_v4  ;;  %v1492_v17 = vld [vmem:[%s1816_s1 + $0x1d0] sm:$0xff]  ;;  %v1483_v23 = vld [vmem:[%s1816_s1 + $0x188] sm:$0xff]  ;;  %v1466_v30 = vld [vmem:[%s1816_s1 + $0x100] sm:$0xff] }
  0x21   : > { %415 = vmatpush.bf16.msra.mxu2 %v1452_v24  ;;  %v1476_v18 = vld [vmem:[%s1816_s1 + $0x150] sm:$0xff]  ;;  %v534_v19 = vshrl.u32 %v532_v13, 16  ;;  %v537_v20 = vshll.u32 %v532_v13, 16  ;;  %v1491_v25 = vld [vmem:[%s1816_s1 + $0x1c8] sm:$0xff]  ;;  %v1482_v31 = vld [vmem:[%s1816_s1 + $0x180] sm:$0xff] }
  0x22   : > { %503 = vmatpush.bf16.msra.mxu3 %v1460_v26  ;;  %v792_v16 = vpack.c.b16 %v791_v10, %v790_v9  ;;  %v1475_v26 = vld [vmem:[%s1816_s1 + $0x148] sm:$0xff]  ;;  %v1490_v35 = vld [vmem:[%s1816_s1 + $0x1c0] sm:$0xff] }
  0x23   : > { %331 = vmatpush.bf16.msra.mxu1 %v1436_v27  ;;  %v623_v27 = vunpack.c.l.b16 %v604_v21  ;;  %v536_v28 = vrot.slane %v534_v19, 2  ;;  %v539_v29 = vrot.slane %v537_v20, 3  ;;  %v689_v39 = vld [vmem:[%s1606_s24 + $0x4] sm:$0xf]  ;;  %v1503_v43 = vld [vmem:[%s1816_s1 + $0x228] sm:$0xff] }
  0x24   : > { %271 = vmatpush.bf16.msra.mxu0 %v1443_v32  ;;  %v796_v24 = vshll.u32 %v792_v16, 16  ;;  %v1505_v32 = vld [vmem:[%s1816_s1 + $0x238] sm:$0xff]  ;;  %v1502_v44 = vld [vmem:[%s1816_s1 + $0x220] sm:$0xff]  ;;  %v1499_v49 = vld [vmem:[%s1816_s1 + $0x208] sm:$0xff] }
  0x25   : > { %416 = vmatpush.bf16.msra.mxu2 %v1451_v33  ;;  %v794_v33 = vshrl.u32 %v792_v16, 16  ;;  %v540_v38 = vor.u32 %v539_v29, %v536_v28 }
  0x26   : > { %504 = vmatpush.bf16.msra.mxu3 %v1459_v36  ;;  %v798_v34 = vrot.slane %v796_v24, 1  ;;  %v1474_v36 = vld [vmem:[%s1816_s1 + $0x140] sm:$0xff] }
  0x27   : > { %332 = vmatpush.bf16.msra.mxu1 %v1435_v37  ;;  %v624_v37 = vpack.c.b16 %v531_v6, %v623_v27 }
  0x28   : > { %272 = vmatpush.bf16.msra.mxu0 %v1442_v40  ;;  %v1504_v40 = vld [vmem:[%s1816_s1 + $0x230] sm:$0xff] }
  0x29   : > { %417 = vmatpush.bf16.msra.mxu2 %v1450_v41  ;;  %v799_v41 = vor.u32 %v798_v34, %v794_v33  ;;  %v625_v42 = vrot.slane %v624_v37, 3 }
  0x2a   : > { %505 = vmatpush.bf16.msra.mxu3 %v1458_v47  ;;  %v863_v47 = vld [vmem:[%s1606_s24 + $0x4] sm:$0xe] }
  0x2b   : > { %333 = vmatpush.bf16.msra.mxu1 %v1434_v48  ;;  %273 = vmatmul.bf16.vlgmr.msra.gmra.mxu0 %v215_v53  ;;  %v882_v48 = vunpack.c.l.b16 %v863_v47 }
  0x2c   : > { %590 = vmatpush.bf16.msrb.mxu0 %v1473_v45  ;;  %418 = vmatmul.bf16.vlgmr.msra.gmra.mxu2 %v360_v52  ;;  %v1501_v45 = vld [vmem:[%s1816_s1 + $0x218] sm:$0xff] }
  0x2d   : > { %755 = vmatpush.bf16.msrb.mxu2 %v1489_v46  ;;  %506 = vmatmul.bf16.vlgmr.msra.gmra.mxu3 %v448_v56  ;;  %v1500_v46 = vld [vmem:[%s1816_s1 + $0x210] sm:$0xff] }
  0x2e   : > { %849 = vmatpush.bf16.msrb.mxu3 %v1497_v50  ;;  %334 = vmatmul.bf16.vlgmr.msra.gmra.mxu1 %v1622_v22  ;;  %v1467_v22 = vld [vmem:[%s1816_s1 + $0x108] sm:$0xff]  ;;  %v883_v50 = vpack.c.b16 %v791_v10, %v882_v48 }
  0x2f   : > { %675 = vmatpush.bf16.msrb.mxu1 %v1481_v51  ;;  %v1498_v51 = vld [vmem:[%s1816_s1 + $0x200] sm:$0xff] }
  0x30   : > { %591 = vmatpush.bf16.msrb.mxu0 %v1472_v54  ;;  %v884_v52 = vrot.slane %v883_v50, 1 }
  0x31   : > { %756 = vmatpush.bf16.msrb.mxu2 %v1488_v55 }
  0x32   : > { %850 = vmatpush.bf16.msrb.mxu3 %v1496_v57 }
  0x33   : > { %676 = vmatpush.bf16.msrb.mxu1 %v1480_v58 }
  0x34   : > { %592 = vmatpush.bf16.msrb.mxu0 %v1471_v59 }
  0x35   : > { %757 = vmatpush.bf16.msrb.mxu2 %v1487_v60 }
  0x36   : > { %851 = vmatpush.bf16.msrb.mxu3 %v1495_v61 }
  0x37   : > { %677 = vmatpush.bf16.msrb.mxu1 %v1479_v62 }
  0x38   : > { %593 = vmatpush.bf16.msrb.mxu0 %v1470_v63 }
  0x39   : > { %758 = vmatpush.bf16.msrb.mxu2 %v1486_v0 }
  0x3a   : > { %852 = vmatpush.bf16.msrb.mxu3 %v1494_v2 }
  0x3b   : > { %678 = vmatpush.bf16.msrb.mxu1 %v1478_v3 }
  0x3c   : > { %594 = vmatpush.bf16.msrb.mxu0 %v1469_v7 }
  0x3d   : > { %759 = vmatpush.bf16.msrb.mxu2 %v1485_v8 }
  0x3e   : > { %853 = vmatpush.bf16.msrb.mxu3 %v1493_v11 }
  0x3f   : > { %679 = vmatpush.bf16.msrb.mxu1 %v1477_v12  ;;  %v1515_v12 = vld [vmem:[%s1817_s2] ss:$0 sm:$0xff] }
  0x40   : > { %595 = vmatpush.bf16.msrb.mxu0 %v1468_v14 }
  0x41   : > { %760 = vmatpush.bf16.msrb.mxu2 %v1484_v15 }
  0x42   : > { %854 = vmatpush.bf16.msrb.mxu3 %v1492_v17 }
  0x43   : > { %680 = vmatpush.bf16.msrb.mxu1 %v1476_v18 }
  0x44   : > { %596 = vmatpush.bf16.msrb.mxu0 %v1467_v22 }
  0x45   : > { %761 = vmatpush.bf16.msrb.mxu2 %v1483_v23 }
  0x46   : > { %855 = vmatpush.bf16.msrb.mxu3 %v1491_v25 }
  0x47   : > { %681 = vmatpush.bf16.msrb.mxu1 %v1475_v26 }
  0x48   : > { %597 = vmatpush.bf16.msrb.mxu0 %v1466_v30 }
  0x49   : > { %762 = vmatpush.bf16.msrb.mxu2 %v1482_v31 }
  0x4a   : > { %856 = vmatpush.bf16.msrb.mxu3 %v1490_v35 }
  0x4b   : > { %682 = vmatpush.bf16.msrb.mxu1 %v1474_v36  ;;  %598 = vmatmul.bf16.vlgmr.msrb.gmra.mxu0 %v540_v38 }
  0x4c   : > { %934 = vmatpush.bf16.msra.mxu0 %v1505_v32  ;;  %763 = vmatmul.bf16.vlgmr.msrb.gmra.mxu2 %v689_v39 }
  0x4d   : > { %857 = vmatmul.bf16.vlgmr.msrb.gmra.mxu3 %v799_v41 }
  0x4e   : > { %683 = vmatmul.bf16.vlgmr.msrb.gmra.mxu1 %v625_v42 }
  0x50   : > { %935 = vmatpush.bf16.msra.mxu0 %v1504_v40 }
  0x54   : > { %936 = vmatpush.bf16.msra.mxu0 %v1503_v43 }
  0x58   : > { %937 = vmatpush.bf16.msra.mxu0 %v1502_v44 }
  0x5c   : > { %938 = vmatpush.bf16.msra.mxu0 %v1501_v45 }
  0x60   : > { %939 = vmatpush.bf16.msra.mxu0 %v1500_v46 }
  0x64   : > { %940 = vmatpush.bf16.msra.mxu0 %v1499_v49 }
  0x68   : > { %941 = vmatpush.bf16.msra.mxu0 %v1498_v51 }
  0x6b   : > { %942 = vmatmul.bf16.vlgmr.msra.gmra.mxu0 %v884_v52 }
  0xa8   : > { %v274_v53 = vpop.f32.mrf.mxu0 }
  0xab   : > { %v335_v54 = vpop.f32.mrf.mxu1 }
  0xac   : > { %v336_v63 = vadd.f32 %v335_v54, %v274_v53 }
  0xaf   : > { %v419_v55 = vpop.f32.mrf.mxu2 }
  0xb0   : > { %v507_v56 = vpop.f32.mrf.mxu3  ;;  %v276_v57 = vpop.f32.mrf.mxu0  ;;  %v423_v1 = vadd.f32 %v419_v55, %v336_v63 }
  0xb2   : > { %v511_v5 = vadd.f32 %v507_v56, %v423_v1 }
  0xb3   : > { %v337_v58 = vpop.f32.mrf.mxu1 }
  0xb7   : > { %v421_v59 = vpop.f32.mrf.mxu2 }
  0xb8   : > { %v509_v60 = vpop.f32.mrf.mxu3 }
  0xc8   : > { %v599_v61 = vpop.f32.mrf.mxu0 }
  0xc9   : > { %v603_v7 = vadd.f32 %v599_v61, %v511_v5 }
  0xcb   : > { %v684_v62 = vpop.f32.mrf.mxu1 }
  0xcc   : > { %v688_v9 = vadd.f32 %v684_v62, %v603_v7 }
  0xcf   : > { %v764_v0 = vpop.f32.mrf.mxu2 }
  0xd0   : > { %v858_v2 = vpop.f32.mrf.mxu3  ;;  %v601_v3 = vpop.f32.mrf.mxu0  ;;  %v768_v10 = vadd.f32 %v764_v0, %v688_v9 }
  0xd2   : > { %v862_v11 = vadd.f32 %v858_v2, %v768_v10 }
  0xd3   : > { %v686_v4 = vpop.f32.mrf.mxu1 }
  0xd7   : > { %v766_v6 = vpop.f32.mrf.mxu2 }
  0xd8   : > { %v860_v8 = vpop.f32.mrf.mxu3 }
  0xe8   : > { %v943_v13 = vpop.f32.mrf.mxu0 }
  0xe9   : > { %v947_v14 = vadd.f32 %v943_v13, %v862_v11 }
  0xeb   : > { %v952_v15 = vadd.f32 %v1515_v12, %v947_v14 }
  0xed   : > { %v953_v16 = vmax.f32 %v952_v15, 0.0 }
  0xef   : > { %v954_v17 = vpack.c.bf16 %v953_v16, %v953_v16 }
  0xf0   : > { %v945_v18 = vpop.f32.mrf.mxu0 }
  0xf1   : > { %955 = vst [vmem:[%s168_s20] sm:$0xf] %v954_v17 }
  0xf2 PF: > { %s13_s12 = sadd.s32 1, %s1522_s12  }
  0xf3   : > { %p10_p4 = scmp.ge.s32.totalorder %s13_s12, 4  }
  0xf5   :  { %12 = sbr.rel (!%p10_p4) target bundleno = 1 (0x1), region = 70 }

// kernel: deep_transfer_forward.13
= control target key start
LH: loop header
LB: loop body
LE: loop exit
PB: predicated region body
PF: predicated region fallthrough
CT: control target
= control target key end

     0   :  { %vm612_vm0 = vcmask 80896   ;;  %s1153_s1 = inlined_call_operand.vmem [shape: bf16[512,128], index: 1, kind: input, shape index: {}]   ;;  %s1154_s2 = inlined_call_operand.vmem [shape: f32[1,128], index: 2, kind: input, shape index: {}]   ;;  %s1155_s0 = inlined_call_operand.vmem [shape: bf16[8,512], index: 0, kind: input, shape index: {}]   ;;  %s1156_s3 = inlined_call_operand.vmem [shape: bf16[128,128], index: 3, kind: input, shape index: {}]   ;;  %s1157_s4 = inlined_call_operand.vmem [shape: f32[1,128], index: 4, kind: input, shape index: {}]   ;;  %s1158_s5 = inlined_call_operand.vmem [shape: bf16[128,128], index: 5, kind: input, shape index: {}]   ;;  %s1159_s9 = inlined_call_operand.vmem [shape: bf16[8,128], index: 9, kind: output, shape index: {0}]   ;;  %s1160_s6 = inlined_call_operand.vmem [shape: f32[1,128], index: 6, kind: input, shape index: {}]   ;;  %s1161_s7 = inlined_call_operand.vmem [shape: bf16[128,10], index: 7, kind: input, shape index: {}]   ;;  %s1162_s8 = inlined_call_operand.vmem [shape: f32[1,10], index: 8, kind: input, shape index: {}]   ;;  %s1163_s10 = inlined_call_operand.vmem [shape: f32[8,10], index: 10, kind: output, shape index: {1}]  }
   0x1   :  { %v853_v0 = vld [vmem:[%s1153_s1 + $0x38] sm:$0xff]  ;;  %v852_v4 = vld [vmem:[%s1153_s1 + $0x30] sm:$0xff]  ;;  %v851_v8 = vld [vmem:[%s1153_s1 + $0x28] sm:$0xff] }
   0x2   :  { %v861_v1 = vld [vmem:[%s1153_s1 + $0x78] sm:$0xff]  ;;  %310 = vmatpush.bf16.msra.mxu0 %v853_v0  ;;  %v860_v5 = vld [vmem:[%s1153_s1 + $0x70] sm:$0xff]  ;;  %v859_v9 = vld [vmem:[%s1153_s1 + $0x68] sm:$0xff] }
   0x3   :  { %v869_v2 = vld [vmem:[%s1153_s1 + $0xb8] sm:$0xff]  ;;  %323 = vmatpush.bf16.msra.mxu1 %v861_v1  ;;  %v868_v6 = vld [vmem:[%s1153_s1 + $0xb0] sm:$0xff]  ;;  %v867_v10 = vld [vmem:[%s1153_s1 + $0xa8] sm:$0xff] }
   0x4   :  { %v877_v3 = vld [vmem:[%s1153_s1 + $0xf8] sm:$0xff]  ;;  %336 = vmatpush.bf16.msra.mxu2 %v869_v2  ;;  %v876_v7 = vld [vmem:[%s1153_s1 + $0xf0] sm:$0xff]  ;;  %v875_v11 = vld [vmem:[%s1153_s1 + $0xe8] sm:$0xff] }
   0x5   :  { %349 = vmatpush.bf16.msra.mxu3 %v877_v3  ;;  %v850_v12 = vld [vmem:[%s1153_s1 + $0x20] sm:$0xff]  ;;  %v849_v16 = vld [vmem:[%s1153_s1 + $0x18] sm:$0xff]  ;;  %v848_v20 = vld [vmem:[%s1153_s1 + $0x10] sm:$0xff] }
   0x6   :  { %311 = vmatpush.bf16.msra.mxu0 %v852_v4  ;;  %v858_v13 = vld [vmem:[%s1153_s1 + $0x60] sm:$0xff]  ;;  %v857_v17 = vld [vmem:[%s1153_s1 + $0x58] sm:$0xff]  ;;  %v856_v21 = vld [vmem:[%s1153_s1 + $0x50] sm:$0xff] }
   0x7   :  { %324 = vmatpush.bf16.msra.mxu1 %v860_v5  ;;  %v866_v14 = vld [vmem:[%s1153_s1 + $0xa0] sm:$0xff]  ;;  %v865_v18 = vld [vmem:[%s1153_s1 + $0x98] sm:$0xff]  ;;  %v864_v22 = vld [vmem:[%s1153_s1 + $0x90] sm:$0xff] }
   0x8   :  { %337 = vmatpush.bf16.msra.mxu2 %v868_v6  ;;  %v874_v15 = vld [vmem:[%s1153_s1 + $0xe0] sm:$0xff]  ;;  %v873_v19 = vld [vmem:[%s1153_s1 + $0xd8] sm:$0xff]  ;;  %v872_v23 = vld [vmem:[%s1153_s1 + $0xd0] sm:$0xff] }
   0x9   :  { %350 = vmatpush.bf16.msra.mxu3 %v876_v7  ;;  %v847_v24 = vld [vmem:[%s1153_s1 + $0x8] sm:$0xff]  ;;  %v34_v26 = vld [vmem:[%s1155_s0] sm:$0xff]  ;;  %v885_v38 = vld [vmem:[%s1156_s3 + $0x38] sm:$0xff] }
   0xa   :  { %312 = vmatpush.bf16.msra.mxu0 %v851_v8  ;;  %v855_v25 = vld [vmem:[%s1153_s1 + $0x48] sm:$0xff]  ;;  %v106_v30 = vunpack.c.l.b16 %v34_v26  ;;  %v107_v31 = vunpack.c.h.b16 %v34_v26  ;;  %v846_v32 = vld [vmem:[%s1153_s1] sm:$0xff]  ;;  %v884_v43 = vld [vmem:[%s1156_s3 + $0x30] sm:$0xff] }
   0xb   :  { %325 = vmatpush.bf16.msra.mxu1 %v859_v9  ;;  %v863_v27 = vld [vmem:[%s1153_s1 + $0x88] sm:$0xff]  ;;  %v854_v33 = vld [vmem:[%s1153_s1 + $0x40] sm:$0xff]  ;;  %v881_v46 = vld [vmem:[%s1156_s3 + $0x18] sm:$0xff] }
   0xc   :  { %338 = vmatpush.bf16.msra.mxu2 %v867_v10  ;;  %v871_v28 = vld [vmem:[%s1153_s1 + $0xc8] sm:$0xff]  ;;  %v862_v36 = vld [vmem:[%s1153_s1 + $0x80] sm:$0xff]  ;;  %v110_v39 = vpack.c.b16 %v106_v30, %v106_v30  ;;  %v111_v40 = vpack.c.b16 %v107_v31, %v107_v31  ;;  %v880_v47 = vld [vmem:[%s1156_s3 + $0x10] sm:$0xff] }
   0xd   :  { %351 = vmatpush.bf16.msra.mxu3 %v875_v11  ;;  %v35_v29 = vld [vmem:[%s1155_s0 + $0x8] sm:$0xff]  ;;  %v870_v37 = vld [vmem:[%s1153_s1 + $0xc0] sm:$0xff]  ;;  %v893_v50 = vld [vmem:[%s1158_s5 + $0x38] sm:$0xff] }
   0xe   :  { %313 = vmatpush.bf16.msra.mxu0 %v850_v12  ;;  %v108_v34 = vunpack.c.l.b16 %v35_v29  ;;  %v109_v35 = vunpack.c.h.b16 %v35_v29  ;;  %v883_v44 = vld [vmem:[%s1156_s3 + $0x28] sm:$0xff]  ;;  %v882_v45 = vld [vmem:[%s1156_s3 + $0x20] sm:$0xff]  ;;  %v892_v51 = vld [vmem:[%s1158_s5 + $0x30] sm:$0xff] }
   0xf   :  { %326 = vmatpush.bf16.msra.mxu1 %v858_v13  ;;  %v879_v48 = vld [vmem:[%s1156_s3 + $0x8] sm:$0xff]  ;;  %v878_v49 = vld [vmem:[%s1156_s3] sm:$0xff]  ;;  %v889_v55 = vld [vmem:[%s1158_s5 + $0x18] sm:$0xff] }
  0x10   :  { %339 = vmatpush.bf16.msra.mxu2 %v866_v14  ;;  %v112_v41 = vpack.c.b16 %v108_v34, %v108_v34  ;;  %v113_v42 = vpack.c.b16 %v109_v35, %v109_v35  ;;  %v891_v52 = vld [vmem:[%s1158_s5 + $0x28] sm:$0xff]  ;;  %v890_v53 = vld [vmem:[%s1158_s5 + $0x20] sm:$0xff]  ;;  %v888_v59 = vld [vmem:[%s1158_s5 + $0x10] sm:$0xff] }
  0x11   :  { %352 = vmatpush.bf16.msra.mxu3 %v874_v15  ;;  %v902_v54 = vld [vmem:[%s1154_s2] ss:$0 sm:$0xff]  ;;  %v887_v7 = vld [vmem:[%s1158_s5 + $0x8] sm:$0xff]  ;;  %v901_v9 = vld [vmem:[%s1161_s7 + $0x38] sm:$0xff] }
  0x12   :  { %314 = vmatpush.bf16.msra.mxu0 %v849_v16  ;;  %v886_v8 = vld [vmem:[%s1158_s5] sm:$0xff]  ;;  %v900_v10 = vld [vmem:[%s1161_s7 + $0x30] sm:$0xff]  ;;  %v899_v11 = vld [vmem:[%s1161_s7 + $0x28] sm:$0xff] }
  0x13   :  { %327 = vmatpush.bf16.msra.mxu1 %v857_v17  ;;  %v898_v12 = vld [vmem:[%s1161_s7 + $0x20] sm:$0xff]  ;;  %v897_v13 = vld [vmem:[%s1161_s7 + $0x18] sm:$0xff]  ;;  %v896_v14 = vld [vmem:[%s1161_s7 + $0x10] sm:$0xff] }
  0x14   :  { %340 = vmatpush.bf16.msra.mxu2 %v865_v18  ;;  %v903_v15 = vld [vmem:[%s1157_s4] ss:$0 sm:$0xff] }
  0x15   :  { %353 = vmatpush.bf16.msra.mxu3 %v873_v19  ;;  %v905_v29 = vld [vmem:[%s1162_s8] ss:$0 sm:$0xff] }
  0x16   :  { %315 = vmatpush.bf16.msra.mxu0 %v848_v20 }
  0x17   :  { %328 = vmatpush.bf16.msra.mxu1 %v856_v21  ;;  %v895_v21 = vld [vmem:[%s1161_s7 + $0x8] sm:$0xff] }
  0x18   :  { %341 = vmatpush.bf16.msra.mxu2 %v864_v22  ;;  %v894_v22 = vld [vmem:[%s1161_s7] sm:$0xff] }
  0x19   :  { %354 = vmatpush.bf16.msra.mxu3 %v872_v23  ;;  %v904_v23 = vld [vmem:[%s1160_s6] ss:$0 sm:$0xff] }
  0x1a   :  { %316 = vmatpush.bf16.msra.mxu0 %v847_v24 }
  0x1b   :  { %329 = vmatpush.bf16.msra.mxu1 %v855_v25 }
  0x1c   :  { %342 = vmatpush.bf16.msra.mxu2 %v863_v27 }
  0x1d   :  { %355 = vmatpush.bf16.msra.mxu3 %v871_v28 }
  0x1e   :  { %317 = vmatpush.bf16.msra.mxu0 %v846_v32 }
  0x1f   :  { %330 = vmatpush.bf16.msra.mxu1 %v854_v33 }
  0x20   :  { %343 = vmatpush.bf16.msra.mxu2 %v862_v36 }
  0x21   :  { %356 = vmatpush.bf16.msra.mxu3 %v870_v37  ;;  %318 = vmatmul.bf16.vlgmr.msra.gmra.mxu0 %v110_v39 }
  0x22   :  { %433 = vmatpush.bf16.msrb.mxu0 %v885_v38  ;;  %331 = vmatmul.bf16.vlgmr.msra.gmra.mxu1 %v111_v40 }
  0x23   :  { %344 = vmatmul.bf16.vlgmr.msra.gmra.mxu2 %v112_v41  ;;  %516 = vmatpush.bf16.msrb.mxu1 %v893_v50 }
  0x24   :  { %357 = vmatmul.bf16.vlgmr.msra.gmra.mxu3 %v113_v42  ;;  %599 = vmatpush.bf16.msrb.mxu2 %v901_v9 }
  0x26   :  { %434 = vmatpush.bf16.msrb.mxu0 %v884_v43 }
  0x27   :  { %517 = vmatpush.bf16.msrb.mxu1 %v892_v51 }
  0x28   :  { %600 = vmatpush.bf16.msrb.mxu2 %v900_v10 }
  0x2a   :  { %435 = vmatpush.bf16.msrb.mxu0 %v883_v44 }
  0x2b   :  { %518 = vmatpush.bf16.msrb.mxu1 %v891_v52 }
  0x2c   :  { %601 = vmatpush.bf16.msrb.mxu2 %v899_v11 }
  0x2e   :  { %436 = vmatpush.bf16.msrb.mxu0 %v882_v45 }
  0x2f   :  { %519 = vmatpush.bf16.msrb.mxu1 %v890_v53 }
  0x30   :  { %602 = vmatpush.bf16.msrb.mxu2 %v898_v12 }
  0x32   :  { %437 = vmatpush.bf16.msrb.mxu0 %v881_v46 }
  0x33   :  { %520 = vmatpush.bf16.msrb.mxu1 %v889_v55 }
  0x34   :  { %603 = vmatpush.bf16.msrb.mxu2 %v897_v13 }
  0x36   :  { %438 = vmatpush.bf16.msrb.mxu0 %v880_v47 }
  0x37   :  { %521 = vmatpush.bf16.msrb.mxu1 %v888_v59 }
  0x38   :  { %604 = vmatpush.bf16.msrb.mxu2 %v896_v14 }
  0x3a   :  { %439 = vmatpush.bf16.msrb.mxu0 %v879_v48 }
  0x3b   :  { %522 = vmatpush.bf16.msrb.mxu1 %v887_v7 }
  0x3c   :  { %605 = vmatpush.bf16.msrb.mxu2 %v895_v21 }
  0x3e   :  { %440 = vmatpush.bf16.msrb.mxu0 %v878_v49 }
  0x3f   :  { %523 = vmatpush.bf16.msrb.mxu1 %v886_v8 }
  0x40   :  { %606 = vmatpush.bf16.msrb.mxu2 %v894_v22 }
  0x9e   :  { %v319_v56 = vpop.f32.mrf.mxu0 }
  0x9f   :  { %v332_v57 = vpop.f32.mrf.mxu1  ;;  %v320_v58 = vadd.f32 %v902_v54, %v319_v56 }
  0xa1   :  { %v333_v60 = vadd.f32 %v332_v57, %v320_v58 }
  0xa6   :  { %v345_v61 = vpop.f32.mrf.mxu2  ;;  %v321_v0 = vpop.f32.mrf.mxu0 }
  0xa7   :  { %v358_v62 = vpop.f32.mrf.mxu3  ;;  %v346_v63 = vadd.f32 %v345_v61, %v333_v60  ;;  %v334_v1 = vpop.f32.mrf.mxu1 }
  0xa9   :  { %v359_v2 = vadd.f32 %v358_v62, %v346_v63 }
  0xab   :  { %v362_v3 = vmax.f32 %v359_v2, 0.0 }
  0xad   :  { %v363_v4 = vpack.c.bf16 %v362_v3, %v362_v3 }
  0xae   :  { %v347_v5 = vpop.f32.mrf.mxu2 }
  0xaf   :  { %v360_v6 = vpop.f32.mrf.mxu3  ;;  %364 = vst [vmem:[%s1159_s9] sm:$0xf] %v363_v4  ;;  %441 = vmatmul.bf16.vlgmr.msrb.gmra.mxu0 %v363_v4 }
 0x12c   :  { %v442_v16 = vpop.f32.mrf.mxu0 }
 0x12d   :  { %v443_v17 = vadd.f32 %v903_v15, %v442_v16 }
 0x12f   :  { %v446_v18 = vmax.f32 %v443_v17, 0.0 }
 0x131   :  { %v447_v19 = vpack.c.bf16 %v446_v18, %v446_v18 }
 0x133   :  { %524 = vmatmul.bf16.vlgmr.msrb.gmra.mxu1 %v447_v19 }
 0x134   :  { %v444_v20 = vpop.f32.mrf.mxu0 }
 0x1b0   :  { %v525_v24 = vpop.f32.mrf.mxu1 }
 0x1b1   :  { %v526_v25 = vadd.f32 %v904_v23, %v525_v24 }
 0x1b3   :  { %v529_v26 = vmax.f32 %v526_v25, 0.0 }
 0x1b5   :  { %v530_v27 = vpack.c.bf16 %v529_v26, %v529_v26 }
 0x1b7   :  { %607 = vmatmul.bf16.vlgmr.msrb.gmra.mxu2 %v530_v27 }
 0x1b8   :  { %v527_v28 = vpop.f32.mrf.mxu1 }
 0x23a   :  { %v608_v30 = vpop.f32.mrf.mxu2 }
 0x23b   :  { %v609_v31 = vadd.f32 %v905_v29, %v608_v30 }
 0x23d   :  { %613 = vst.msk [vmem:[%s1163_s10] sm:$0xff] %vm612_vm0, %v609_v31 }
 0x242   :  { %v610_v32 = vpop.f32.mrf.mxu2 }

</bundles_post_ra>
